<compile_context>
chip_gen: v7x
topology: tpu7x:2x2x1
jax: 0.10.0
libtpu: 0.0.40
codegen_flags: <defaults>
</compile_context>

<pallas_src>
import jax
import jax.numpy as jnp
from jax.experimental import pallas as pl
from jax.experimental.pallas import tpu as pltpu

EPS = 1e-5  # BatchNorm2d default eps


# --------------------------------------------------------------------------- kernels
def _conv_stats_kernel(x_ref, w_ref, y_ref, s_ref):
    """Fused (nearest-2x upsample -> 3x3 conv) for one image, phase-decomposed.

    x_ref: (1, Hin+2, Win+2, Cin)   bf16  zero-padded original-resolution image
    w_ref: (16, Cin, Cout)          bf16  2x2 phase weights, index = ((a*2+b)*2+d)*2+e
    y_ref: (2, 1, Hin*Win, 2*Cout)  bf16  conv output: [a, 0, i*Win+j, b*Cout+c]
    s_ref: (1, 2, 4*Cout)           f32   row0 = per-(phase,c) sums, row1 = centered M2
    """
    Hp, Wp, Cin = x_ref.shape[1], x_ref.shape[2], x_ref.shape[3]
    Hin, Win = Hp - 2, Wp - 2
    Cout = w_ref.shape[-1]
    M = Hin * Win

    xp = x_ref[0]                                        # (Hin+2, Win+2, Cin) bf16
    # In-kernel im2col: 9 shifted views of the padded image (VMEM slices only; the
    # leading-dim merge reshape keeps the minor dim, so it is layout-preserving).
    views = {}
    for r in range(3):
        for c in range(3):
            views[(r, c)] = xp[r:r + Hin, c:c + Win, :].reshape(M, Cin)

    ones_row = jnp.ones((1, M), jnp.float32)             # MXU cross-row reduction helper
    accs, sums, m2s = [], [], []
    for a in range(2):
        for b in range(2):
            acc = None
            for d in range(2):
                for e in range(2):
                    wi = w_ref[((a * 2 + b) * 2 + d) * 2 + e]           # (Cin, Cout)
                    p = jnp.dot(views[(a + d, b + e)], wi,
                                preferred_element_type=jnp.float32)     # (M, Cout) f32
                    acc = p if acc is None else acc + p
            accs.append(acc)
            # Per-(image, phase, channel) moments centered at the group mean so the
            # wrapper can combine them Welford-style (no catastrophic cancellation).
            csum = jnp.dot(ones_row, acc, preferred_element_type=jnp.float32)   # (1,Cout)
            dc = acc - csum * (1.0 / M)
            m2 = jnp.dot(ones_row, dc * dc, preferred_element_type=jnp.float32)
            sums.append(csum)
            m2s.append(m2)

    # Row-phase a is separated by output placement (no in-kernel transpose); within a
    # slab the columns are (b, c), matching the final interleaved layout.
    cat0 = jnp.concatenate([accs[0], accs[1]], axis=-1)   # a=0  (M, 2*Cout)
    cat1 = jnp.concatenate([accs[2], accs[3]], axis=-1)   # a=1
    y_ref[0, 0] = cat0.astype(y_ref.dtype)                # bf16 intermediate writeback
    y_ref[1, 0] = cat1.astype(y_ref.dtype)

    # Two row stores (no sublane shuffle).
    s_ref[0, 0:1, :] = jnp.concatenate(sums, axis=-1)
    s_ref[0, 1:2, :] = jnp.concatenate(m2s, axis=-1)


def _bn_relu_kernel(y_ref, scale_ref, shift_ref, o_ref):
    """Affine normalize + ReLU; interleaves both row-phase slabs of one image.

    y_ref:  (2, 1, Hin, Wl)  bf16   Wl = Win*2*Cout, columns ordered (j, b, c)
    scale_ref / shift_ref: (1, Wl)  f32 per-column affine (pattern repeats every Cout)
    o_ref:  (1, Hin, 2*Wl)   f32    columns ordered (a, j, b, c)  == upsampled NHWC rows
    """
    Wl = y_ref.shape[-1]
    s = scale_ref[...]
    t = shift_ref[...]
    # 128-aligned lane-slab stores (Wl is a multiple of 128 whenever Win*Cout >= 64).
    o_ref[0, :, 0:Wl] = jnp.maximum(y_ref[0, 0].astype(jnp.float32) * s + t, 0.0)
    o_ref[0, :, Wl:2 * Wl] = jnp.maximum(y_ref[1, 0].astype(jnp.float32) * s + t, 0.0)


# --------------------------------------------------------------------------- helpers
def _phase_weights(w):
    """OIHW (Cout, Cin, 3, 3) -> (16, Cin, Cout) per-(phase, tap) effective 2x2 weights.

    Output phase (a, b) of (nearest-2x upsample -> 3x3 conv, pad=1) is an effective 2x2
    conv on the zero-padded ORIGINAL input reading rows {i+a, i+a+1} / cols {j+b, j+b+1};
    A[a, d, k] says which original taps k collapse onto offset a+d.
    """
    A = jnp.array([[[1., 0., 0.], [0., 1., 1.]],
                   [[1., 1., 0.], [0., 0., 1.]]], dtype=jnp.float32)     # A[a, d, k]
    w_eff = jnp.einsum('adk,bel,oikl->abdeio', A, A, w.astype(jnp.float32))
    cout, cin = w.shape[0], w.shape[1]
    return w_eff.reshape(16, cin, cout)                  # flat index ((a*2+b)*2+d)*2+e


# --------------------------------------------------------------------------- forward
def upsampling_forward(x, w, b, gamma, beta):
    """x: (N, Cin, Hin, Win) f32 NCHW.  Returns (N, Cout, 2*Hin, 2*Win) f32 NCHW."""
    N, Cin, Hin, Win = x.shape
    Cout = w.shape[0]
    M = Hin * Win                 # GEMM rows per image (original-resolution pixels)
    Wl = Win * 2 * Cout           # lane width of one row-phase slab
    n_pix = N * 4 * M             # output pixels per channel (BN statistics count)

    # Conv bias intentionally NOT applied: under training-mode BatchNorm it shifts the
    # per-channel mean only and cancels exactly in the normalized output.
    del b

    # Cheap input-side glue at ORIGINAL resolution only: NCHW->NHWC, 1-pixel pad, bf16.
    x_nhwc = jnp.transpose(x, (0, 2, 3, 1))
    x_pad = jnp.pad(x_nhwc, ((0, 0), (1, 1), (1, 1), (0, 0))).astype(jnp.bfloat16)
    w16 = _phase_weights(w).astype(jnp.bfloat16)          # (16, Cin, Cout)

    # --- pass 1: per-image in-kernel im2col + 16 K=Cin matmuls + centered moments ---
    # TODO(synk): at production H*W switch the grid to (N, cdiv(Hin, BAND)) with a
    # manual halo'd row-band DMA (memory_space=pl.ANY + make_async_copy, Buffered
    # invariant weights, explicit vmem_limit_bytes for v7x's 64 MiB); whole padded
    # images fit trivially in VMEM at demo sizes.
    y_all, stats = pl.pallas_call(
        _conv_stats_kernel,
        out_shape=(jax.ShapeDtypeStruct((2, N, M, 2 * Cout), jnp.bfloat16),
                   jax.ShapeDtypeStruct((N, 2, 4 * Cout), jnp.float32)),
        grid=(N,),
        in_specs=[pl.BlockSpec((1, Hin + 2, Win + 2, Cin), lambda n: (n, 0, 0, 0)),
                  pl.BlockSpec((16, Cin, Cout), lambda n: (0, 0, 0))],
        out_specs=(pl.BlockSpec((2, 1, M, 2 * Cout), lambda n: (0, n, 0, 0)),
                   pl.BlockSpec((1, 2, 4 * Cout), lambda n: (n, 0, 0))),
        compiler_params=pltpu.CompilerParams(dimension_semantics=("parallel",)),
    )(x_pad, w16)

    # --- exact global BatchNorm statistics (Welford-style combination in f32) ---
    S = stats[:, 0, :].reshape(N, 4, Cout)                # per (image, phase, channel)
    M2 = stats[:, 1, :].reshape(N, 4, Cout)
    mean = jnp.sum(S, axis=(0, 1)) / n_pix
    mu_g = S / M
    var = (jnp.sum(M2, axis=(0, 1))
           + M * jnp.sum((mu_g - mean) ** 2, axis=(0, 1))) / n_pix   # biased variance
    inv = jax.lax.rsqrt(var + EPS)
    scale = gamma.astype(jnp.float32) * inv
    shift = beta.astype(jnp.float32) - mean * scale

    # --- pass 2: affine normalize + ReLU; output placement interleaves the row phase,
    # so the result is already upsampled NHWC (only free reshapes of the same bytes). ---
    scale_row = jnp.tile(scale, 2 * Win).reshape(1, Wl)   # column pattern repeats / Cout
    shift_row = jnp.tile(shift, 2 * Win).reshape(1, Wl)
    out2d = pl.pallas_call(
        _bn_relu_kernel,
        out_shape=jax.ShapeDtypeStruct((N, Hin, 2 * Wl), jnp.float32),
        grid=(N,),
        in_specs=[pl.BlockSpec((2, 1, Hin, Wl), lambda n: (0, n, 0, 0)),
                  pl.BlockSpec((1, Wl), lambda n: (0, 0)),
                  pl.BlockSpec((1, Wl), lambda n: (0, 0))],
        out_specs=pl.BlockSpec((1, Hin, 2 * Wl), lambda n: (n, 0, 0)),
        compiler_params=pltpu.CompilerParams(dimension_semantics=("parallel",)),
    )(y_all.reshape(2, N, Hin, Wl), scale_row, shift_row)   # free HBM reshape

    out_nhwc = out2d.reshape(N, 2 * Hin, 2 * Win, Cout)      # free reshape
    # TODO(synk): fold this last full-output transpose away by computing the conv in a
    # channel-major (Cout x pixels) GEMM orientation so pass 2 emits NCHW blocks directly.
    return jnp.transpose(out_nhwc, (0, 3, 1, 2))


# --------------------------------------------------------------------------- reference
def reference(x, w, b, gamma, beta):
    """Pure-JAX f32 reference matching the PyTorch forward (training-mode BN)."""
    x_up = jnp.repeat(jnp.repeat(x, 2, axis=2), 2, axis=3)
    y = jax.lax.conv_general_dilated(
        x_up, w, window_strides=(1, 1), padding=((1, 1), (1, 1)),
        dimension_numbers=("NCHW", "OIHW", "NCHW"),
        precision=jax.lax.Precision.HIGHEST)
    y = y + b[None, :, None, None]
    mean = jnp.mean(y, axis=(0, 2, 3), keepdims=True)
    var = jnp.mean((y - mean) ** 2, axis=(0, 2, 3), keepdims=True)
    y = (y - mean) * jax.lax.rsqrt(var + EPS)
    y = y * gamma[None, :, None, None] + beta[None, :, None, None]
    return jnp.maximum(y, 0.0)


if __name__ == "__main__":
    N, in_ch, out_ch, Hin, Win = 2, 4, 8, 16, 16

    key = jax.random.PRNGKey(0)
    kx, kw, kb, kg, ke = jax.random.split(key, 5)
    x = jax.random.normal(kx, (N, in_ch, Hin, Win), dtype=jnp.float32)
    # PyTorch parameter shapes: Conv2d weight OIHW, bias O; BN weight/bias O.
    w = 0.1 * jax.random.normal(kw, (out_ch, in_ch, 3, 3), dtype=jnp.float32)
    b = 0.05 * jax.random.normal(kb, (out_ch,), dtype=jnp.float32)
    gamma = 1.0 + 0.1 * jax.random.normal(kg, (out_ch,), dtype=jnp.float32)
    beta = 0.1 * jax.random.normal(ke, (out_ch,), dtype=jnp.float32)

    out = jax.block_until_ready(upsampling_forward(x, w, b, gamma, beta))

    ref = reference(x, w, b, gamma, beta)
    assert out.shape == (N, out_ch, 2 * Hin, 2 * Win), out.shape
    err = float(jnp.max(jnp.abs(out - ref)))
    assert jnp.allclose(out, ref, atol=2e-2, rtol=2e-2), err

    print("KERNEL_OK")
</pallas_src>

<mosaic_0001>
module attributes {stable_mosaic.version = 11 : i64} {
  func.func @_conv_stats_kernel(%arg0: i32, %arg1: memref<1x18x18x4xbf16, #tpu.memory_space<vmem>>, %arg2: memref<16x4x8xbf16, #tpu.memory_space<vmem>>, %arg3: memref<2x1x256x16xbf16, #tpu.memory_space<vmem>>, %arg4: memref<1x2x32xf32, #tpu.memory_space<vmem>>) attributes {dimension_semantics = [#tpu.dimension_semantics<parallel>], iteration_bounds = array<i64: 2>, scalar_prefetch = 0 : i64, scratch_operands = 0 : i64, tpu.core_type = #tpu.core_type<tc>, window_params = [{transform_indices = @transform_0, window_bounds = array<i64: 1, 18, 18, 4>}, {pipeline_mode = #tpu.pipeline_mode<synchronous>, transform_indices = @transform_1, window_bounds = array<i64: 16, 4, 8>}, {transform_indices = @transform_2, window_bounds = array<i64: 2, 1, 256, 16>}, {transform_indices = @transform_3, window_bounds = array<i64: 1, 2, 32>}]} {
    %c0 = arith.constant 0 : index
    %c0_0 = arith.constant 0 : index
    %c0_1 = arith.constant 0 : index
    %c0_2 = arith.constant 0 : index
    %0 = vector.load %arg1[%c0, %c0_0, %c0_1, %c0_2] : memref<1x18x18x4xbf16, #tpu.memory_space<vmem>>, vector<1x18x18x4xbf16>
    %1 = vector.shape_cast %0 : vector<1x18x18x4xbf16> to vector<18x18x4xbf16>
    %2 = vector.extract_strided_slice %1 {offsets = [0, 0, 0], sizes = [16, 16, 4], strides = [1, 1, 1]} : vector<18x18x4xbf16> to vector<16x16x4xbf16>
    %3 = vector.shape_cast %2 : vector<16x16x4xbf16> to vector<256x4xbf16>
    %4 = vector.extract_strided_slice %1 {offsets = [0, 1, 0], sizes = [16, 16, 4], strides = [1, 1, 1]} : vector<18x18x4xbf16> to vector<16x16x4xbf16>
    %5 = vector.shape_cast %4 : vector<16x16x4xbf16> to vector<256x4xbf16>
    %6 = vector.extract_strided_slice %1 {offsets = [0, 2, 0], sizes = [16, 16, 4], strides = [1, 1, 1]} : vector<18x18x4xbf16> to vector<16x16x4xbf16>
    %7 = vector.shape_cast %6 : vector<16x16x4xbf16> to vector<256x4xbf16>
    %8 = vector.extract_strided_slice %1 {offsets = [1, 0, 0], sizes = [16, 16, 4], strides = [1, 1, 1]} : vector<18x18x4xbf16> to vector<16x16x4xbf16>
    %9 = vector.shape_cast %8 : vector<16x16x4xbf16> to vector<256x4xbf16>
    %10 = vector.extract_strided_slice %1 {offsets = [1, 1, 0], sizes = [16, 16, 4], strides = [1, 1, 1]} : vector<18x18x4xbf16> to vector<16x16x4xbf16>
    %11 = vector.shape_cast %10 : vector<16x16x4xbf16> to vector<256x4xbf16>
    %12 = vector.extract_strided_slice %1 {offsets = [1, 2, 0], sizes = [16, 16, 4], strides = [1, 1, 1]} : vector<18x18x4xbf16> to vector<16x16x4xbf16>
    %13 = vector.shape_cast %12 : vector<16x16x4xbf16> to vector<256x4xbf16>
    %14 = vector.extract_strided_slice %1 {offsets = [2, 0, 0], sizes = [16, 16, 4], strides = [1, 1, 1]} : vector<18x18x4xbf16> to vector<16x16x4xbf16>
    %15 = vector.shape_cast %14 : vector<16x16x4xbf16> to vector<256x4xbf16>
    %16 = vector.extract_strided_slice %1 {offsets = [2, 1, 0], sizes = [16, 16, 4], strides = [1, 1, 1]} : vector<18x18x4xbf16> to vector<16x16x4xbf16>
    %17 = vector.shape_cast %16 : vector<16x16x4xbf16> to vector<256x4xbf16>
    %18 = vector.extract_strided_slice %1 {offsets = [2, 2, 0], sizes = [16, 16, 4], strides = [1, 1, 1]} : vector<18x18x4xbf16> to vector<16x16x4xbf16>
    %19 = vector.shape_cast %18 : vector<16x16x4xbf16> to vector<256x4xbf16>
    %cst = arith.constant 1.000000e+00 : f32
    %20 = vector.broadcast %cst : f32 to vector<1x256xf32>
    %c0_3 = arith.constant 0 : index
    %c0_4 = arith.constant 0 : index
    %c0_5 = arith.constant 0 : index
    %21 = vector.load %arg2[%c0_3, %c0_4, %c0_5] : memref<16x4x8xbf16, #tpu.memory_space<vmem>>, vector<1x4x8xbf16>
    %22 = vector.shape_cast %21 : vector<1x4x8xbf16> to vector<4x8xbf16>
    %cst_6 = arith.constant dense<0.000000e+00> : vector<256x8xf32>
    %23 = tpu.matmul %3, %22, %cst_6 {dimension_numbers = #tpu.dot_dimension_numbers<[1], [0], [0], [1], [0, 0, 1, 1], [], []>} : vector<256x4xbf16>, vector<4x8xbf16>, vector<256x8xf32> -> vector<256x8xf32>
    %c1 = arith.constant 1 : index
    %c0_7 = arith.constant 0 : index
    %c0_8 = arith.constant 0 : index
    %24 = vector.load %arg2[%c1, %c0_7, %c0_8] : memref<16x4x8xbf16, #tpu.memory_space<vmem>>, vector<1x4x8xbf16>
    %25 = vector.shape_cast %24 : vector<1x4x8xbf16> to vector<4x8xbf16>
    %cst_9 = arith.constant dense<0.000000e+00> : vector<256x8xf32>
    %26 = tpu.matmul %5, %25, %cst_9 {dimension_numbers = #tpu.dot_dimension_numbers<[1], [0], [0], [1], [0, 0, 1, 1], [], []>} : vector<256x4xbf16>, vector<4x8xbf16>, vector<256x8xf32> -> vector<256x8xf32>
    %27 = arith.addf %23, %26 : vector<256x8xf32>
    %c2 = arith.constant 2 : index
    %c0_10 = arith.constant 0 : index
    %c0_11 = arith.constant 0 : index
    %28 = vector.load %arg2[%c2, %c0_10, %c0_11] : memref<16x4x8xbf16, #tpu.memory_space<vmem>>, vector<1x4x8xbf16>
    %29 = vector.shape_cast %28 : vector<1x4x8xbf16> to vector<4x8xbf16>
    %cst_12 = arith.constant dense<0.000000e+00> : vector<256x8xf32>
    %30 = tpu.matmul %9, %29, %cst_12 {dimension_numbers = #tpu.dot_dimension_numbers<[1], [0], [0], [1], [0, 0, 1, 1], [], []>} : vector<256x4xbf16>, vector<4x8xbf16>, vector<256x8xf32> -> vector<256x8xf32>
    %31 = arith.addf %27, %30 : vector<256x8xf32>
    %c3 = arith.constant 3 : index
    %c0_13 = arith.constant 0 : index
    %c0_14 = arith.constant 0 : index
    %32 = vector.load %arg2[%c3, %c0_13, %c0_14] : memref<16x4x8xbf16, #tpu.memory_space<vmem>>, vector<1x4x8xbf16>
    %33 = vector.shape_cast %32 : vector<1x4x8xbf16> to vector<4x8xbf16>
    %cst_15 = arith.constant dense<0.000000e+00> : vector<256x8xf32>
    %34 = tpu.matmul %11, %33, %cst_15 {dimension_numbers = #tpu.dot_dimension_numbers<[1], [0], [0], [1], [0, 0, 1, 1], [], []>} : vector<256x4xbf16>, vector<4x8xbf16>, vector<256x8xf32> -> vector<256x8xf32>
    %35 = arith.addf %31, %34 : vector<256x8xf32>
    %cst_16 = arith.constant dense<0.000000e+00> : vector<1x8xf32>
    %36 = tpu.matmul %20, %35, %cst_16 {dimension_numbers = #tpu.dot_dimension_numbers<[1], [0], [0], [1], [0, 0, 1, 1], [], []>} : vector<1x256xf32>, vector<256x8xf32>, vector<1x8xf32> -> vector<1x8xf32>
    %cst_17 = arith.constant 3.906250e-03 : f32
    %37 = vector.broadcast %cst_17 : f32 to vector<1x8xf32>
    %38 = arith.mulf %36, %37 : vector<1x8xf32>
    %39 = vector.broadcast %38 : vector<1x8xf32> to vector<256x8xf32>
    %40 = arith.subf %35, %39 : vector<256x8xf32>
    %41 = arith.mulf %40, %40 : vector<256x8xf32>
    %cst_18 = arith.constant dense<0.000000e+00> : vector<1x8xf32>
    %42 = tpu.matmul %20, %41, %cst_18 {dimension_numbers = #tpu.dot_dimension_numbers<[1], [0], [0], [1], [0, 0, 1, 1], [], []>} : vector<1x256xf32>, vector<256x8xf32>, vector<1x8xf32> -> vector<1x8xf32>
    %c4 = arith.constant 4 : index
    %c0_19 = arith.constant 0 : index
    %c0_20 = arith.constant 0 : index
    %43 = vector.load %arg2[%c4, %c0_19, %c0_20] : memref<16x4x8xbf16, #tpu.memory_space<vmem>>, vector<1x4x8xbf16>
    %44 = vector.shape_cast %43 : vector<1x4x8xbf16> to vector<4x8xbf16>
    %cst_21 = arith.constant dense<0.000000e+00> : vector<256x8xf32>
    %45 = tpu.matmul %5, %44, %cst_21 {dimension_numbers = #tpu.dot_dimension_numbers<[1], [0], [0], [1], [0, 0, 1, 1], [], []>} : vector<256x4xbf16>, vector<4x8xbf16>, vector<256x8xf32> -> vector<256x8xf32>
    %c5 = arith.constant 5 : index
    %c0_22 = arith.constant 0 : index
    %c0_23 = arith.constant 0 : index
    %46 = vector.load %arg2[%c5, %c0_22, %c0_23] : memref<16x4x8xbf16, #tpu.memory_space<vmem>>, vector<1x4x8xbf16>
    %47 = vector.shape_cast %46 : vector<1x4x8xbf16> to vector<4x8xbf16>
    %cst_24 = arith.constant dense<0.000000e+00> : vector<256x8xf32>
    %48 = tpu.matmul %7, %47, %cst_24 {dimension_numbers = #tpu.dot_dimension_numbers<[1], [0], [0], [1], [0, 0, 1, 1], [], []>} : vector<256x4xbf16>, vector<4x8xbf16>, vector<256x8xf32> -> vector<256x8xf32>
    %49 = arith.addf %45, %48 : vector<256x8xf32>
    %c6 = arith.constant 6 : index
    %c0_25 = arith.constant 0 : index
    %c0_26 = arith.constant 0 : index
    %50 = vector.load %arg2[%c6, %c0_25, %c0_26] : memref<16x4x8xbf16, #tpu.memory_space<vmem>>, vector<1x4x8xbf16>
    %51 = vector.shape_cast %50 : vector<1x4x8xbf16> to vector<4x8xbf16>
    %cst_27 = arith.constant dense<0.000000e+00> : vector<256x8xf32>
    %52 = tpu.matmul %11, %51, %cst_27 {dimension_numbers = #tpu.dot_dimension_numbers<[1], [0], [0], [1], [0, 0, 1, 1], [], []>} : vector<256x4xbf16>, vector<4x8xbf16>, vector<256x8xf32> -> vector<256x8xf32>
    %53 = arith.addf %49, %52 : vector<256x8xf32>
    %c7 = arith.constant 7 : index
    %c0_28 = arith.constant 0 : index
    %c0_29 = arith.constant 0 : index
    %54 = vector.load %arg2[%c7, %c0_28, %c0_29] : memref<16x4x8xbf16, #tpu.memory_space<vmem>>, vector<1x4x8xbf16>
    %55 = vector.shape_cast %54 : vector<1x4x8xbf16> to vector<4x8xbf16>
    %cst_30 = arith.constant dense<0.000000e+00> : vector<256x8xf32>
    %56 = tpu.matmul %13, %55, %cst_30 {dimension_numbers = #tpu.dot_dimension_numbers<[1], [0], [0], [1], [0, 0, 1, 1], [], []>} : vector<256x4xbf16>, vector<4x8xbf16>, vector<256x8xf32> -> vector<256x8xf32>
    %57 = arith.addf %53, %56 : vector<256x8xf32>
    %cst_31 = arith.constant dense<0.000000e+00> : vector<1x8xf32>
    %58 = tpu.matmul %20, %57, %cst_31 {dimension_numbers = #tpu.dot_dimension_numbers<[1], [0], [0], [1], [0, 0, 1, 1], [], []>} : vector<1x256xf32>, vector<256x8xf32>, vector<1x8xf32> -> vector<1x8xf32>
    %cst_32 = arith.constant 3.906250e-03 : f32
    %59 = vector.broadcast %cst_32 : f32 to vector<1x8xf32>
    %60 = arith.mulf %58, %59 : vector<1x8xf32>
    %61 = vector.broadcast %60 : vector<1x8xf32> to vector<256x8xf32>
    %62 = arith.subf %57, %61 : vector<256x8xf32>
    %63 = arith.mulf %62, %62 : vector<256x8xf32>
    %cst_33 = arith.constant dense<0.000000e+00> : vector<1x8xf32>
    %64 = tpu.matmul %20, %63, %cst_33 {dimension_numbers = #tpu.dot_dimension_numbers<[1], [0], [0], [1], [0, 0, 1, 1], [], []>} : vector<1x256xf32>, vector<256x8xf32>, vector<1x8xf32> -> vector<1x8xf32>
    %c8 = arith.constant 8 : index
    %c0_34 = arith.constant 0 : index
    %c0_35 = arith.constant 0 : index
    %65 = vector.load %arg2[%c8, %c0_34, %c0_35] : memref<16x4x8xbf16, #tpu.memory_space<vmem>>, vector<1x4x8xbf16>
    %66 = vector.shape_cast %65 : vector<1x4x8xbf16> to vector<4x8xbf16>
    %cst_36 = arith.constant dense<0.000000e+00> : vector<256x8xf32>
    %67 = tpu.matmul %9, %66, %cst_36 {dimension_numbers = #tpu.dot_dimension_numbers<[1], [0], [0], [1], [0, 0, 1, 1], [], []>} : vector<256x4xbf16>, vector<4x8xbf16>, vector<256x8xf32> -> vector<256x8xf32>
    %c9 = arith.constant 9 : index
    %c0_37 = arith.constant 0 : index
    %c0_38 = arith.constant 0 : index
    %68 = vector.load %arg2[%c9, %c0_37, %c0_38] : memref<16x4x8xbf16, #tpu.memory_space<vmem>>, vector<1x4x8xbf16>
    %69 = vector.shape_cast %68 : vector<1x4x8xbf16> to vector<4x8xbf16>
    %cst_39 = arith.constant dense<0.000000e+00> : vector<256x8xf32>
    %70 = tpu.matmul %11, %69, %cst_39 {dimension_numbers = #tpu.dot_dimension_numbers<[1], [0], [0], [1], [0, 0, 1, 1], [], []>} : vector<256x4xbf16>, vector<4x8xbf16>, vector<256x8xf32> -> vector<256x8xf32>
    %71 = arith.addf %67, %70 : vector<256x8xf32>
    %c10 = arith.constant 10 : index
    %c0_40 = arith.constant 0 : index
    %c0_41 = arith.constant 0 : index
    %72 = vector.load %arg2[%c10, %c0_40, %c0_41] : memref<16x4x8xbf16, #tpu.memory_space<vmem>>, vector<1x4x8xbf16>
    %73 = vector.shape_cast %72 : vector<1x4x8xbf16> to vector<4x8xbf16>
    %cst_42 = arith.constant dense<0.000000e+00> : vector<256x8xf32>
    %74 = tpu.matmul %15, %73, %cst_42 {dimension_numbers = #tpu.dot_dimension_numbers<[1], [0], [0], [1], [0, 0, 1, 1], [], []>} : vector<256x4xbf16>, vector<4x8xbf16>, vector<256x8xf32> -> vector<256x8xf32>
    %75 = arith.addf %71, %74 : vector<256x8xf32>
    %c11 = arith.constant 11 : index
    %c0_43 = arith.constant 0 : index
    %c0_44 = arith.constant 0 : index
    %76 = vector.load %arg2[%c11, %c0_43, %c0_44] : memref<16x4x8xbf16, #tpu.memory_space<vmem>>, vector<1x4x8xbf16>
    %77 = vector.shape_cast %76 : vector<1x4x8xbf16> to vector<4x8xbf16>
    %cst_45 = arith.constant dense<0.000000e+00> : vector<256x8xf32>
    %78 = tpu.matmul %17, %77, %cst_45 {dimension_numbers = #tpu.dot_dimension_numbers<[1], [0], [0], [1], [0, 0, 1, 1], [], []>} : vector<256x4xbf16>, vector<4x8xbf16>, vector<256x8xf32> -> vector<256x8xf32>
    %79 = arith.addf %75, %78 : vector<256x8xf32>
    %cst_46 = arith.constant dense<0.000000e+00> : vector<1x8xf32>
    %80 = tpu.matmul %20, %79, %cst_46 {dimension_numbers = #tpu.dot_dimension_numbers<[1], [0], [0], [1], [0, 0, 1, 1], [], []>} : vector<1x256xf32>, vector<256x8xf32>, vector<1x8xf32> -> vector<1x8xf32>
    %cst_47 = arith.constant 3.906250e-03 : f32
    %81 = vector.broadcast %cst_47 : f32 to vector<1x8xf32>
    %82 = arith.mulf %80, %81 : vector<1x8xf32>
    %83 = vector.broadcast %82 : vector<1x8xf32> to vector<256x8xf32>
    %84 = arith.subf %79, %83 : vector<256x8xf32>
    %85 = arith.mulf %84, %84 : vector<256x8xf32>
    %cst_48 = arith.constant dense<0.000000e+00> : vector<1x8xf32>
    %86 = tpu.matmul %20, %85, %cst_48 {dimension_numbers = #tpu.dot_dimension_numbers<[1], [0], [0], [1], [0, 0, 1, 1], [], []>} : vector<1x256xf32>, vector<256x8xf32>, vector<1x8xf32> -> vector<1x8xf32>
    %c12 = arith.constant 12 : index
    %c0_49 = arith.constant 0 : index
    %c0_50 = arith.constant 0 : index
    %87 = vector.load %arg2[%c12, %c0_49, %c0_50] : memref<16x4x8xbf16, #tpu.memory_space<vmem>>, vector<1x4x8xbf16>
    %88 = vector.shape_cast %87 : vector<1x4x8xbf16> to vector<4x8xbf16>
    %cst_51 = arith.constant dense<0.000000e+00> : vector<256x8xf32>
    %89 = tpu.matmul %11, %88, %cst_51 {dimension_numbers = #tpu.dot_dimension_numbers<[1], [0], [0], [1], [0, 0, 1, 1], [], []>} : vector<256x4xbf16>, vector<4x8xbf16>, vector<256x8xf32> -> vector<256x8xf32>
    %c13 = arith.constant 13 : index
    %c0_52 = arith.constant 0 : index
    %c0_53 = arith.constant 0 : index
    %90 = vector.load %arg2[%c13, %c0_52, %c0_53] : memref<16x4x8xbf16, #tpu.memory_space<vmem>>, vector<1x4x8xbf16>
    %91 = vector.shape_cast %90 : vector<1x4x8xbf16> to vector<4x8xbf16>
    %cst_54 = arith.constant dense<0.000000e+00> : vector<256x8xf32>
    %92 = tpu.matmul %13, %91, %cst_54 {dimension_numbers = #tpu.dot_dimension_numbers<[1], [0], [0], [1], [0, 0, 1, 1], [], []>} : vector<256x4xbf16>, vector<4x8xbf16>, vector<256x8xf32> -> vector<256x8xf32>
    %93 = arith.addf %89, %92 : vector<256x8xf32>
    %c14 = arith.constant 14 : index
    %c0_55 = arith.constant 0 : index
    %c0_56 = arith.constant 0 : index
    %94 = vector.load %arg2[%c14, %c0_55, %c0_56] : memref<16x4x8xbf16, #tpu.memory_space<vmem>>, vector<1x4x8xbf16>
    %95 = vector.shape_cast %94 : vector<1x4x8xbf16> to vector<4x8xbf16>
    %cst_57 = arith.constant dense<0.000000e+00> : vector<256x8xf32>
    %96 = tpu.matmul %17, %95, %cst_57 {dimension_numbers = #tpu.dot_dimension_numbers<[1], [0], [0], [1], [0, 0, 1, 1], [], []>} : vector<256x4xbf16>, vector<4x8xbf16>, vector<256x8xf32> -> vector<256x8xf32>
    %97 = arith.addf %93, %96 : vector<256x8xf32>
    %c15 = arith.constant 15 : index
    %c0_58 = arith.constant 0 : index
    %c0_59 = arith.constant 0 : index
    %98 = vector.load %arg2[%c15, %c0_58, %c0_59] : memref<16x4x8xbf16, #tpu.memory_space<vmem>>, vector<1x4x8xbf16>
    %99 = vector.shape_cast %98 : vector<1x4x8xbf16> to vector<4x8xbf16>
    %cst_60 = arith.constant dense<0.000000e+00> : vector<256x8xf32>
    %100 = tpu.matmul %19, %99, %cst_60 {dimension_numbers = #tpu.dot_dimension_numbers<[1], [0], [0], [1], [0, 0, 1, 1], [], []>} : vector<256x4xbf16>, vector<4x8xbf16>, vector<256x8xf32> -> vector<256x8xf32>
    %101 = arith.addf %97, %100 : vector<256x8xf32>
    %cst_61 = arith.constant dense<0.000000e+00> : vector<1x8xf32>
    %102 = tpu.matmul %20, %101, %cst_61 {dimension_numbers = #tpu.dot_dimension_numbers<[1], [0], [0], [1], [0, 0, 1, 1], [], []>} : vector<1x256xf32>, vector<256x8xf32>, vector<1x8xf32> -> vector<1x8xf32>
    %cst_62 = arith.constant 3.906250e-03 : f32
    %103 = vector.broadcast %cst_62 : f32 to vector<1x8xf32>
    %104 = arith.mulf %102, %103 : vector<1x8xf32>
    %105 = vector.broadcast %104 : vector<1x8xf32> to vector<256x8xf32>
    %106 = arith.subf %101, %105 : vector<256x8xf32>
    %107 = arith.mulf %106, %106 : vector<256x8xf32>
    %cst_63 = arith.constant dense<0.000000e+00> : vector<1x8xf32>
    %108 = tpu.matmul %20, %107, %cst_63 {dimension_numbers = #tpu.dot_dimension_numbers<[1], [0], [0], [1], [0, 0, 1, 1], [], []>} : vector<1x256xf32>, vector<256x8xf32>, vector<1x8xf32> -> vector<1x8xf32>
    %109 = tpu.concatenate %35, %57 in 1 : vector<256x8xf32>, vector<256x8xf32> -> vector<256x16xf32>
    %110 = tpu.concatenate %79, %101 in 1 : vector<256x8xf32>, vector<256x8xf32> -> vector<256x16xf32>
    %111 = arith.truncf %109 : vector<256x16xf32> to vector<256x16xbf16>
    %c0_64 = arith.constant 0 : index
    %c0_65 = arith.constant 0 : index
    %c0_66 = arith.constant 0 : index
    %c0_67 = arith.constant 0 : index
    %112 = vector.load %arg3[%c0_64, %c0_65, %c0_66, %c0_67] : memref<2x1x256x16xbf16, #tpu.memory_space<vmem>>, vector<1x1x256x16xbf16>
    %113 = vector.shape_cast %112 : vector<1x1x256x16xbf16> to vector<256x16xbf16>
    %114 = vector.shape_cast %111 : vector<256x16xbf16> to vector<1x1x256x16xbf16>
    tpu.vector_store %arg3[%c0_64, %c0_65, %c0_66, %c0_67], %114 {strides = array<i32>} : memref<2x1x256x16xbf16, #tpu.memory_space<vmem>>, vector<1x1x256x16xbf16>,
    %115 = arith.truncf %110 : vector<256x16xf32> to vector<256x16xbf16>
    %c1_68 = arith.constant 1 : index
    %c0_69 = arith.constant 0 : index
    %c0_70 = arith.constant 0 : index
    %c0_71 = arith.constant 0 : index
    %116 = vector.load %arg3[%c1_68, %c0_69, %c0_70, %c0_71] : memref<2x1x256x16xbf16, #tpu.memory_space<vmem>>, vector<1x1x256x16xbf16>
    %117 = vector.shape_cast %116 : vector<1x1x256x16xbf16> to vector<256x16xbf16>
    %118 = vector.shape_cast %115 : vector<256x16xbf16> to vector<1x1x256x16xbf16>
    tpu.vector_store %arg3[%c1_68, %c0_69, %c0_70, %c0_71], %118 {strides = array<i32>} : memref<2x1x256x16xbf16, #tpu.memory_space<vmem>>, vector<1x1x256x16xbf16>,
    %119 = tpu.concatenate %36, %58, %80, %102 in 1 : vector<1x8xf32>, vector<1x8xf32>, vector<1x8xf32>, vector<1x8xf32> -> vector<1x32xf32>
    %c0_72 = arith.constant 0 : index
    %c0_73 = arith.constant 0 : index
    %c0_74 = arith.constant 0 : index
    %120 = vector.load %arg4[%c0_72, %c0_73, %c0_74] : memref<1x2x32xf32, #tpu.memory_space<vmem>>, vector<1x1x32xf32>
    %121 = vector.shape_cast %120 : vector<1x1x32xf32> to vector<1x32xf32>
    %122 = vector.shape_cast %119 : vector<1x32xf32> to vector<1x1x32xf32>
    tpu.vector_store %arg4[%c0_72, %c0_73, %c0_74], %122 {strides = array<i32>} : memref<1x2x32xf32, #tpu.memory_space<vmem>>, vector<1x1x32xf32>,
    %123 = tpu.concatenate %42, %64, %86, %108 in 1 : vector<1x8xf32>, vector<1x8xf32>, vector<1x8xf32>, vector<1x8xf32> -> vector<1x32xf32>
    %c0_75 = arith.constant 0 : index
    %c1_76 = arith.constant 1 : index
    %c0_77 = arith.constant 0 : index
    %124 = vector.load %arg4[%c0_75, %c1_76, %c0_77] : memref<1x2x32xf32, #tpu.memory_space<vmem>>, vector<1x1x32xf32>
    %125 = vector.shape_cast %124 : vector<1x1x32xf32> to vector<1x32xf32>
    %126 = vector.shape_cast %123 : vector<1x32xf32> to vector<1x1x32xf32>
    tpu.vector_store %arg4[%c0_75, %c1_76, %c0_77], %126 {strides = array<i32>} : memref<1x2x32xf32, #tpu.memory_space<vmem>>, vector<1x1x32xf32>,
    return
  }
  func.func @transform_0(%arg0: i32) -> (i32, i32, i32, i32) {
    %c0_i32 = arith.constant 0 : i32
    %c0_i32_0 = arith.constant 0 : i32
    %c0_i32_1 = arith.constant 0 : i32
    %c0_i32_2 = arith.constant 0 : i32
    return %arg0, %c0_i32, %c0_i32_0, %c0_i32_1 : i32, i32, i32, i32
  }
  func.func @transform_1(%arg0: i32) -> (i32, i32, i32) {
    %c0_i32 = arith.constant 0 : i32
    %c0_i32_0 = arith.constant 0 : i32
    %c0_i32_1 = arith.constant 0 : i32
    %c0_i32_2 = arith.constant 0 : i32
    return %c0_i32, %c0_i32_0, %c0_i32_1 : i32, i32, i32
  }
  func.func @transform_2(%arg0: i32) -> (i32, i32, i32, i32) {
    %c0_i32 = arith.constant 0 : i32
    %c0_i32_0 = arith.constant 0 : i32
    %c0_i32_1 = arith.constant 0 : i32
    %c0_i32_2 = arith.constant 0 : i32
    return %c0_i32, %arg0, %c0_i32_0, %c0_i32_1 : i32, i32, i32, i32
  }
  func.func @transform_3(%arg0: i32) -> (i32, i32, i32) {
    %c0_i32 = arith.constant 0 : i32
    %c0_i32_0 = arith.constant 0 : i32
    %c0_i32_1 = arith.constant 0 : i32
    return %arg0, %c0_i32, %c0_i32_0 : i32, i32, i32
  }
}

</mosaic_0001>

<bundles_post_ra>
// kernel: tpu_custom_call.1
= control target key start
LH: loop header
LB: loop body
LE: loop exit
PB: predicated region body
PF: predicated region fallthrough
CT: control target
= control target key end

     0   :  { %9 = vsyncpa [#allocation4], 0  ;;  %s10876_s0 = inlined_call_operand.vmem [shape: bf16[2,18,18,4], index: 0, kind: input, shape index: {}]   ;;  %s10877_s1 = inlined_call_operand.vmem [shape: bf16[16,4,8], index: 1, kind: input, shape index: {}]   ;;  %s10878_s2 = inlined_call_operand.vmem [shape: bf16[2,2,256,16], index: 2, kind: output, shape index: {0}]   ;;  %s10879_s3 = inlined_call_operand.hbm [shape: f32[2,2,32], index: 3, kind: output, shape index: {1}]  }
   0x1   :  { %11 = vsyncpa [#allocation4 + $0x1], 0  ;;  %s8611_s12 = smov 0   ;;  %s8613_s13 = smov 0  }
   0x2   :  { %s8615_s14 = smov 0   ;;  %s8617_s15 = smov 0  }
   0x3 LB: > { %s8632_s16 = sadd.s32 4294967295, %s8584_s15   ;;  %s6002_s17 = sadd.s32 4294967294, %s8584_s15   ;;  %s8584_s15 = sphi %s8617_s15, %s11369_s15   ;;  %s8580_s14 = sphi %s8615_s14, %s11368_s14   ;;  %s8576_s13 = sphi %s8613_s13, %s11367_s13   ;;  %s8572_s12 = sphi %s8611_s12, %s11366_s12  }
   0x4   : > { %s8636_s18 = sadd.s32 1, %s8584_s15   ;;  %s71_s19 = sadd.s32 1, %s8580_s14 }
   0x5   : > { %s68_s20 = ssub.s32 %s8584_s15, %s8636_s18  ;;  %p81_p0 = scmp.ne.s32.totalorder %s8580_s14, %s8576_s13 }
   0x6   : > { %p69_p1 = scmp.eq.s32.totalorder %s68_s20, 0  ;;  %p82_p2 = scmp.eq.s32.totalorder %s8632_s16, 1 }
   0x7   : > { %p113_p3 = scmp.ne.s32.totalorder %s8576_s13, %s8572_s12  ;;  %p114_p4 = scmp.eq.s32.totalorder %s6002_s17, 1 }
   0x8   : > { %s8647_s21 = scalar_select %p69_p1, %s8580_s14, %s71_s19  }
   0x9   : > { %p8649_p5 = por %p82_p2, %p81_p0  ;;  %p8653_p6 = por %p114_p4, %p113_p3 }
   0xa   : > { %p6005_p7 = scmp.ge.s32.totalorder %s8584_s15, 1  ;;  %p143_p8 = scmp.lt.s32.totalorder %s8584_s15, 3 }
   0xc   : > { %p144_p9 = pnand %p6005_p7, %p143_p8 }
   0xe   : > { %147 = sbr.rel (%p144_p9) target bundleno = 3383 (0xd37), region = 28 }
  0x15   : > { %v6027_v0 = vld [vmem:[%s10877_s1 + $0x2] sm:$0x3]  ;;  %vm949_vm0 = vcmask 1041408   ;;  %p171_p10 = scmp.lt.s32.totalorder %s8632_s16, 1  ;;  %v849_v2 = vld [vmem:[%s10877_s1] sm:$0x3] }
  0x16   : > { %8256 = vmatprep.subr.msk.bf16.mxu0 %vm949_vm0, %v6027_v0  ;;  %v951_v1 = vsel %vm949_vm0, %v6027_v0, 0  ;;  %vm231_vm1 = vsmask.f32 3328  ;;  %vm232_vm2 = vsmask.f32 7440  ;;  %vm900_vm3 = vcmask 31744  }
  0x17   : > { %7073 = vmatpush3.bf16.msra.mxu0 %v951_v1  ;;  %s172_s28 = scalar_select %p171_p10, %s8632_s16, 1  ;;  %v8694_v14 = vsel %vm949_vm0, %v849_v2, 0  ;;  %vm8708_vm4 = vmor %vm231_vm1, %vm232_vm2  ;;  %v11076_v29 = vmov 0  ;;  %vm666_vm5 = vcmask 1042432   ;;  %vm667_vm6 = vcmask 1046532  }
  0x18   : > { %8257 = vmatprep.subr.msk.bf16.mxu0 %vm949_vm0, %v849_v2  ;;  %v11077_v29 = vsel %vm8708_vm4, 4294967295, %v11076_v29  ;;  %vm9356_vm7 = vmor %vm666_vm5, %vm667_vm6  ;;  %s8587_s27 = smov 8   ;;  %vm5050_vm8 = vcmask 64512   ;;  %vm5371_vm9 = vcmask 125952   ;;  %vm5578_vm10 = vcmask 130048   ;;  %s6519_s10 = sshll.u32 (%p8649_p5), %s8632_s16, 7 }
  0x19   : > { %s8272_s29 = smul.u32 216, %s172_s28  ;;  %11078 = vst [vmem:[#allocation6_spill] sm:$0xff] %v11077_v29  ;;  %s9809_s28 = sand.u32 1, %s8576_s13   ;;  %vm5580_vm11 = vcmask 195584   ;;  %vm5582_vm12 = vcmask 253952  }
  0x1a   : > { %s6007_s7 = sshll.u32 %s9809_s28, 1  ;;  %s5605_s9 = scalar_lea.sflag [#allocation4], %s9809_s28 }
  0x1b   : > { %s8673_s5 = scalar_lea.vmem %s10876_s0, %s8272_s29  ;;  %s6006_s29 = sshll.u32 %s9809_s28, 8 }
  0x1c   : > { %v8676_v3 = vld [vmem:[%s8673_s5] sm:$0xf]  ;;  %v8679_v4 = vld [vmem:[%s8673_s5 + $0x4] sm:$0xf]  ;;  %v179_v5 = vld [vmem:[%s8673_s5 + $0x8] sm:$0x1] }
  0x1d   : > { %v235_v6 = vshrl.u32 %v8676_v3, 16  ;;  %v238_v7 = vshll.u32 %v8676_v3, 16  ;;  %v244_v8 = vshll.u32 %v8679_v4, 16  ;;  %v248_v9 = vshrl.u32 %v8679_v4, 16  ;;  %v8687_v10 = vld [vmem:[%s8673_s5 + $0xc] sm:$0xf] }
  0x1e   : > { %v254_v11 = vshll.u32 %v179_v5, 16  ;;  %v8690_v12 = vld [vmem:[%s8673_s5 + $0x10] sm:$0xf]  ;;  %v182_v13 = vld [vmem:[%s8673_s5 + $0x14] sm:$0x1]  ;;  %v259_v21 = vshrl.u32 %v8687_v10, 16 }
  0x1f   : > { %v237_v15 = vrot.slane %v235_v6, 4  ;;  %v240_v16 = vrot.slane %v238_v7, 5  ;;  %v246_v17 = vrot.slane %v244_v8, 5  ;;  %v250_v18 = vrot.slane %v248_v9, 4  ;;  %v8697_v19 = vld [vmem:[%s8673_s5 + $0x18] sm:$0xf] }
  0x20   : > { %v256_v20 = vrot.slane %v254_v11, 5  ;;  %v262_v22 = vshll.u32 %v8687_v10, 16  ;;  %v268_v23 = vshll.u32 %v8690_v12, 16  ;;  %v272_v26 = vshrl.u32 %v8690_v12, 16  ;;  %v8704_v28 = vld [vmem:[%s8673_s5 + $0x1c] sm:$0xf] }
  0x21   : > { %v241_v24 = vor.u32 %v240_v16, %v237_v15  ;;  %v251_v25 = vor.u32 %v250_v18, %v246_v17  ;;  %v278_v27 = vshll.u32 %v182_v13, 16  ;;  %v261_v30 = vrot.slane %v259_v21, 4  ;;  %v185_v38 = vld [vmem:[%s8673_s5 + $0x20] sm:$0x1]  ;;  %v8717_v43 = vld [vmem:[%s8673_s5 + $0x24] sm:$0xf] }
  0x22   : > { %v264_v31 = vrot.slane %v262_v22, 5  ;;  %v270_v32 = vrot.slane %v268_v23, 5  ;;  %v283_v33 = vshrl.u32 %v8697_v19, 16  ;;  %v274_v36 = vrot.slane %v272_v26, 4  ;;  %v8725_v48 = vld [vmem:[%s8673_s5 + $0x28] sm:$0xf] }
  0x23   : > { %v242_v34 = vrot.slane %v241_v24, 4  ;;  %v252_v35 = vrot.slane %v251_v25, 4  ;;  %v280_v37 = vrot.slane %v278_v27, 5  ;;  %v286_v41 = vshll.u32 %v8697_v19, 16  ;;  %v188_v59 = vld [vmem:[%s8673_s5 + $0x2c] sm:$0x1] }
  0x24   : > { %v265_v39 = vor.u32 %v264_v31, %v261_v30  ;;  %v285_v40 = vrot.slane %v283_v33, 4  ;;  %v292_v42 = vshll.u32 %v8704_v28, 16  ;;  %v275_v46 = vor.u32 %v274_v36, %v270_v32  ;;  %v8738_v62 = vld [vmem:[%s8673_s5 + $0x30] sm:$0xf]  ;;  %v8743_v5 = vld [vmem:[%s8673_s5 + $0x34] sm:$0xf] }
  0x25   : > { %v247_v44 = vsel %vm8708_vm4, %v242_v34, %v246_v17  ;;  %v257_v45 = vsel %vm8708_vm4, %v252_v35, %v256_v20  ;;  %v296_v47 = vshrl.u32 %v8704_v28, 16  ;;  %v288_v51 = vrot.slane %v286_v41, 5  ;;  %v8752_v17 = vld [vmem:[%s10877_s1 + $0x4] sm:$0x3]  ;;  %v191_v21 = vld [vmem:[%s8673_s5 + $0x38] sm:$0x1] }
  0x26   : > { %v8727_v49 = vcombine.low %v247_v44, %v257_v45  ;;  %v266_v50 = vrot.slane %v265_v39, 4  ;;  %v294_v52 = vrot.slane %v292_v42, 5  ;;  %v276_v53 = vrot.slane %v275_v46, 4  ;;  %v8762_v24 = vld [vmem:[%s8673_s5 + $0x3c] sm:$0xf]  ;;  %s9816_s30 = scalar_lea.vmem [#allocation2], %s6006_s29 }
  0x27   : > { %v298_v54 = vrot.slane %v296_v47, 4  ;;  %v302_v55 = vshll.u32 %v185_v38, 16  ;;  %v307_v56 = vshrl.u32 %v8717_v43, 16  ;;  %v289_v58 = vor.u32 %v288_v51, %v285_v40  ;;  %v8767_v31 = vld [vmem:[%s8673_s5 + $0x40] sm:$0xf]  ;;  %s10758_s8 = scalar_lea.vmem [#allocation3], %s6007_s7 }
  0x28   : > { %11079 = vst [vmem:[#allocation7_spill] sm:$0xff] %v8727_v49  ;;  %7074 = vmatprep.mubr.msk.bf16.mxu0 %vm900_vm3, %v8727_v49  ;;  %v271_v57 = vsel %vm8708_vm4, %v266_v50, %v270_v32  ;;  %v310_v60 = vshll.u32 %v8717_v43, 16  ;;  %v316_v61 = vshll.u32 %v8725_v48, 16  ;;  %v281_v63 = vsel %vm8708_vm4, %v276_v53, %v280_v37  ;;  %v194_v41 = vld [vmem:[%s8673_s5 + $0x44] sm:$0x1] }
  0x29   : > { %v299_v0 = vor.u32 %v298_v54, %v294_v52  ;;  %v304_v1 = vrot.slane %v302_v55, 5  ;;  %v309_v2 = vrot.slane %v307_v56, 4  ;;  %v8745_v6 = vcombine.low %v271_v57, %v281_v63  ;;  %v8784_v45 = vld [vmem:[%s8673_s5 + $0x48] sm:$0xf] }
  0x2a   : > { %v290_v7 = vrot.slane %v289_v58, 4  ;;  %v312_v8 = vrot.slane %v310_v60, 5  ;;  %v318_v9 = vrot.slane %v316_v61, 5  ;;  %v320_v13 = vshrl.u32 %v8725_v48, 16 }
  0x2b   : > { %11080 = vst [vmem:[#allocation8_spill] sm:$0xff] %v8745_v6  ;;  %v300_v11 = vrot.slane %v299_v0, 4  ;;  %v326_v15 = vshll.u32 %v188_v59, 16  ;;  %v331_v16 = vshrl.u32 %v8738_v62, 16  ;;  %7075 = vmatmul.mubr.msk.bf16.vlgmr.msra.gmra.mrb[0].mxu0 %vm900_vm3, %v8745_v6  ;;  %v334_v22 = vshll.u32 %v8738_v62, 16 }
  0x2c   : > { %v295_v18 = vsel %vm8708_vm4, %v290_v7, %v294_v52  ;;  %v313_v20 = vor.u32 %v312_v8, %v309_v2  ;;  %v340_v23 = vshll.u32 %v8743_v5, 16  ;;  %v322_v26 = vrot.slane %v320_v13, 4  ;;  %7107 = vmatpush3.bf16.msra.mxu0 %v8694_v14  ;;  %v8790_v59 = vld [vmem:[%s8673_s5 + $0x4c] sm:$0xf]  ;;  %v197_v2 = vld [vmem:[%s8673_s5 + $0x50] sm:$0x1] }
  0x2d   : > { %v305_v25 = vsel %vm8708_vm4, %v300_v11, %v304_v1  ;;  %v328_v27 = vrot.slane %v326_v15, 5  ;;  %v333_v30 = vrot.slane %v331_v16, 4  ;;  %v336_v34 = vrot.slane %v334_v22, 5  ;;  %8258 = vmatprep.subr.msk.bf16.mxu0 %vm949_vm0, %v8752_v17  ;;  %v8799_v7 = vld [vmem:[%s8673_s5 + $0x54] sm:$0xf] }
  0x2e   : > { %v8770_v32 = vcombine.low %v295_v18, %v305_v25  ;;  %v314_v33 = vrot.slane %v313_v20, 4  ;;  %v342_v35 = vrot.slane %v340_v23, 5  ;;  %v323_v36 = vor.u32 %v322_v26, %v318_v9  ;;  %v8809_v25 = vld [vmem:[%s8673_s5 + $0x58] sm:$0xf] }
  0x2f   : > { %v344_v37 = vshrl.u32 %v8743_v5, 16  ;;  %v350_v38 = vshll.u32 %v191_v21, 16  ;;  %v355_v39 = vshrl.u32 %v8762_v24, 16  ;;  %v337_v40 = vor.u32 %v336_v34, %v333_v30 }
  0x30   : > { %11081 = vst [vmem:[#allocation9_spill] sm:$0xff] %v8770_v32  ;;  %7078 = vmatprep.mubr.msk.bf16.mxu0 %vm900_vm3, %v8770_v32  ;;  %v319_v14 = vsel %vm8708_vm4, %v314_v33, %v318_v9  ;;  %v358_v42 = vshll.u32 %v8762_v24, 16  ;;  %v364_v44 = vshll.u32 %v8767_v31, 16  ;;  %v324_v46 = vrot.slane %v323_v36, 4 }
  0x31   : > { %v346_v47 = vrot.slane %v344_v37, 4  ;;  %v352_v50 = vrot.slane %v350_v38, 5  ;;  %v357_v51 = vrot.slane %v355_v39, 4  ;;  %v338_v52 = vrot.slane %v337_v40, 4 }
  0x32   : > { %v360_v53 = vrot.slane %v358_v42, 5  ;;  %v366_v54 = vrot.slane %v364_v44, 5  ;;  %v368_v55 = vshrl.u32 %v8767_v31, 16  ;;  %v329_v56 = vsel %vm8708_vm4, %v324_v46, %v328_v27 }
  0x33   : > { %v347_v57 = vor.u32 %v346_v47, %v342_v35  ;;  %v374_v58 = vshll.u32 %v194_v41, 16  ;;  %v379_v60 = vshrl.u32 %v8784_v45, 16  ;;  %v8793_v61 = vcombine.low %v319_v14, %v329_v56  ;;  %v8818_v14 = vld [vmem:[%s8673_s5 + $0x60] sm:$0xf]  ;;  %v203_v56 = vld [vmem:[%s8673_s5 + $0x68] sm:$0x1] }
  0x34   : > { %v343_v63 = vsel %vm8708_vm4, %v338_v52, %v342_v35  ;;  %v361_v0 = vor.u32 %v360_v53, %v357_v51  ;;  %v370_v1 = vrot.slane %v368_v55, 4  ;;  %v382_v13 = vshll.u32 %v8784_v45, 16  ;;  %v200_v35 = vld [vmem:[%s8673_s5 + $0x5c] sm:$0x1]  ;;  %v8830_v52 = vld [vmem:[%s8673_s5 + $0x64] sm:$0xf] }
  0x35   : > { %11082 = vst [vmem:[#allocation10_spill] sm:$0xff] %v8793_v61  ;;  %v348_v8 = vrot.slane %v347_v57, 4  ;;  %v376_v9 = vrot.slane %v374_v58, 5  ;;  %v381_v11 = vrot.slane %v379_v60, 4  ;;  %7079 = vmatmul.mubr.msk.bf16.gmra.mrb[4].mxu0 %vm900_vm3, %v8793_v61  ;;  %v388_v18 = vshll.u32 %v8790_v59, 16 }
  0x36   : > { %v362_v15 = vrot.slane %v361_v0, 4  ;;  %v371_v16 = vor.u32 %v370_v1, %v366_v54  ;;  %v392_v20 = vshrl.u32 %v8790_v59, 16  ;;  %v384_v22 = vrot.slane %v382_v13, 5 }
  0x37   : > { %v353_v21 = vsel %vm8708_vm4, %v348_v8, %v352_v50  ;;  %v398_v23 = vshll.u32 %v197_v2, 16  ;;  %v403_v26 = vshrl.u32 %v8799_v7, 16  ;;  %v390_v34 = vrot.slane %v388_v18, 5 }
  0x38   : > { %v8812_v27 = vcombine.low %v343_v63, %v353_v21  ;;  %v367_v30 = vsel %vm8708_vm4, %v362_v15, %v366_v54  ;;  %v372_v33 = vrot.slane %v371_v16, 4  ;;  %v385_v36 = vor.u32 %v384_v22, %v381_v11  ;;  %v8841_v11 = vld [vmem:[%s8673_s5 + $0x6c] sm:$0xf] }
  0x39   : > { %v394_v37 = vrot.slane %v392_v20, 4  ;;  %v400_v38 = vrot.slane %v398_v23, 5  ;;  %v405_v39 = vrot.slane %v403_v26, 4  ;;  %v406_v41 = vshll.u32 %v8799_v7, 16  ;;  %v8847_v20 = vld [vmem:[%s8673_s5 + $0x70] sm:$0xf] }
  0x3a   : > { %11083 = vst [vmem:[#allocation11_spill] sm:$0xff] %v8812_v27  ;;  %7082 = vmatprep.mubr.msk.bf16.mxu0 %vm900_vm3, %v8812_v27  ;;  %v377_v40 = vsel %vm8708_vm4, %v372_v33, %v376_v9  ;;  %v412_v42 = vshll.u32 %v8809_v25, 16  ;;  %v416_v44 = vshrl.u32 %v8809_v25, 16  ;;  %v386_v47 = vrot.slane %v385_v36, 4 }
  0x3b   : > { %v8827_v46 = vcombine.low %v367_v30, %v377_v40  ;;  %v395_v50 = vor.u32 %v394_v37, %v390_v34  ;;  %v422_v51 = vshll.u32 %v200_v35, 16  ;;  %v408_v53 = vrot.slane %v406_v41, 5  ;;  %v8852_v35 = vld [vmem:[%s8673_s5 + $0x74] sm:$0x1]  ;;  %v8864_v41 = vld [vmem:[%s8673_s5 + $0x78] sm:$0xf] }
  0x3c   : > { %v414_v54 = vrot.slane %v412_v42, 5  ;;  %v418_v55 = vrot.slane %v416_v44, 4  ;;  %v427_v57 = vshrl.u32 %v8818_v14, 16  ;;  %v391_v58 = vsel %vm8708_vm4, %v386_v47, %v390_v34  ;;  %11086 = vst [vmem:[#allocation14_spill] sm:$0xff] %v8852_v35 }
  0x3d   : > { %11084 = vst [vmem:[#allocation12_spill] sm:$0xff] %v8827_v46  ;;  %v396_v60 = vrot.slane %v395_v50, 4  ;;  %v424_v63 = vrot.slane %v422_v51, 5  ;;  %v430_v0 = vshll.u32 %v8818_v14, 16  ;;  %7083 = vmatmul.mubr.msk.bf16.gmra.mrb[8].mxu0 %vm900_vm3, %v8827_v46  ;;  %v409_v1 = vor.u32 %v408_v53, %v405_v39  ;;  %v8869_v51 = vld [vmem:[%s8673_s5 + $0x7c] sm:$0xf] }
  0x3e   : > { %v419_v2 = vor.u32 %v418_v55, %v414_v54  ;;  %v429_v8 = vrot.slane %v427_v57, 4  ;;  %v436_v9 = vshll.u32 %v8830_v52, 16  ;;  %v440_v16 = vshrl.u32 %v8830_v52, 16 }
  0x3f   : > { %v401_v13 = vsel %vm8708_vm4, %v396_v60, %v400_v38  ;;  %v432_v15 = vrot.slane %v430_v0, 5  ;;  %v446_v18 = vshll.u32 %v203_v56, 16  ;;  %v410_v22 = vrot.slane %v409_v1, 4  ;;  %v8876_v60 = vld [vmem:[%s8673_s5 + $0x80] sm:$0x1] }
  0x40   : > { %v8849_v21 = vcombine.low %v391_v58, %v401_v13  ;;  %v420_v23 = vrot.slane %v419_v2, 4  ;;  %v438_v26 = vrot.slane %v436_v9, 5  ;;  %v442_v33 = vrot.slane %v440_v16, 4  ;;  %11088 = vst [vmem:[#allocation16_spill] sm:$0xff] %v8876_v60  ;;  %v8884_v13 = vld [vmem:[%s8673_s5 + $0x84] sm:$0xf] }
  0x41   : > { %v433_v30 = vor.u32 %v432_v15, %v429_v8  ;;  %v448_v34 = vrot.slane %v446_v18, 5  ;;  %v451_v36 = vshrl.u32 %v8841_v11, 16  ;;  %v415_v37 = vsel %vm8708_vm4, %v410_v22, %v414_v54 }
  0x42   : > { %11085 = vst [vmem:[#allocation13_spill] sm:$0xff] %v8849_v21  ;;  %7086 = vmatprep.mubr.msk.bf16.mxu0 %vm900_vm3, %v8849_v21  ;;  %v425_v38 = vsel %vm8708_vm4, %v420_v23, %v424_v63  ;;  %v454_v39 = vshll.u32 %v8841_v11, 16  ;;  %v460_v40 = vshll.u32 %v8847_v20, 16  ;;  %v443_v47 = vor.u32 %v442_v33, %v438_v26  ;;  %v8890_v23 = vld [vmem:[%s8673_s5 + $0x88] sm:$0xf] }
  0x43   : > { %v8866_v42 = vcombine.low %v415_v37, %v425_v38  ;;  %v434_v44 = vrot.slane %v433_v30, 4  ;;  %v453_v50 = vrot.slane %v451_v36, 4  ;;  %v464_v55 = vshrl.u32 %v8847_v20, 16 }
  0x44   : > { %v456_v53 = vrot.slane %v454_v39, 5  ;;  %v462_v54 = vrot.slane %v460_v40, 5  ;;  %v470_v56 = vshll.u32 %v8852_v35, 16  ;;  %v444_v58 = vrot.slane %v443_v47, 4  ;;  %v8901_v47 = vld [vmem:[%s8673_s5 + $0x8c] sm:$0x1] }
  0x45   : > { %11087 = vst [vmem:[#allocation15_spill] sm:$0xff] %v8866_v42  ;;  %v439_v57 = vsel %vm8708_vm4, %v434_v44, %v438_v26  ;;  %v475_v63 = vshrl.u32 %v8864_v41, 16  ;;  %v478_v0 = vshll.u32 %v8864_v41, 16  ;;  %7087 = vmatmul.mubr.msk.bf16.gmra.mrb[12].mxu0 %vm900_vm3, %v8866_v42  ;;  %v466_v2 = vrot.slane %v464_v55, 4  ;;  %11090 = vst [vmem:[#allocation18_spill] sm:$0xff] %v8901_v47 }
  0x46   : > { %v457_v1 = vor.u32 %v456_v53, %v453_v50  ;;  %v472_v8 = vrot.slane %v470_v56, 5  ;;  %v484_v9 = vshll.u32 %v8869_v51, 16  ;;  %v449_v15 = vsel %vm8708_vm4, %v444_v58, %v448_v34 }
  0x47   : > { %v477_v16 = vrot.slane %v475_v63, 4  ;;  %v480_v18 = vrot.slane %v478_v0, 5  ;;  %v488_v22 = vshrl.u32 %v8869_v51, 16  ;;  %v8892_v26 = vcombine.low %v439_v57, %v449_v15  ;;  %v8906_v63 = vld [vmem:[%s8673_s5 + $0x90] sm:$0xf] }
  0x48   : > { %v458_v30 = vrot.slane %v457_v1, 4  ;;  %v467_v33 = vor.u32 %v466_v2, %v462_v54  ;;  %v486_v36 = vrot.slane %v484_v9, 5  ;;  %v494_v39 = vshll.u32 %v8876_v60, 16  ;;  %v8912_v9 = vld [vmem:[%s8673_s5 + $0x94] sm:$0xf] }
  0x49   : > { %11089 = vst [vmem:[#allocation17_spill] sm:$0xff] %v8892_v26  ;;  %v481_v37 = vor.u32 %v480_v18, %v477_v16  ;;  %v490_v38 = vrot.slane %v488_v22, 4  ;;  %v499_v40 = vshrl.u32 %v8884_v13, 16  ;;  %7090 = vmatprep.mubr.msk.bf16.mxu0 %vm900_vm3, %v8892_v26  ;;  %v502_v50 = vshll.u32 %v8884_v13, 16 }
  0x4a   : > { %v463_v34 = vsel %vm8708_vm4, %v458_v30, %v462_v54  ;;  %v468_v44 = vrot.slane %v467_v33, 4  ;;  %v508_v53 = vshll.u32 %v8890_v23, 16  ;;  %v496_v57 = vrot.slane %v494_v39, 5 }
  0x4b   : > { %v482_v55 = vrot.slane %v481_v37, 4  ;;  %v491_v56 = vor.u32 %v490_v38, %v486_v36  ;;  %v501_v58 = vrot.slane %v499_v40, 4  ;;  %v504_v1 = vrot.slane %v502_v50, 5  ;;  %v8920_v37 = vld [vmem:[%s8673_s5 + $0x98] sm:$0x1] }
  0x4c   : > { %v473_v0 = vsel %vm8708_vm4, %v468_v44, %v472_v8  ;;  %v510_v2 = vrot.slane %v508_v53, 5  ;;  %v512_v54 = vshrl.u32 %v8890_v23, 16  ;;  %v518_v22 = vshll.u32 %v8901_v47, 16  ;;  %11092 = vst [vmem:[#allocation20_spill] sm:$0xff] %v8920_v37  ;;  %v8931_v44 = vld [vmem:[%s8673_s5 + $0x9c] sm:$0xf] }
  0x4d   : > { %v8914_v15 = vcombine.low %v463_v34, %v473_v0  ;;  %v487_v16 = vsel %vm8708_vm4, %v482_v55, %v486_v36  ;;  %v492_v18 = vrot.slane %v491_v56, 4  ;;  %v505_v30 = vor.u32 %v504_v1, %v501_v58  ;;  %v8936_v58 = vld [vmem:[%s8673_s5 + $0xa0] sm:$0xf] }
  0x4e   : > { %v514_v33 = vrot.slane %v512_v54, 4  ;;  %v523_v8 = vshrl.u32 %v8906_v63, 16  ;;  %v526_v38 = vshll.u32 %v8906_v63, 16  ;;  %v520_v40 = vrot.slane %v518_v22, 5 }
  0x4f   : > { %11091 = vst [vmem:[#allocation19_spill] sm:$0xff] %v8914_v15  ;;  %7091 = vmatmul.mubr.msk.bf16.gmra.mrb[16].mxu0 %vm900_vm3, %v8914_v15  ;;  %v497_v39 = vsel %vm8708_vm4, %v492_v18, %v496_v57  ;;  %v532_v36 = vshll.u32 %v8912_v9, 16  ;;  %v536_v34 = vshrl.u32 %v8912_v9, 16  ;;  %v506_v53 = vrot.slane %v505_v30, 4 }
  0x50   : > { %v8933_v50 = vcombine.low %v487_v16, %v497_v39  ;;  %v515_v55 = vor.u32 %v514_v33, %v510_v2  ;;  %v525_v56 = vrot.slane %v523_v8, 4  ;;  %v528_v0 = vrot.slane %v526_v38, 5  ;;  %v8946_v38 = vld [vmem:[%s8673_s5 + $0xa4] sm:$0x1] }
  0x51   : > { %v534_v1 = vrot.slane %v532_v36, 5  ;;  %v538_v54 = vrot.slane %v536_v34, 4  ;;  %v542_v57 = vshll.u32 %v8920_v37, 16  ;;  %v511_v16 = vsel %vm8708_vm4, %v506_v53, %v510_v2  ;;  %11094 = vst [vmem:[#allocation22_spill] sm:$0xff] %v8946_v38  ;;  %v8950_v34 = vld [vmem:[%s8673_s5 + $0xa8] sm:$0xf] }
  0x52   : > { %11093 = vst [vmem:[#allocation21_spill] sm:$0xff] %v8933_v50  ;;  %7094 = vmatprep.mubr.msk.bf16.mxu0 %vm900_vm3, %v8933_v50  ;;  %v516_v18 = vrot.slane %v515_v55, 4  ;;  %v547_v22 = vshrl.u32 %v8931_v44, 16  ;;  %v550_v30 = vshll.u32 %v8931_v44, 16  ;;  %v529_v33 = vor.u32 %v528_v0, %v525_v56  ;;  %v8956_v55 = vld [vmem:[%s8673_s5 + $0xac] sm:$0xf] }
  0x53   : > { %v539_v8 = vor.u32 %v538_v54, %v534_v1  ;;  %v544_v39 = vrot.slane %v542_v57, 5  ;;  %v556_v36 = vshll.u32 %v8936_v58, 16  ;;  %v560_v53 = vshrl.u32 %v8936_v58, 16 }
  0x54   : > { %v521_v49 = vsel %vm8708_vm4, %v516_v18, %v520_v40  ;;  %v549_v37 = vrot.slane %v547_v22, 4  ;;  %v552_v2 = vrot.slane %v550_v30, 5  ;;  %v530_v0 = vrot.slane %v529_v33, 4  ;;  %v8974_v30 = vld [vmem:[%s8673_s5 + $0xb4] sm:$0xf] }
  0x55   : > { %v8958_v56 = vcombine.low %v511_v16, %v521_v49  ;;  %v540_v54 = vrot.slane %v539_v8, 4  ;;  %v558_v57 = vrot.slane %v556_v36, 5  ;;  %v562_v60 = vrot.slane %v560_v53, 4  ;;  %v8969_v16 = vld [vmem:[%s8673_s5 + $0xb0] sm:$0x1]  ;;  %11097 = vst [vmem:[#allocation25_spill] sm:$0xff] %v8974_v30 }
  0x56   : > { %v553_v47 = vor.u32 %v552_v2, %v549_v37  ;;  %v566_v35 = vshll.u32 %v8946_v38, 16  ;;  %v571_v40 = vshrl.u32 %v8950_v34, 16  ;;  %v535_v18 = vsel %vm8708_vm4, %v530_v0, %v534_v1  ;;  %11096 = vst [vmem:[#allocation24_spill] sm:$0xff] %v8969_v16  ;;  %v8979_v53 = vld [vmem:[%s8673_s5 + $0xb8] sm:$0xf] }
  0x57   : > { %11095 = vst [vmem:[#allocation23_spill] sm:$0xff] %v8958_v56  ;;  %7095 = vmatmul.mubr.msk.bf16.gmra.mrb[20].mxu0 %vm900_vm3, %v8958_v56  ;;  %v545_v49 = vsel %vm8708_vm4, %v540_v54, %v544_v39  ;;  %v574_v22 = vshll.u32 %v8950_v34, 16  ;;  %v580_v37 = vshll.u32 %v8956_v55, 16  ;;  %v563_v36 = vor.u32 %v562_v60, %v558_v57  ;;  %11099 = vst [vmem:[#allocation27_spill] sm:$0xff] %v8979_v53 }
  0x58   : > { %v8976_v33 = vcombine.low %v535_v18, %v545_v49  ;;  %v554_v8 = vrot.slane %v553_v47, 4  ;;  %v568_v2 = vrot.slane %v566_v35, 5  ;;  %v573_v1 = vrot.slane %v571_v40, 4  ;;  %v8989_v49 = vld [vmem:[%s8673_s5 + $0xbc] sm:$0x1] }
  0x59   : > { %v576_v0 = vrot.slane %v574_v22, 5  ;;  %v582_v38 = vrot.slane %v580_v37, 5  ;;  %v584_v39 = vshrl.u32 %v8956_v55, 16  ;;  %v564_v56 = vrot.slane %v563_v36, 4  ;;  %11100 = vst [vmem:[#allocation28_spill] sm:$0xff] %v8989_v49 }
  0x5a   : > { %11098 = vst [vmem:[#allocation26_spill] sm:$0xff] %v8976_v33  ;;  %7098 = vmatprep.mubr.msk.bf16.mxu0 %vm900_vm3, %v8976_v33  ;;  %v559_v54 = vsel %vm8708_vm4, %v554_v8, %v558_v57  ;;  %v590_v18 = vshll.u32 %v8969_v16, 16  ;;  %v595_v47 = vshrl.u32 %v8974_v30, 16  ;;  %v598_v40 = vshll.u32 %v8974_v30, 16 }
  0x5b   : > { %v577_v60 = vor.u32 %v576_v0, %v573_v1  ;;  %v586_v35 = vrot.slane %v584_v39, 4  ;;  %v604_v22 = vshll.u32 %v8979_v53, 16  ;;  %v569_v37 = vsel %vm8708_vm4, %v564_v56, %v568_v2 }
  0x5c   : > { %v592_v33 = vrot.slane %v590_v18, 5  ;;  %v597_v50 = vrot.slane %v595_v47, 4  ;;  %v608_v57 = vshrl.u32 %v8979_v53, 16  ;;  %v8996_v8 = vcombine.low %v559_v54, %v569_v37  ;;  %v11124_v37 = vld [vmem:[#allocation21_spill] sm:$0xff] }
  0x5d   : > { %v578_v36 = vrot.slane %v577_v60, 4  ;;  %v587_v16 = vor.u32 %v586_v35, %v582_v38  ;;  %v600_v15 = vrot.slane %v598_v40, 5  ;;  %v606_v1 = vrot.slane %v604_v22, 5 }
  0x5e   : > { %11101 = vst [vmem:[#allocation29_spill] sm:$0xff] %v8996_v8  ;;  %v610_v0 = vrot.slane %v608_v57, 4  ;;  %v614_v39 = vshll.u32 %v8989_v49, 16 }
  0x5f   : > { %7099 = vmatmul.mubr.msk.bf16.gmra.mrb[24].mxu0 %vm900_vm3, %v8996_v8  ;;  %v583_v26 = vsel %vm8708_vm4, %v578_v36, %v582_v38  ;;  %v588_v56 = vrot.slane %v587_v16, 4  ;;  %v601_v2 = vor.u32 %v600_v15, %v597_v50  ;;  %v6060_v15 = vcombine.low %v8676_v3, %v8679_v4  ;;  %v6110_v3 = vld [vmem:[%s10877_s1 + $0x6] sm:$0x3] }
  0x60   : > { %v611_v18 = vor.u32 %v610_v0, %v606_v1  ;;  %v616_v47 = vrot.slane %v614_v39, 5  ;;  %v9026_v16 = vcombine.low %v8697_v19, %v8704_v28  ;;  %v9040_v4 = vcombine.low %v8717_v43, %v8725_v48  ;;  %v11125_v39 = vld [vmem:[#allocation23_spill] sm:$0xff] }
  0x61   : > { %v593_v54 = vsel %vm8708_vm4, %v588_v56, %v592_v33  ;;  %v602_v60 = vrot.slane %v601_v2, 4  ;;  %v1383_v33 = vsel %vm949_vm0, %v8752_v17, 0  ;;  %v9056_v19 = vcombine.low %v8784_v45, %v8790_v59 }
  0x62   : > { %v9005_v35 = vcombine.low %v583_v26, %v593_v54  ;;  %v612_v40 = vrot.slane %v611_v18, 4  ;;  %v9022_v26 = vcombine.low %v8687_v10, %v8690_v12  ;;  %11105 = vst [vmem:[#allocation33_spill] sm:$0xff] %v9026_v16  ;;  %11106 = vst [vmem:[#allocation34_spill] sm:$0xff] %v9040_v4  ;;  %v9044_v10 = vcombine.low %v8738_v62, %v8743_v5  ;;  %v9186_v54 = vld [vmem:[%s8673_s5 + $0xc8] sm:$0x1] }
  0x63   : > { %v607_v22 = vsel %vm8708_vm4, %v602_v60, %v606_v1  ;;  %v9052_v12 = vcombine.low %v8762_v24, %v8767_v31  ;;  %11109 = vst [vmem:[#allocation37_spill] sm:$0xff] %v9056_v19  ;;  %v9064_v28 = vcombine.low %v8799_v7, %v8809_v25  ;;  %v9068_v43 = vcombine.low %v8818_v14, %v8830_v52  ;;  %v9148_v7 = vld [vmem:[%s8673_s5 + $0xc0] sm:$0xf]  ;;  %v9151_v25 = vld [vmem:[%s8673_s5 + $0xc4] sm:$0xf] }
  0x64   : > { %11102 = vst [vmem:[#allocation30_spill] sm:$0xff] %v9005_v35  ;;  %7102 = vmatprep.mubr.msk.bf16.mxu0 %vm900_vm3, %v9005_v35  ;;  %v617_v38 = vsel %vm8708_vm4, %v612_v40, %v616_v47  ;;  %11104 = vst [vmem:[#allocation32_spill] sm:$0xff] %v9022_v26  ;;  %v9076_v48 = vcombine.low %v8841_v11, %v8847_v20  ;;  %v9080_v62 = vcombine.low %v8864_v41, %v8869_v51  ;;  %v11122_v52 = vld [vmem:[#allocation17_spill] sm:$0xff]  ;;  %v11123_v11 = vld [vmem:[#allocation19_spill] sm:$0xff] }
  0x65   : > { %v9015_v50 = vcombine.low %v607_v22, %v617_v38  ;;  %11107 = vst [vmem:[#allocation35_spill] sm:$0xff] %v9044_v10  ;;  %11108 = vst [vmem:[#allocation36_spill] sm:$0xff] %v9052_v12  ;;  %v9088_v5 = vcombine.low %v8884_v13, %v8890_v23  ;;  %v9092_v17 = vcombine.low %v8906_v63, %v8912_v9  ;;  %v1587_v59 = vsel %vm949_vm0, %v6110_v3, 0  ;;  %v11127_v60 = vld [vmem:[#allocation26_spill] sm:$0xff] }
  0x66   : > { %11110 = vst [vmem:[#allocation38_spill] sm:$0xff] %v9064_v28  ;;  %11111 = vst [vmem:[#allocation39_spill] sm:$0xff] %v9068_v43  ;;  %v9100_v24 = vcombine.low %v8931_v44, %v8936_v58  ;;  %v9104_v31 = vcombine.low %v8950_v34, %v8956_v55  ;;  %v9112_v45 = vcombine.low %v8974_v30, %v8979_v53  ;;  %v782_v57 = vshrl.u32 %v9148_v7, 16 }
  0x67   : > { %11103 = vst [vmem:[#allocation31_spill] sm:$0xff] %v9015_v50  ;;  %7103 = vmatmul.mubr.msk.bf16.gmra.mrb[28].mxu0 %vm900_vm3, %v9015_v50  ;;  %11112 = vst [vmem:[#allocation40_spill] sm:$0xff] %v9076_v48  ;;  %v9155_v14 = vcombine.low %v9148_v7, %v9151_v25  ;;  %v785_v36 = vshll.u32 %v9148_v7, 16  ;;  %v791_v1 = vshll.u32 %v9151_v25, 16  ;;  %v795_v0 = vshrl.u32 %v9151_v25, 16 }
  0x68   : > { %7108 = vmatprep.mubr.msk.bf16.mxu0 %vm900_vm3, %v6060_v15  ;;  %11113 = vst [vmem:[#allocation41_spill] sm:$0xff] %v9080_v62  ;;  %11114 = vst [vmem:[#allocation42_spill] sm:$0xff] %v9088_v5  ;;  %v784_v56 = vrot.slane %v782_v57, 4  ;;  %v801_v38 = vshll.u32 %v9186_v54, 16 }
  0x69   : > { %11115 = vst [vmem:[#allocation43_spill] sm:$0xff] %v9092_v17  ;;  %11116 = vst [vmem:[#allocation44_spill] sm:$0xff] %v9100_v24  ;;  %v787_v2 = vrot.slane %v785_v36, 5  ;;  %v793_v18 = vrot.slane %v791_v1, 5  ;;  %v797_v47 = vrot.slane %v795_v0, 4  ;;  %v10897_v1 = vmov 1.0  }
  0x6a   : > { %11117 = vst [vmem:[#allocation45_spill] sm:$0xff] %v9104_v31  ;;  %11118 = vst [vmem:[#allocation46_spill] sm:$0xff] %v9112_v45  ;;  %1846 = vmatprep.mubr.f32.mxu1 %v10897_v1 }
  0x6b   : > { %11119 = vst [vmem:[#allocation47_spill] sm:$0xff] %v9148_v7  ;;  %11120 = vst [vmem:[#allocation48_spill] sm:$0xff] %v9151_v25  ;;  %v788_v40 = vor.u32 %v787_v2, %v784_v56  ;;  %v798_v22 = vor.u32 %v797_v47, %v793_v18 }
  0x6c   : > { %11121 = vst [vmem:[#allocation49_spill] sm:$0xff] %v9155_v14  ;;  %11126 = vst [vmem:[#allocation50_spill] sm:$0xff] %v9186_v54 }
  0x6d   : > { %v789_v15 = vrot.slane %v788_v40, 4 }
  0x6f   : > { %7109 = vmatmul.mubr.msk.bf16.vlgmr.msra.gmra.mrb[0].mxu0 %vm900_vm3, %v9022_v26 }
  0x70   : > { %7112 = vmatprep.mubr.msk.bf16.mxu0 %vm900_vm3, %v9026_v16  ;;  %7141 = vmatpush3.bf16.msra.mxu0 %v1383_v33  ;;  %v799_v33 = vrot.slane %v798_v22, 4 }
  0x71   : > { %8259 = vmatprep.subr.msk.bf16.mxu0 %vm949_vm0, %v6110_v3  ;;  %v803_v3 = vrot.slane %v801_v38, 5 }
  0x73   : > { %v804_v57 = vsel %vm8708_vm4, %v799_v33, %v803_v3 }
  0x77   : > { %7113 = vmatmul.mubr.msk.bf16.gmra.mrb[4].mxu0 %vm900_vm3, %v9040_v4 }
  0x78   : > { %7116 = vmatprep.mubr.msk.bf16.mxu0 %vm900_vm3, %v9044_v10 }
  0x7f   : > { %7117 = vmatmul.mubr.msk.bf16.gmra.mrb[8].mxu0 %vm900_vm3, %v9052_v12 }
  0x80   : > { %7120 = vmatprep.mubr.msk.bf16.mxu0 %vm900_vm3, %v9056_v19 }
  0x87   : > { %7121 = vmatmul.mubr.msk.bf16.gmra.mrb[12].mxu0 %vm900_vm3, %v9064_v28 }
  0x88   : > { %7124 = vmatprep.mubr.msk.bf16.mxu0 %vm900_vm3, %v9068_v43 }
  0x8f   : > { %7125 = vmatmul.mubr.msk.bf16.gmra.mrb[16].mxu0 %vm900_vm3, %v9076_v48 }
  0x90   : > { %7128 = vmatprep.mubr.msk.bf16.mxu0 %vm900_vm3, %v9080_v62 }
  0x97   : > { %7129 = vmatmul.mubr.msk.bf16.gmra.mrb[20].mxu0 %vm900_vm3, %v9088_v5 }
  0x98   : > { %7132 = vmatprep.mubr.msk.bf16.mxu0 %vm900_vm3, %v9092_v17 }
  0x9f   : > { %7133 = vmatmul.mubr.msk.bf16.gmra.mrb[24].mxu0 %vm900_vm3, %v9100_v24 }
  0xa0   : > { %7136 = vmatprep.mubr.msk.bf16.mxu0 %vm900_vm3, %v9104_v31 }
  0xa7   : > { %7137 = vmatmul.mubr.msk.bf16.gmra.mrb[28].mxu0 %vm900_vm3, %v9112_v45 }
  0xa8   : > { %7142 = vmatprep.mubr.msk.bf16.mxu0 %vm900_vm3, %v9022_v26 }
  0xaf   : > { %7143 = vmatmul.mubr.msk.bf16.vlgmr.msra.gmra.mrb[0].mxu0 %vm900_vm3, %v9026_v16 }
  0xb0   : > { %7146 = vmatprep.mubr.msk.bf16.mxu0 %vm900_vm3, %v9040_v4  ;;  %7175 = vmatpush3.bf16.msra.mxu0 %v1587_v59  ;;  %v794_v59 = vsel %vm8708_vm4, %v789_v15, %v793_v18 }
  0xb1   : > { %v9201_v36 = vcombine.low %v794_v59, %v804_v57 }
  0xb3   : > { %11128 = vst [vmem:[#allocation51_spill] sm:$0xff] %v9201_v36 }
  0xb7   : > { %7147 = vmatmul.mubr.msk.bf16.gmra.mrb[4].mxu0 %vm900_vm3, %v9044_v10 }
  0xb8   : > { %7150 = vmatprep.mubr.msk.bf16.mxu0 %vm900_vm3, %v9052_v12 }
  0xbf   : > { %7151 = vmatmul.mubr.msk.bf16.gmra.mrb[8].mxu0 %vm900_vm3, %v9056_v19 }
  0xc0   : > { %7154 = vmatprep.mubr.msk.bf16.mxu0 %vm900_vm3, %v9064_v28 }
  0xc7   : > { %7155 = vmatmul.mubr.msk.bf16.gmra.mrb[12].mxu0 %vm900_vm3, %v9068_v43 }
  0xc8   : > { %7158 = vmatprep.mubr.msk.bf16.mxu0 %vm900_vm3, %v9076_v48 }
  0xcf   : > { %7159 = vmatmul.mubr.msk.bf16.gmra.mrb[16].mxu0 %vm900_vm3, %v9080_v62 }
  0xd0   : > { %7162 = vmatprep.mubr.msk.bf16.mxu0 %vm900_vm3, %v9088_v5 }
  0xd7   : > { %7163 = vmatmul.mubr.msk.bf16.gmra.mrb[20].mxu0 %vm900_vm3, %v9092_v17 }
  0xd8   : > { %7166 = vmatprep.mubr.msk.bf16.mxu0 %vm900_vm3, %v9100_v24 }
  0xdf   : > { %7167 = vmatmul.mubr.msk.bf16.gmra.mrb[24].mxu0 %vm900_vm3, %v9104_v31 }
  0xe0   : > { %7170 = vmatprep.mubr.msk.bf16.mxu0 %vm900_vm3, %v9112_v45 }
  0xe7   : > { %7171 = vmatmul.mubr.msk.bf16.gmra.mrb[28].mxu0 %vm900_vm3, %v9155_v14 }
  0xe8   : > { %7176 = vmatprep.mubr.msk.bf16.mxu0 %vm900_vm3, %v8745_v6 }
  0xef   : > { %7177 = vmatmul.mubr.msk.bf16.vlgmr.msra.gmra.mrb[0].mxu0 %vm900_vm3, %v8770_v32 }
  0xf0   : > { %7180 = vmatprep.mubr.msk.bf16.mxu0 %vm900_vm3, %v8793_v61 }
  0xf7   : > { %7181 = vmatmul.mubr.msk.bf16.gmra.mrb[4].mxu0 %vm900_vm3, %v8812_v27 }
  0xf8   : > { %7184 = vmatprep.mubr.msk.bf16.mxu0 %vm900_vm3, %v8827_v46 }
  0xff   : > { %7185 = vmatmul.mubr.msk.bf16.gmra.mrb[8].mxu0 %vm900_vm3, %v8849_v21 }
 0x100   : > { %7188 = vmatprep.mubr.msk.bf16.mxu0 %vm900_vm3, %v8866_v42 }
 0x107   : > { %7189 = vmatmul.mubr.msk.bf16.gmra.mrb[12].mxu0 %vm900_vm3, %v11122_v52 }
 0x108   : > { %7192 = vmatprep.mubr.msk.bf16.mxu0 %vm900_vm3, %v11123_v11 }
 0x10f   : > { %7193 = vmatmul.mubr.msk.bf16.gmra.mrb[16].mxu0 %vm900_vm3, %v11124_v37 }
 0x110   : > { %7196 = vmatprep.mubr.msk.bf16.mxu0 %vm900_vm3, %v11125_v39 }
 0x117   : > { %7197 = vmatmul.mubr.msk.bf16.gmra.mrb[20].mxu0 %vm900_vm3, %v11127_v60 }
 0x118   : > { %7200 = vmatprep.mubr.msk.bf16.mxu0 %vm900_vm3, %v8996_v8 }
 0x11f   : > { %7201 = vmatmul.mubr.msk.bf16.gmra.mrb[24].mxu0 %vm900_vm3, %v9005_v35 }
 0x120   : > { %7204 = vmatprep.mubr.msk.bf16.mxu0 %vm900_vm3, %v9015_v50 }
 0x127   : > { %7205 = vmatmul.mubr.msk.bf16.gmra.mrb[28].mxu0 %vm900_vm3, %v9201_v36 }
 0x128   : > { %2885 = vmatprep.mubr.f32.mxu0 %v10897_v1 }
 0x1c2   : > { %v9207_v0 = vpop.f32.mrb[0].mxu0 }
 0x1c3   : > { %11129 = vst [vmem:[#allocation52_spill] sm:$0xff] %v9207_v0  ;;  %v9209_v56 = vpop.f32.mrb[1].mxu0 }
 0x1c4   : > { %11130 = vst [vmem:[#allocation53_spill] sm:$0xff] %v9209_v56  ;;  %v9211_v2 = vpop.f32.mrb[2].mxu0 }
 0x1c5   : > { %11131 = vst [vmem:[#allocation54_spill] sm:$0xff] %v9211_v2  ;;  %v7622_v18 = vpack.c.bf16 %v9211_v2, %v9207_v0  ;;  %v9215_v47 = vpop.f32.mrb[3].mxu0 }
 0x1c6   : > { %11132 = vst [vmem:[#allocation55_spill] sm:$0xff] %v9215_v47  ;;  %v7618_v40 = vpack.c.bf16 %v9215_v47, %v9209_v56 }
 0x1ca   : > { %v9219_v22 = vpop.f32.mrb[4].mxu0 }
 0x1cb   : > { %11133 = vst [vmem:[#allocation56_spill] sm:$0xff] %v9219_v22  ;;  %v9221_v38 = vpop.f32.mrb[5].mxu0 }
 0x1cc   : > { %11134 = vst [vmem:[#allocation57_spill] sm:$0xff] %v9221_v38  ;;  %v9223_v15 = vpop.f32.mrb[6].mxu0 }
 0x1cd   : > { %11135 = vst [vmem:[#allocation58_spill] sm:$0xff] %v9223_v15  ;;  %v7630_v33 = vpack.c.bf16 %v9223_v15, %v9219_v22  ;;  %v9227_v3 = vpop.f32.mrb[7].mxu0 }
 0x1ce   : > { %11136 = vst [vmem:[#allocation59_spill] sm:$0xff] %v9227_v3  ;;  %v7626_v59 = vpack.c.bf16 %v9227_v3, %v9221_v38 }
 0x1d2   : > { %v9231_v57 = vpop.f32.mrb[8].mxu0 }
 0x1d3   : > { %11137 = vst [vmem:[#allocation60_spill] sm:$0xff] %v9231_v57  ;;  %v9233_v1 = vpop.f32.mrb[9].mxu0 }
 0x1d4   : > { %11138 = vst [vmem:[#allocation61_spill] sm:$0xff] %v9233_v1  ;;  %v9235_v29 = vpop.f32.mrb[10].mxu0 }
 0x1d5   : > { %11139 = vst [vmem:[#allocation62_spill] sm:$0xff] %v9235_v29  ;;  %v7638_v14 = vpack.c.bf16 %v9235_v29, %v9231_v57  ;;  %v9239_v45 = vpop.f32.mrb[11].mxu0 }
 0x1d6   : > { %11140 = vst [vmem:[#allocation63_spill] sm:$0xff] %v9239_v45  ;;  %v7634_v31 = vpack.c.bf16 %v9239_v45, %v9233_v1 }
 0x1da   : > { %v9243_v24 = vpop.f32.mrb[12].mxu0 }
 0x1db   : > { %11141 = vst [vmem:[#allocation64_spill] sm:$0xff] %v9243_v24  ;;  %v9245_v17 = vpop.f32.mrb[13].mxu0 }
 0x1dc   : > { %11142 = vst [vmem:[#allocation65_spill] sm:$0xff] %v9245_v17  ;;  %v9247_v5 = vpop.f32.mrb[14].mxu0 }
 0x1dd   : > { %11143 = vst [vmem:[#allocation66_spill] sm:$0xff] %v9247_v5  ;;  %v7646_v62 = vpack.c.bf16 %v9247_v5, %v9243_v24  ;;  %v9251_v48 = vpop.f32.mrb[15].mxu0 }
 0x1de   : > { %11144 = vst [vmem:[#allocation67_spill] sm:$0xff] %v9251_v48  ;;  %v7642_v43 = vpack.c.bf16 %v9251_v48, %v9245_v17 }
 0x1e2   : > { %v9255_v28 = vpop.f32.mrb[16].mxu0 }
 0x1e3   : > { %11145 = vst [vmem:[#allocation68_spill] sm:$0xff] %v9255_v28  ;;  %v9257_v19 = vpop.f32.mrb[17].mxu0 }
 0x1e4   : > { %11146 = vst [vmem:[#allocation69_spill] sm:$0xff] %v9257_v19  ;;  %v9259_v12 = vpop.f32.mrb[18].mxu0 }
 0x1e5   : > { %11147 = vst [vmem:[#allocation70_spill] sm:$0xff] %v9259_v12  ;;  %v7620_v10 = vpack.c.bf16 %v9259_v12, %v9255_v28  ;;  %v9263_v4 = vpop.f32.mrb[19].mxu0 }
 0x1e6   : > { %11148 = vst [vmem:[#allocation71_spill] sm:$0xff] %v9263_v4  ;;  %v7616_v16 = vpack.c.bf16 %v9263_v4, %v9257_v19 }
 0x1e8   : > { %7617 = vmatprep.subr.bf16.mxu1 %v7616_v16 }
 0x1e9   : > { %7619 = vmatpush3.bf16.msra.mxu1 %v7618_v40 }
 0x1ea   : > { %v9267_v26 = vpop.f32.mrb[20].mxu0  ;;  %7621 = vmatprep.subr.bf16.mxu1 %v7620_v10 }
 0x1eb   : > { %11149 = vst [vmem:[#allocation72_spill] sm:$0xff] %v9267_v26  ;;  %v9269_v54 = vpop.f32.mrb[21].mxu0 }
 0x1ec   : > { %11150 = vst [vmem:[#allocation73_spill] sm:$0xff] %v9269_v54  ;;  %v9271_v7 = vpop.f32.mrb[22].mxu0 }
 0x1ed   : > { %11151 = vst [vmem:[#allocation74_spill] sm:$0xff] %v9271_v7  ;;  %v7628_v25 = vpack.c.bf16 %v9271_v7, %v9267_v26  ;;  %v9275_v36 = vpop.f32.mrb[23].mxu0  ;;  %7623 = vmatpush3.bf16.msra.mxu1 %v7622_v18 }
 0x1ee   : > { %11152 = vst [vmem:[#allocation75_spill] sm:$0xff] %v9275_v36  ;;  %v7624_v50 = vpack.c.bf16 %v9275_v36, %v9269_v54 }
 0x1f0   : > { %7625 = vmatprep.subr.bf16.mxu1 %v7624_v50 }
 0x1f1   : > { %7627 = vmatpush3.bf16.msra.mxu1 %v7626_v59 }
 0x1f2   : > { %v9279_v16 = vpop.f32.mrb[24].mxu0  ;;  %7629 = vmatprep.subr.bf16.mxu1 %v7628_v25 }
 0x1f3   : > { %11153 = vst [vmem:[#allocation76_spill] sm:$0xff] %v9279_v16  ;;  %v9281_v40 = vpop.f32.mrb[25].mxu0 }
 0x1f4   : > { %11154 = vst [vmem:[#allocation77_spill] sm:$0xff] %v9281_v40  ;;  %v9283_v10 = vpop.f32.mrb[26].mxu0 }
 0x1f5   : > { %11155 = vst [vmem:[#allocation78_spill] sm:$0xff] %v9283_v10  ;;  %v7636_v35 = vpack.c.bf16 %v9283_v10, %v9279_v16  ;;  %v9287_v8 = vpop.f32.mrb[27].mxu0  ;;  %7631 = vmatpush3.bf16.msra.mxu1 %v7630_v33 }
 0x1f6   : > { %11156 = vst [vmem:[#allocation79_spill] sm:$0xff] %v9287_v8  ;;  %v7632_v18 = vpack.c.bf16 %v9287_v8, %v9281_v40 }
 0x1f8   : > { %7633 = vmatprep.subr.bf16.mxu1 %v7632_v18 }
 0x1f9   : > { %7635 = vmatpush3.bf16.msra.mxu1 %v7634_v31  ;;  %v11161_v31 = vmov 1.0  }
 0x1fa   : > { %v9291_v50 = vpop.f32.mrb[28].mxu0  ;;  %7637 = vmatprep.subr.bf16.mxu1 %v7636_v35  ;;  %v1853_v35 = vlaneseq }
 0x1fb   : > { %11157 = vst [vmem:[#allocation80_spill] sm:$0xff] %v9291_v50  ;;  %v9293_v59 = vpop.f32.mrb[29].mxu0 }
 0x1fc   : > { %11158 = vst [vmem:[#allocation81_spill] sm:$0xff] %v9293_v59  ;;  %v9295_v25 = vpop.f32.mrb[30].mxu0  ;;  %v1854_v18 = vshrl.u32 %v1853_v35, 7 }
 0x1fd   : > { %11159 = vst [vmem:[#allocation82_spill] sm:$0xff] %v9295_v25  ;;  %v7644_v60 = vpack.c.bf16 %v9295_v25, %v9291_v50  ;;  %v9299_v39 = vpop.f32.mrb[31].mxu0  ;;  %7639 = vmatpush3.bf16.msra.mxu1 %v7638_v14 }
 0x1fe   : > { %11160 = vst [vmem:[#allocation83_spill] sm:$0xff] %v9299_v39  ;;  %v7640_v33 = vpack.c.bf16 %v9299_v39, %v9293_v59  ;;  %v9307_v42 = vsub.s32 0, %v1854_v18 }
 0x200   : > { %7641 = vmatprep.subr.bf16.mxu1 %v7640_v33  ;;  %11163 = vst [vmem:[#allocation85_spill] sm:$0xff] %v9307_v42 }
 0x201   : > { %7643 = vmatpush3.bf16.msra.mxu1 %v7642_v43 }
 0x202   : > { %7645 = vmatprep.subr.bf16.mxu1 %v7644_v60 }
 0x205   : > { %7647 = vmatpush3.bf16.msra.mxu1 %v7646_v62 }
 0x208   : > { %1847 = vmatmul.mubr.f32.vlgmr.msra.gmra.mrb[0].mxu1 %v11161_v31 }
 0x209   : > { %1985 = vmatprep.mubr.f32.mxu1 %v11161_v31 }
 0x2db   : > { %v6620_v37 = vpop.f32.mrb[0].mxu1 }
 0x2dc   : > { %v6621_v11 = vpop.f32.mrb[1].mxu1 }
 0x2dd   : > { %v9305_v52 = vadd.f32 %v6621_v11, %v6620_v37 }
 0x2df   : > { %11162 = vst [vmem:[#allocation84_spill] sm:$0xff] %v9305_v52  ;;  %v1852_v14 = vmul.f32 0.00390625, %v9305_v52 }
 0x2e1   : > { %v1856_v21 = vrot.slane %v1852_v14, %v9307_v42 }
 0x2e3   : > { %v1857_v43 = vsub.f32 %v9209_v56, %v1856_v21  ;;  %v1858_v62 = vsub.f32 %v9215_v47, %v1856_v21  ;;  %v1859_v60 = vsub.f32 %v9207_v0, %v1856_v21  ;;  %v1860_v33 = vsub.f32 %v9211_v2, %v1856_v21 }
 0x2e4   : > { %v1861_v35 = vsub.f32 %v9221_v38, %v1856_v21  ;;  %v1862_v46 = vsub.f32 %v9227_v3, %v1856_v21  ;;  %v1863_v11 = vsub.f32 %v9219_v22, %v1856_v21  ;;  %v1864_v37 = vsub.f32 %v9223_v15, %v1856_v21 }
 0x2e5   : > { %v1865_v18 = vsub.f32 %v9233_v1, %v1856_v21  ;;  %v1866_v14 = vsub.f32 %v9239_v45, %v1856_v21  ;;  %v1867_v52 = vsub.f32 %v9231_v57, %v1856_v21  ;;  %v1868_v42 = vsub.f32 %v9235_v29, %v1856_v21 }
 0x2e6   : > { %v1869_v56 = vsub.f32 %v9245_v17, %v1856_v21  ;;  %v1870_v47 = vsub.f32 %v9251_v48, %v1856_v21  ;;  %v1871_v38 = vsub.f32 %v9243_v24, %v1856_v21  ;;  %v1872_v3 = vsub.f32 %v9247_v5, %v1856_v21 }
 0x2e7   : > { %v1873_v22 = vsub.f32 %v9257_v19, %v1856_v21  ;;  %v1874_v15 = vsub.f32 %v9263_v4, %v1856_v21  ;;  %v1875_v1 = vsub.f32 %v9255_v28, %v1856_v21  ;;  %v1876_v45 = vsub.f32 %v9259_v12, %v1856_v21 }
 0x2e8   : > { %v1877_v57 = vsub.f32 %v9269_v54, %v1856_v21  ;;  %v1878_v29 = vsub.f32 %v9275_v36, %v1856_v21  ;;  %v1879_v17 = vsub.f32 %v9267_v26, %v1856_v21  ;;  %v1880_v48 = vsub.f32 %v9271_v7, %v1856_v21 }
 0x2e9   : > { %v1881_v24 = vsub.f32 %v9281_v40, %v1856_v21  ;;  %v1882_v5 = vsub.f32 %v9287_v8, %v1856_v21  ;;  %v1883_v19 = vsub.f32 %v9279_v16, %v1856_v21  ;;  %v1884_v4 = vsub.f32 %v9283_v10, %v1856_v21 }
 0x2ea   : > { %v1885_v28 = vsub.f32 %v9293_v59, %v1856_v21  ;;  %v1886_v12 = vsub.f32 %v9299_v39, %v1856_v21  ;;  %v1887_v54 = vsub.f32 %v9291_v50, %v1856_v21  ;;  %v1888_v36 = vsub.f32 %v9295_v25, %v1856_v21 }
 0x2eb   : > { %v1889_v0 = vmul.f32 %v1857_v43, %v1857_v43  ;;  %v1890_v26 = vmul.f32 %v1858_v62, %v1858_v62  ;;  %v1891_v2 = vmul.f32 %v1859_v60, %v1859_v60  ;;  %v1892_v7 = vmul.f32 %v1860_v33, %v1860_v33 }
 0x2ec   : > { %v1893_v27 = vmul.f32 %v1861_v35, %v1861_v35  ;;  %v1894_v40 = vmul.f32 %v1862_v46, %v1862_v46  ;;  %v1895_v61 = vmul.f32 %v1863_v11, %v1863_v11  ;;  %v1896_v8 = vmul.f32 %v1864_v37, %v1864_v37 }
 0x2ed   : > { %v1897_v32 = vmul.f32 %v1865_v18, %v1865_v18  ;;  %v1898_v16 = vmul.f32 %v1866_v14, %v1866_v14  ;;  %v1899_v6 = vmul.f32 %v1867_v52, %v1867_v52  ;;  %v1900_v10 = vmul.f32 %v1868_v42, %v1868_v42 }
 0x2ee   : > { %v9343_v49 = vmul.f32 %v1869_v56, %v1869_v56  ;;  %v1902_v59 = vmul.f32 %v1870_v47, %v1870_v47  ;;  %v9345_v39 = vmul.f32 %v1871_v38, %v1871_v38  ;;  %v9347_v50 = vmul.f32 %v1872_v3, %v1872_v3 }
 0x2ef   : > { %v1905_v21 = vmul.f32 %v1873_v22, %v1873_v22  ;;  %v1906_v43 = vmul.f32 %v1874_v15, %v1874_v15  ;;  %v1907_v62 = vmul.f32 %v1875_v1, %v1875_v1  ;;  %v1908_v60 = vmul.f32 %v1876_v45, %v1876_v45 }
 0x2f0   : > { %v1909_v33 = vmul.f32 %v1877_v57, %v1877_v57  ;;  %v1910_v35 = vmul.f32 %v1878_v29, %v1878_v29  ;;  %v1911_v46 = vmul.f32 %v1879_v17, %v1879_v17  ;;  %v1912_v11 = vmul.f32 %v1880_v48, %v1880_v48  ;;  %v8500_v57 = vld [vmem:[%s8673_s5 + $0x14] sm:$0x1] }
 0x2f1   : > { %v1913_v37 = vmul.f32 %v1881_v24, %v1881_v24  ;;  %v1914_v18 = vmul.f32 %v1882_v5, %v1882_v5  ;;  %v1915_v14 = vmul.f32 %v1883_v19, %v1883_v19  ;;  %v1916_v52 = vmul.f32 %v1884_v4, %v1884_v4 }
 0x2f2   : > { %v1917_v42 = vmul.f32 %v1885_v28, %v1885_v28  ;;  %v1918_v56 = vmul.f32 %v1886_v12, %v1886_v12  ;;  %v1919_v25 = vmul.f32 %v1887_v54, %v1887_v54  ;;  %v1920_v47 = vmul.f32 %v1888_v36, %v1888_v36  ;;  %v8499_v36 = vld [vmem:[%s8673_s5 + $0xc] sm:$0xf] }
 0x2f3   : > { %v7648_v38 = vpack.c.bf16 %v1906_v43, %v1905_v21  ;;  %v7650_v30 = vpack.c.bf16 %v1890_v26, %v1889_v0  ;;  %v7654_v3 = vpack.c.bf16 %v1892_v7, %v1891_v2  ;;  %v7658_v53 = vpack.c.bf16 %v1894_v40, %v1893_v27  ;;  %v8498_v7 = vld [vmem:[%s8673_s5 + $0x1c] sm:$0xf]  ;;  %v6129_v43 = vld [vmem:[%s10877_s1 + $0xa] sm:$0x3] }
 0x2f4   : > { %v7662_v22 = vpack.c.bf16 %v1896_v8, %v1895_v61  ;;  %v7666_v15 = vpack.c.bf16 %v1898_v16, %v1897_v32  ;;  %v7670_v1 = vpack.c.bf16 %v1900_v10, %v1899_v6  ;;  %v7674_v45 = vpack.c.bf16 %v1902_v59, %v9343_v49  ;;  %v8494_v6 = vld [vmem:[%s8673_s5 + $0x4] sm:$0xf]  ;;  %v8495_v61 = vld [vmem:[%s8673_s5] sm:$0xf]  ;;  %v8497_v8 = vld [vmem:[%s8673_s5 + $0x8] sm:$0x1] }
 0x2f5   : > { %7649 = vmatprep.subr.bf16.mxu1 %v7648_v38  ;;  %v7678_v29 = vpack.c.bf16 %v9347_v50, %v9345_v39  ;;  %v7652_v48 = vpack.c.bf16 %v1908_v60, %v1907_v62  ;;  %v7656_v19 = vpack.c.bf16 %v1910_v35, %v1909_v33  ;;  %v7660_v4 = vpack.c.bf16 %v1912_v11, %v1911_v46  ;;  %v8501_v10 = vld [vmem:[%s8673_s5 + $0x18] sm:$0xf]  ;;  %v8503_v35 = vld [vmem:[%s8673_s5 + $0x28] sm:$0xf]  ;;  %v8505_v38 = vld [vmem:[%s8673_s5 + $0x24] sm:$0xf] }
 0x2f6   : > { %7651 = vmatpush3.bf16.msra.mxu1 %v7650_v30  ;;  %v7664_v12 = vpack.c.bf16 %v1914_v18, %v1913_v37  ;;  %v7668_v28 = vpack.c.bf16 %v1916_v52, %v1915_v14  ;;  %v7672_v5 = vpack.c.bf16 %v1918_v56, %v1917_v42  ;;  %v7676_v26 = vpack.c.bf16 %v1920_v47, %v1919_v25  ;;  %v8496_v30 = vld [vmem:[%s8673_s5 + $0x10] sm:$0xf]  ;;  %v8502_v25 = vld [vmem:[%s8673_s5 + $0x20] sm:$0x1]  ;;  %v8504_v14 = vld [vmem:[%s8673_s5 + $0x34] sm:$0xf] }
 0x2f7   : > { %7653 = vmatprep.subr.bf16.mxu1 %v7652_v48  ;;  %v671_v32 = vrot.slane %v8494_v6, 5  ;;  %v6009_v27 = vrot.slane %v8495_v61, 9  ;;  %v678_v49 = vrot.slane %v8496_v30, 5  ;;  %v11164_v17 = vmov 0  ;;  %v6128_v42 = vld [vmem:[%s10877_s1 + $0x8] sm:$0x3] }
 0x2f8   : > { %v11165_v17 = vsel %vm9356_vm7, 4294967295, %v11164_v17  ;;  %v685_v39 = vrot.slane %v8498_v7, 5  ;;  %v6010_v0 = vrot.slane %v8499_v36, 9  ;;  %v681_v16 = vrot.slane %v8500_v57, 5  ;;  %v8509_v6 = vld [vmem:[%s8673_s5 + $0x40] sm:$0xf] }
 0x2f9   : > { %11166 = vst [vmem:[#allocation86_spill] sm:$0xff] %v11165_v17  ;;  %v673_v24 = vrot.slane %v671_v32, 4  ;;  %v672_v54 = vsel %vm9356_vm7, %v6009_v27, %v671_v32  ;;  %v680_v2 = vrot.slane %v678_v49, 4  ;;  %v6011_v50 = vrot.slane %v8501_v10, 9  ;;  %v8510_v30 = vld [vmem:[%s8673_s5 + $0x4c] sm:$0xf] }
 0x2fa   : > { %7655 = vmatpush3.bf16.msra.mxu1 %v7654_v3  ;;  %v687_v59 = vrot.slane %v685_v39, 4  ;;  %v688_v21 = vrot.slane %v8502_v25, 5  ;;  %v679_v60 = vsel %vm9356_vm7, %v6010_v0, %v678_v49  ;;  %v692_v46 = vrot.slane %v8503_v35, 5  ;;  %v8513_v0 = vld [vmem:[%s8673_s5 + $0x48] sm:$0xf] }
 0x2fb   : > { %7657 = vmatprep.subr.bf16.mxu1 %v7656_v19  ;;  %v682_v33 = vsel %vm9356_vm7, %v680_v2, %v681_v16  ;;  %v2092_v11 = vsel %vm949_vm0, %v6129_v43, 0  ;;  %v686_v37 = vsel %vm9356_vm7, %v6011_v50, %v685_v39  ;;  %v699_v52 = vrot.slane %v8504_v14, 5  ;;  %v8508_v19 = vld [vmem:[%s8673_s5 + $0x38] sm:$0x1]  ;;  %v8514_v16 = vld [vmem:[%s8673_s5 + $0x50] sm:$0x1] }
 0x2fc   : > { %v689_v18 = vsel %vm9356_vm7, %v687_v59, %v688_v21  ;;  %v9388_v56 = vcombine.low %v679_v60, %v682_v33  ;;  %v6012_v3 = vrot.slane %v8505_v38, 9  ;;  %v706_v32 = vrot.slane %v8509_v6, 5  ;;  %v8515_v59 = vld [vmem:[%s8673_s5 + $0x58] sm:$0xf] }
 0x2fd   : > { %v9391_v47 = vcombine.low %v686_v37, %v689_v18  ;;  %v701_v48 = vrot.slane %v699_v52, 4  ;;  %v713_v49 = vrot.slane %v8510_v30, 5  ;;  %v6015_v2 = vrot.slane %v8513_v0, 9  ;;  %v8518_v18 = vld [vmem:[%s8673_s5 + $0x5c] sm:$0x1]  ;;  %v11176_v30 = vld [vmem:[#allocation16_spill] sm:$0xff] }
 0x2fe   : > { %7659 = vmatpush3.bf16.msra.mxu1 %v7658_v53  ;;  %v674_v53 = vrot.slane %v8497_v8, 5  ;;  %11167 = vst [vmem:[#allocation87_spill] sm:$0xff] %v9388_v56  ;;  %v708_v39 = vrot.slane %v706_v32, 4  ;;  %v720_v25 = vrot.slane %v8515_v59, 5  ;;  %v723_v14 = vrot.slane %v8518_v18, 5 }
 0x2ff   : > { %7661 = vmatprep.subr.bf16.mxu1 %v7660_v4  ;;  %11168 = vst [vmem:[#allocation88_spill] sm:$0xff] %v9391_v47  ;;  %v702_v4 = vrot.slane %v8508_v19, 5  ;;  %v715_v57 = vrot.slane %v713_v49, 4  ;;  %v714_v21 = vsel %vm9356_vm7, %v6015_v2, %v713_v49  ;;  %v741_v19 = vrot.slane %v8869_v51, 5 }
 0x300   : > { %v675_v40 = vsel %vm9356_vm7, %v673_v24, %v674_v53  ;;  %v8511_v24 = vld [vmem:[%s8673_s5 + $0x3c] sm:$0xf]  ;;  %v722_v37 = vrot.slane %v720_v25, 4  ;;  %v744_v49 = vrot.slane %v11176_v30, 5  ;;  %v6020_v2 = vrot.slane %v8884_v13, 9  ;;  %v11192_v30 = vld [vmem:[#allocation8_spill] sm:$0xff] }
 0x301   : > { %v6130_v62 = vcombine.low %v672_v54, %v675_v40  ;;  %v703_v27 = vsel %vm9356_vm7, %v701_v48, %v702_v4  ;;  %v6014_v7 = vrot.slane %v8511_v24, 9  ;;  %v8512_v54 = vld [vmem:[%s8673_s5 + $0x44] sm:$0x1]  ;;  %v716_v40 = vrot.slane %v8514_v16, 5 }
 0x302   : > { %7663 = vmatpush3.bf16.msra.mxu1 %v7662_v22  ;;  %v694_v22 = vrot.slane %v692_v46, 4  ;;  %v709_v36 = vrot.slane %v8512_v54, 5  ;;  %v755_v54 = vrot.slane %v8912_v9, 5  ;;  %v11179_v16 = vld [vmem:[#allocation18_spill] sm:$0xff] }
 0x303   : > { %7665 = vmatprep.subr.bf16.mxu1 %v7664_v12  ;;  %v2256_v12 = vsel %vm949_vm0, %v6128_v42, 0  ;;  %v707_v10 = vsel %vm9356_vm7, %v6014_v7, %v706_v32  ;;  %v11175_v32 = vld [vmem:[#allocation14_spill] sm:$0xff]  ;;  %v748_v7 = vrot.slane %v8890_v23, 5 }
 0x304   : > { %v710_v50 = vsel %vm9356_vm7, %v708_v39, %v709_v36  ;;  %v757_v23 = vrot.slane %v755_v54, 4 }
 0x305   : > { %v9442_v33 = vcombine.low %v707_v10, %v710_v50  ;;  %v6021_v10 = vrot.slane %v8906_v63, 9  ;;  %v11180_v50 = vld [vmem:[#allocation20_spill] sm:$0xff]  ;;  %v749_v9 = vsel %vm9356_vm7, %v6020_v2, %v748_v7  ;;  %v11201_v2 = vld [vmem:[#allocation21_spill] sm:$0xff] }
 0x306   : > { %7667 = vmatpush3.bf16.msra.mxu1 %v7666_v15  ;;  %v8506_v15 = vld [vmem:[%s8673_s5 + $0x2c] sm:$0x1]  ;;  %v758_v59 = vrot.slane %v11180_v50, 5 }
 0x307   : > { %7669 = vmatprep.subr.bf16.mxu1 %v7668_v28  ;;  %v9402_v28 = vld [vmem:[%s10877_s1 + $0xc] sm:$0x3]  ;;  %11171 = vst [vmem:[#allocation91_spill] sm:$0xff] %v9442_v33  ;;  %v756_v63 = vsel %vm9356_vm7, %v6021_v10, %v755_v54  ;;  %v11205_v10 = vld [vmem:[#allocation30_spill] sm:$0xff] }
 0x308   : > { %v11200_v54 = vld [vmem:[#allocation19_spill] sm:$0xff] }
 0x30a   : > { %7671 = vmatpush3.bf16.msra.mxu1 %v7670_v1  ;;  %v695_v1 = vrot.slane %v8506_v15, 5 }
 0x30b   : > { %7673 = vmatprep.subr.bf16.mxu1 %v7672_v5  ;;  %v693_v5 = vsel %vm9356_vm7, %v6012_v3, %v692_v46  ;;  %v8517_v46 = vld [vmem:[%s8673_s5 + $0x54] sm:$0xf]  ;;  %v8520_v3 = vld [vmem:[%s8673_s5 + $0x68] sm:$0x1] }
 0x30e   : > { %7675 = vmatpush3.bf16.msra.mxu1 %v7674_v45  ;;  %v8507_v45 = vld [vmem:[%s8673_s5 + $0x30] sm:$0xf] }
 0x30f   : > { %7677 = vmatprep.subr.bf16.mxu1 %v7676_v26  ;;  %v696_v26 = vsel %vm9356_vm7, %v694_v22, %v695_v1  ;;  %v730_v22 = vrot.slane %v8520_v3, 5  ;;  %v724_v1 = vsel %vm9356_vm7, %v722_v37, %v723_v14  ;;  %v11183_v37 = vld [vmem:[#allocation22_spill] sm:$0xff]  ;;  %v6023_v14 = vrot.slane %v8950_v34, 9 }
 0x310   : > { %v9420_v8 = vcombine.low %v693_v5, %v696_v26  ;;  %v8521_v5 = vld [vmem:[%s8673_s5 + $0x6c] sm:$0xf]  ;;  %v765_v18 = vrot.slane %v11183_v37, 5  ;;  %v11211_v37 = vld [vmem:[#allocation50_spill] sm:$0xff] }
 0x311   : > { %v6018_v26 = vrot.slane %v8521_v5, 9 }
 0x312   : > { %7679 = vmatpush3.bf16.msra.mxu1 %v7678_v29  ;;  %v6013_v29 = vrot.slane %v8507_v45, 9  ;;  %11169 = vst [vmem:[#allocation89_spill] sm:$0xff] %v9420_v8  ;;  %v734_v45 = vrot.slane %v8847_v20, 5  ;;  %v743_v20 = vrot.slane %v741_v19, 4 }
 0x313   : > { %8260 = vmatprep.subr.msk.bf16.mxu1 %vm949_vm0, %v6129_v43  ;;  %v717_v43 = vsel %vm9356_vm7, %v715_v57, %v716_v40  ;;  %v750_v57 = vrot.slane %v748_v7, 4  ;;  %v751_v40 = vrot.slane %v11179_v16, 5  ;;  %v11197_v7 = vld [vmem:[#allocation13_spill] sm:$0xff]  ;;  %v11203_v16 = vld [vmem:[#allocation26_spill] sm:$0xff] }
 0x314   : > { %v700_v61 = vsel %vm9356_vm7, %v6013_v29, %v699_v52  ;;  %v9444_v35 = vcombine.low %v714_v21, %v717_v43  ;;  %v8519_v52 = vld [vmem:[%s8673_s5 + $0x60] sm:$0xf]  ;;  %v736_v6 = vrot.slane %v734_v45, 4  ;;  %v735_v51 = vsel %vm9356_vm7, %v6018_v26, %v734_v45 }
 0x315   : > { %1986 = vmatmul.mubr.f32.vlgmr.msra.gmra.mrb[2].mxu1 %v11161_v31  ;;  %v9422_v53 = vcombine.low %v700_v61, %v703_v27  ;;  %v737_v61 = vrot.slane %v11175_v32, 5  ;;  %v6019_v27 = vrot.slane %v8864_v41, 9  ;;  %v745_v39 = vsel %vm9356_vm7, %v743_v20, %v744_v49  ;;  %v11188_v45 = vld [vmem:[#allocation25_spill] sm:$0xff]  ;;  %v6195_v20 = vld [vmem:[%s10877_s1 + $0xe] sm:$0x3] }
 0x316   : > { %7209 = vmatpush3.bf16.msra.mxu1 %v2092_v11  ;;  %7210 = vmatprep.mubr.msk.bf16.mxu1 %vm900_vm3, %v6130_v62  ;;  %v8516_v62 = vld [vmem:[%s8673_s5 + $0x64] sm:$0xf]  ;;  %11172 = vst [vmem:[#allocation92_spill] sm:$0xff] %v9444_v35  ;;  %v6016_v11 = vrot.slane %v8517_v46, 9  ;;  %v752_v13 = vsel %vm9356_vm7, %v750_v57, %v751_v40  ;;  %v759_v21 = vsel %vm9356_vm7, %v757_v23, %v758_v59  ;;  %v769_v43 = vrot.slane %v8956_v55, 5  ;;  %v11193_v49 = vld [vmem:[#allocation9_spill] sm:$0xff] }
 0x317   : > { %8261 = vmatprep.subr.msk.bf16.mxu1 %vm949_vm0, %v6128_v42  ;;  %11170 = vst [vmem:[#allocation90_spill] sm:$0xff] %v9422_v53  ;;  %v727_v60 = vrot.slane %v8516_v62, 5  ;;  %v6017_v42 = vrot.slane %v8519_v52, 9  ;;  %v738_v24 = vsel %vm9356_vm7, %v736_v6, %v737_v61  ;;  %v742_v41 = vsel %vm9356_vm7, %v6019_v27, %v741_v19  ;;  %v11184_v52 = vld [vmem:[#allocation24_spill] sm:$0xff]  ;;  %v11191_v61 = vld [vmem:[#allocation7_spill] sm:$0xff]  ;;  %v11204_v40 = vld [vmem:[#allocation29_spill] sm:$0xff] }
 0x318   : > { %v721_v15 = vsel %vm9356_vm7, %v6016_v11, %v720_v25  ;;  %v9486_v36 = vcombine.low %v735_v51, %v738_v24  ;;  %v9488_v0 = vcombine.low %v742_v41, %v745_v39  ;;  %v762_v25 = vrot.slane %v8936_v58, 5  ;;  %v11189_v19 = vld [vmem:[#allocation28_spill] sm:$0xff]  ;;  %v11194_v51 = vld [vmem:[#allocation10_spill] sm:$0xff]  ;;  %v11195_v24 = vld [vmem:[#allocation11_spill] sm:$0xff] }
 0x319   : > { %7211 = vmatmul.mubr.msk.bf16.vlgmr.msra.gmra.mrb[4].mxu1 %vm900_vm3, %v9388_v56  ;;  %v729_v38 = vrot.slane %v727_v60, 4  ;;  %v728_v29 = vsel %vm9356_vm7, %v6017_v42, %v727_v60  ;;  %v9464_v4 = vcombine.low %v721_v15, %v724_v1  ;;  %v9508_v62 = vcombine.low %v749_v9, %v752_v13  ;;  %v11198_v41 = vld [vmem:[#allocation15_spill] sm:$0xff]  ;;  %v11199_v39 = vld [vmem:[#allocation17_spill] sm:$0xff] }
 0x31a   : > { %7214 = vmatprep.mubr.msk.bf16.mxu1 %vm900_vm3, %v9391_v47  ;;  %7243 = vmatpush3.bf16.msra.mxu1 %v2256_v12  ;;  %11177 = vst [vmem:[#allocation14_spill] sm:$0xff] %v9486_v36  ;;  %11178 = vst [vmem:[#allocation16_spill] sm:$0xff] %v9488_v0  ;;  %v9510_v60 = vcombine.low %v756_v63, %v759_v21  ;;  %v6022_v46 = vrot.slane %v8931_v44, 9  ;;  %v764_v11 = vrot.slane %v762_v25, 4  ;;  %v771_v58 = vrot.slane %v769_v43, 4  ;;  %v11202_v57 = vld [vmem:[#allocation23_spill] sm:$0xff] }
 0x31b   : > { %8262 = vmatprep.subr.msk.bf16.mxu1 %vm949_vm0, %v9402_v28  ;;  %v731_v48 = vsel %vm9356_vm7, %v729_v38, %v730_v22  ;;  %11173 = vst [vmem:[#allocation93_spill] sm:$0xff] %v9464_v4  ;;  %11181 = vst [vmem:[#allocation18_spill] sm:$0xff] %v9508_v62  ;;  %v772_v42 = vrot.slane %v11184_v52, 5  ;;  %v11185_v38 = vld [vmem:[#allocation27_spill] sm:$0xff]  ;;  %v770_v34 = vsel %vm9356_vm7, %v6023_v14, %v769_v43  ;;  %v779_v5 = vrot.slane %v11189_v19, 5  ;;  %v11209_v63 = vld [vmem:[#allocation48_spill] sm:$0xff] }
 0x31c   : > { %v9466_v12 = vcombine.low %v728_v29, %v731_v48  ;;  %11182 = vst [vmem:[#allocation20_spill] sm:$0xff] %v9510_v60  ;;  %v763_v55 = vsel %vm9356_vm7, %v6022_v46, %v762_v25  ;;  %v766_v44 = vsel %vm9356_vm7, %v764_v11, %v765_v18  ;;  %v776_v3 = vrot.slane %v11185_v38, 5  ;;  %v11206_v23 = vld [vmem:[#allocation31_spill] sm:$0xff] }
 0x31d   : > { %v773_v22 = vsel %vm9356_vm7, %v771_v58, %v772_v42  ;;  %v9529_v15 = vcombine.low %v763_v55, %v766_v44  ;;  %v6024_v29 = vrot.slane %v11188_v45, 9  ;;  %v2422_v27 = vsel %vm949_vm0, %v9402_v28, 0  ;;  %v11196_v28 = vld [vmem:[#allocation12_spill] sm:$0xff]  ;;  %v11207_v59 = vld [vmem:[#allocation51_spill] sm:$0xff] }
 0x31e   : > { %11174 = vst [vmem:[#allocation94_spill] sm:$0xff] %v9466_v12  ;;  %v9531_v1 = vcombine.low %v770_v34, %v773_v22  ;;  %v778_v48 = vrot.slane %v776_v3, 4  ;;  %v2626_v50 = vsel %vm949_vm0, %v6195_v20, 0  ;;  %v810_v21 = vrot.slane %v11209_v63, 5  ;;  %v11210_v43 = vld [vmem:[#allocation47_spill] sm:$0xff] }
 0x31f   : > { %11186 = vst [vmem:[#allocation22_spill] sm:$0xff] %v9529_v15  ;;  %v777_v26 = vsel %vm9356_vm7, %v6024_v29, %v776_v3  ;;  %v6025_v46 = vrot.slane %v11210_v43, 9  ;;  %v813_v18 = vrot.slane %v11211_v37, 5 }
 0x320   : > { %11187 = vst [vmem:[#allocation24_spill] sm:$0xff] %v9531_v1  ;;  %v780_v6 = vsel %vm9356_vm7, %v778_v48, %v779_v5  ;;  %v812_v11 = vrot.slane %v810_v21, 4 }
 0x321   : > { %7215 = vmatmul.mubr.msk.bf16.gmra.mrb[8].mxu1 %vm900_vm3, %v9420_v8  ;;  %v9543_v32 = vcombine.low %v777_v26, %v780_v6  ;;  %v811_v14 = vsel %vm9356_vm7, %v6025_v46, %v810_v21 }
 0x322   : > { %7218 = vmatprep.mubr.msk.bf16.mxu1 %vm900_vm3, %v9422_v53  ;;  %v814_v58 = vsel %vm9356_vm7, %v812_v11, %v813_v18 }
 0x323   : > { %11190 = vst [vmem:[#allocation27_spill] sm:$0xff] %v9543_v32  ;;  %v9657_v52 = vcombine.low %v811_v14, %v814_v58 }
 0x325   : > { %11212 = vst [vmem:[#allocation28_spill] sm:$0xff] %v9657_v52 }
 0x329   : > { %7219 = vmatmul.mubr.msk.bf16.gmra.mrb[12].mxu1 %vm900_vm3, %v9442_v33 }
 0x32a   : > { %7222 = vmatprep.mubr.msk.bf16.mxu1 %vm900_vm3, %v9444_v35 }
 0x331   : > { %7223 = vmatmul.mubr.msk.bf16.gmra.mrb[16].mxu1 %vm900_vm3, %v9464_v4 }
 0x332   : > { %7226 = vmatprep.mubr.msk.bf16.mxu1 %vm900_vm3, %v9466_v12 }
 0x339   : > { %7227 = vmatmul.mubr.msk.bf16.gmra.mrb[20].mxu1 %vm900_vm3, %v9486_v36 }
 0x33a   : > { %7230 = vmatprep.mubr.msk.bf16.mxu1 %vm900_vm3, %v9488_v0 }
 0x341   : > { %7231 = vmatmul.mubr.msk.bf16.gmra.mrb[24].mxu1 %vm900_vm3, %v9508_v62 }
 0x342   : > { %7234 = vmatprep.mubr.msk.bf16.mxu1 %vm900_vm3, %v9510_v60 }
 0x349   : > { %7235 = vmatmul.mubr.msk.bf16.gmra.mrb[28].mxu1 %vm900_vm3, %v9529_v15 }
 0x34a   : > { %7238 = vmatprep.mubr.msk.bf16.mxu1 %vm900_vm3, %v9531_v1 }
 0x351   : > { %7239 = vmatmul.mubr.msk.bf16.gmra.mrb[32].mxu1 %vm900_vm3, %v9543_v32 }
 0x352   : > { %7244 = vmatprep.mubr.msk.bf16.mxu1 %vm900_vm3, %v11191_v61 }
 0x359   : > { %7245 = vmatmul.mubr.msk.bf16.vlgmr.msra.gmra.mrb[4].mxu1 %vm900_vm3, %v11192_v30 }
 0x35a   : > { %7248 = vmatprep.mubr.msk.bf16.mxu1 %vm900_vm3, %v11193_v49  ;;  %7277 = vmatpush3.bf16.msra.mxu1 %v2422_v27 }
 0x35b   : > { %8263 = vmatprep.subr.msk.bf16.mxu1 %vm949_vm0, %v6195_v20 }
 0x361   : > { %7249 = vmatmul.mubr.msk.bf16.gmra.mrb[8].mxu1 %vm900_vm3, %v11194_v51 }
 0x362   : > { %7252 = vmatprep.mubr.msk.bf16.mxu1 %vm900_vm3, %v11195_v24 }
 0x369   : > { %7253 = vmatmul.mubr.msk.bf16.gmra.mrb[12].mxu1 %vm900_vm3, %v11196_v28 }
 0x36a   : > { %7256 = vmatprep.mubr.msk.bf16.mxu1 %vm900_vm3, %v11197_v7 }
 0x371   : > { %7257 = vmatmul.mubr.msk.bf16.gmra.mrb[16].mxu1 %vm900_vm3, %v11198_v41 }
 0x372   : > { %7260 = vmatprep.mubr.msk.bf16.mxu1 %vm900_vm3, %v11199_v39 }
 0x379   : > { %7261 = vmatmul.mubr.msk.bf16.gmra.mrb[20].mxu1 %vm900_vm3, %v11200_v54 }
 0x37a   : > { %7264 = vmatprep.mubr.msk.bf16.mxu1 %vm900_vm3, %v11201_v2 }
 0x381   : > { %7265 = vmatmul.mubr.msk.bf16.gmra.mrb[24].mxu1 %vm900_vm3, %v11202_v57 }
 0x382   : > { %7268 = vmatprep.mubr.msk.bf16.mxu1 %vm900_vm3, %v11203_v16 }
 0x389   : > { %7269 = vmatmul.mubr.msk.bf16.gmra.mrb[28].mxu1 %vm900_vm3, %v11204_v40 }
 0x38a   : > { %7272 = vmatprep.mubr.msk.bf16.mxu1 %vm900_vm3, %v11205_v10 }
 0x391   : > { %7273 = vmatmul.mubr.msk.bf16.gmra.mrb[32].mxu1 %vm900_vm3, %v11206_v23 }
 0x392   : > { %7278 = vmatprep.mubr.msk.bf16.mxu1 %vm900_vm3, %v11192_v30 }
 0x399   : > { %7279 = vmatmul.mubr.msk.bf16.vlgmr.msra.gmra.mrb[4].mxu1 %vm900_vm3, %v11193_v49 }
 0x39a   : > { %7282 = vmatprep.mubr.msk.bf16.mxu1 %vm900_vm3, %v11194_v51  ;;  %7311 = vmatpush3.bf16.msra.mxu1 %v2626_v50 }
 0x3a1   : > { %7283 = vmatmul.mubr.msk.bf16.gmra.mrb[8].mxu1 %vm900_vm3, %v11195_v24 }
 0x3a2   : > { %7286 = vmatprep.mubr.msk.bf16.mxu1 %vm900_vm3, %v11196_v28 }
 0x3a9   : > { %7287 = vmatmul.mubr.msk.bf16.gmra.mrb[12].mxu1 %vm900_vm3, %v11197_v7 }
 0x3aa   : > { %7290 = vmatprep.mubr.msk.bf16.mxu1 %vm900_vm3, %v11198_v41 }
 0x3b1   : > { %7291 = vmatmul.mubr.msk.bf16.gmra.mrb[16].mxu1 %vm900_vm3, %v11199_v39 }
 0x3b2   : > { %7294 = vmatprep.mubr.msk.bf16.mxu1 %vm900_vm3, %v11200_v54 }
 0x3b9   : > { %7295 = vmatmul.mubr.msk.bf16.gmra.mrb[20].mxu1 %vm900_vm3, %v11201_v2 }
 0x3ba   : > { %7298 = vmatprep.mubr.msk.bf16.mxu1 %vm900_vm3, %v11202_v57 }
 0x3c1   : > { %7299 = vmatmul.mubr.msk.bf16.gmra.mrb[24].mxu1 %vm900_vm3, %v11203_v16 }
 0x3c2   : > { %7302 = vmatprep.mubr.msk.bf16.mxu1 %vm900_vm3, %v11204_v40 }
 0x3c9   : > { %7303 = vmatmul.mubr.msk.bf16.gmra.mrb[28].mxu1 %vm900_vm3, %v11205_v10 }
 0x3ca   : > { %7306 = vmatprep.mubr.msk.bf16.mxu1 %vm900_vm3, %v11206_v23 }
 0x3d1   : > { %7307 = vmatmul.mubr.msk.bf16.gmra.mrb[32].mxu1 %vm900_vm3, %v11207_v59  ;;  %v11224_v59 = vld [vmem:[#allocation61_spill] sm:$0xff] }
 0x3d2   : > { %7312 = vmatprep.mubr.msk.bf16.mxu1 %vm900_vm3, %v9388_v56 }
 0x3d9   : > { %7313 = vmatmul.mubr.msk.bf16.vlgmr.msra.gmra.mrb[4].mxu1 %vm900_vm3, %v9391_v47  ;;  %v11218_v47 = vld [vmem:[#allocation56_spill] sm:$0xff] }
 0x3da   : > { %7316 = vmatprep.mubr.msk.bf16.mxu1 %vm900_vm3, %v9420_v8 }
 0x3e1   : > { %7317 = vmatmul.mubr.msk.bf16.gmra.mrb[8].mxu1 %vm900_vm3, %v9422_v53 }
 0x3e2   : > { %7320 = vmatprep.mubr.msk.bf16.mxu1 %vm900_vm3, %v9442_v33 }
 0x3e8   : > { %v6655_v9 = vpop.f32.mrb[2].mxu1 }
 0x3e9   : > { %v6656_v13 = vpop.f32.mrb[3].mxu1  ;;  %7321 = vmatmul.mubr.msk.bf16.gmra.mrb[12].mxu1 %vm900_vm3, %v9444_v35 }
 0x3ea   : > { %v9630_v25 = vadd.f32 %v6656_v13, %v6655_v9  ;;  %7324 = vmatprep.mubr.msk.bf16.mxu1 %vm900_vm3, %v9464_v4 }
 0x3ec   : > { %11208 = vst [vmem:[#allocation25_spill] sm:$0xff] %v9630_v25 }
 0x3f1   : > { %7325 = vmatmul.mubr.msk.bf16.gmra.mrb[16].mxu1 %vm900_vm3, %v9466_v12 }
 0x3f2   : > { %7328 = vmatprep.mubr.msk.bf16.mxu1 %vm900_vm3, %v9486_v36 }
 0x3f9   : > { %7329 = vmatmul.mubr.msk.bf16.gmra.mrb[20].mxu1 %vm900_vm3, %v9488_v0 }
 0x3fa   : > { %7332 = vmatprep.mubr.msk.bf16.mxu1 %vm900_vm3, %v9508_v62 }
 0x401   : > { %7333 = vmatmul.mubr.msk.bf16.gmra.mrb[24].mxu1 %vm900_vm3, %v9510_v60 }
 0x402   : > { %7336 = vmatprep.mubr.msk.bf16.mxu1 %vm900_vm3, %v9529_v15 }
 0x409   : > { %7337 = vmatmul.mubr.msk.bf16.gmra.mrb[28].mxu1 %vm900_vm3, %v9531_v1 }
 0x40a   : > { %7340 = vmatprep.mubr.msk.bf16.mxu1 %vm900_vm3, %v9543_v32 }
 0x411   : > { %7341 = vmatmul.mubr.msk.bf16.gmra.mrb[32].mxu1 %vm900_vm3, %v9657_v52 }
 0x412   : > { %3834 = vmatprep.mubr.f32.mxu1 %v11161_v31 }
 0x4ac   : > { %v9662_v42 = vpop.f32.mrb[4].mxu1 }
 0x4ad   : > { %v9664_v55 = vpop.f32.mrb[5].mxu1 }
 0x4ae   : > { %v9666_v44 = vpop.f32.mrb[6].mxu1 }
 0x4af   : > { %v7686_v38 = vpack.c.bf16 %v9666_v44, %v9662_v42  ;;  %v9670_v3 = vpop.f32.mrb[7].mxu1  ;;  %v8316_v34 = vpack.i.bf16 %v9666_v44, %v9662_v42 }
 0x4b0   : > { %v8321_v22 = vpack.i.bf16 %v9670_v3, %v9664_v55  ;;  %v7682_v45 = vpack.c.bf16 %v9670_v3, %v9664_v55 }
 0x4b1   : > { %8317 = vrot.lane.b32.xlu0 %v8316_v34, %s8587_s27 }
 0x4b4   : > { %v9679_v29 = vpop.f32.mrb[8].mxu1 }
 0x4b5   : > { %8322 = vrot.lane.b32.xlu0 %v8321_v22, %s8587_s27  ;;  %v9682_v48 = vpop.f32.mrb[9].mxu1 }
 0x4b6   : > { %v9684_v19 = vpop.f32.mrb[10].mxu1 }
 0x4b7   : > { %v7694_v5 = vpack.c.bf16 %v9684_v19, %v9679_v29  ;;  %v9688_v26 = vpop.f32.mrb[11].mxu1  ;;  %v8326_v6 = vpack.i.bf16 %v9684_v19, %v9679_v29 }
 0x4b8   : > { %v8331_v61 = vpack.i.bf16 %v9688_v26, %v9682_v48  ;;  %v7690_v27 = vpack.c.bf16 %v9688_v26, %v9682_v48 }
 0x4b9   : > { %8327 = vrot.lane.b32.xlu1 %v8326_v6, %s8587_s27 }
 0x4bc   : > { %v9697_v20 = vpop.f32.mrb[12].mxu1 }
 0x4bd   : > { %8332 = vrot.lane.b32.xlu1 %v8331_v61, %s8587_s27  ;;  %v9700_v50 = vpop.f32.mrb[13].mxu1 }
 0x4be   : > { %v9702_v9 = vpop.f32.mrb[14].mxu1 }
 0x4bf   : > { %v8336_v13 = vpack.i.bf16 %v9702_v9, %v9697_v20  ;;  %v7702_v63 = vpack.c.bf16 %v9702_v9, %v9697_v20  ;;  %v9708_v21 = vpop.f32.mrb[15].mxu1 }
 0x4c0   : > { %v8341_v43 = vpack.i.bf16 %v9708_v21, %v9700_v50  ;;  %v7698_v46 = vpack.c.bf16 %v9708_v21, %v9700_v50 }
 0x4c1   : > { %8337 = vrot.lane.b32.xlu1 %v8336_v13, %s8587_s27 }
 0x4c2   : > { %8342 = vrot.lane.b32.xlu0 %v8341_v43, %s8587_s27 }
 0x4c4   : > { %v9716_v11 = vpop.f32.mrb[16].mxu1 }
 0x4c5   : > { %v9718_v37 = vpop.f32.mrb[17].mxu1 }
 0x4c6   : > { %v9720_v18 = vpop.f32.mrb[18].mxu1 }
 0x4c7   : > { %v8346_v14 = vpack.i.bf16 %v9720_v18, %v9716_v11  ;;  %v7710_v58 = vpack.c.bf16 %v9720_v18, %v9716_v11  ;;  %v9726_v34 = vpop.f32.mrb[19].mxu1 }
 0x4c8   : > { %v8351_v22 = vpack.i.bf16 %v9726_v34, %v9718_v37  ;;  %v7706_v6 = vpack.c.bf16 %v9726_v34, %v9718_v37 }
 0x4c9   : > { %8347 = vrot.lane.b32.xlu1 %v8346_v14, %s8587_s27 }
 0x4ca   : > { %8352 = vrot.lane.b32.xlu0 %v8351_v22, %s8587_s27 }
 0x4cc   : > { %v9734_v61 = vpop.f32.mrb[20].mxu1 }
 0x4cd   : > { %v9736_v13 = vpop.f32.mrb[21].mxu1 }
 0x4ce   : > { %v9738_v43 = vpop.f32.mrb[22].mxu1 }
 0x4cf   : > { %v8356_v25 = vpack.i.bf16 %v9738_v43, %v9734_v61  ;;  %v7684_v17 = vpack.c.bf16 %v9738_v43, %v9734_v61  ;;  %v9744_v52 = vpop.f32.mrb[23].mxu1 }
 0x4d0   : > { %v8361_v32 = vpack.i.bf16 %v9744_v52, %v9736_v13  ;;  %v7680_v14 = vpack.c.bf16 %v9744_v52, %v9736_v13 }
 0x4d1   : > { %8357 = vrot.lane.b32.xlu1 %v8356_v25, %s8587_s27 }
 0x4d2   : > { %8362 = vrot.lane.b32.xlu0 %v8361_v32, %s8587_s27  ;;  %7681 = vmatprep.subr.bf16.mxu0 %v7680_v14 }
 0x4d3   : > { %7683 = vmatpush3.bf16.msra.mxu0 %v7682_v45 }
 0x4d4   : > { %v9752_v22 = vpop.f32.mrb[24].mxu1  ;;  %7685 = vmatprep.subr.bf16.mxu0 %v7684_v17 }
 0x4d5   : > { %v9754_v1 = vpop.f32.mrb[25].mxu1 }
 0x4d6   : > { %v9756_v15 = vpop.f32.mrb[26].mxu1 }
 0x4d7   : > { %v8366_v60 = vpack.i.bf16 %v9756_v15, %v9752_v22  ;;  %v7692_v62 = vpack.c.bf16 %v9756_v15, %v9752_v22  ;;  %v9762_v0 = vpop.f32.mrb[27].mxu1  ;;  %7687 = vmatpush3.bf16.msra.mxu0 %v7686_v38 }
 0x4d8   : > { %v8371_v32 = vpack.i.bf16 %v9762_v0, %v9754_v1  ;;  %v7688_v25 = vpack.c.bf16 %v9762_v0, %v9754_v1 }
 0x4d9   : > { %8367 = vrot.lane.b32.xlu1 %v8366_v60, %s8587_s27 }
 0x4da   : > { %8372 = vrot.lane.b32.xlu0 %v8371_v32, %s8587_s27  ;;  %7689 = vmatprep.subr.bf16.mxu0 %v7688_v25 }
 0x4db   : > { %7691 = vmatpush3.bf16.msra.mxu0 %v7690_v27 }
 0x4dc   : > { %v9770_v17 = vpop.f32.mrb[28].mxu1  ;;  %7693 = vmatprep.subr.bf16.mxu0 %v7692_v62 }
 0x4dd   : > { %v9772_v45 = vpop.f32.mrb[29].mxu1 }
 0x4de   : > { %v9774_v14 = vpop.f32.mrb[30].mxu1 }
 0x4df   : > { %v8376_v38 = vpack.i.bf16 %v9774_v14, %v9770_v17  ;;  %v7700_v36 = vpack.c.bf16 %v9774_v14, %v9770_v17  ;;  %v9780_v12 = vpop.f32.mrb[31].mxu1  ;;  %7695 = vmatpush3.bf16.msra.mxu0 %v7694_v5 }
 0x4e0   : > { %v8381_v60 = vpack.i.bf16 %v9780_v12, %v9772_v45  ;;  %v7696_v27 = vpack.c.bf16 %v9780_v12, %v9772_v45 }
 0x4e1   : > { %8377 = vrot.lane.b32.xlu1 %v8376_v38, %s8587_s27 }
 0x4e2   : > { %8382 = vrot.lane.b32.xlu0 %v8381_v60, %s8587_s27  ;;  %7697 = vmatprep.subr.bf16.mxu0 %v7696_v27  ;;  %v11213_v27 = vld [vmem:[#allocation54_spill] sm:$0xff] }
 0x4e3   : > { %7699 = vmatpush3.bf16.msra.mxu0 %v7698_v46 }
 0x4e4   : > { %v9788_v62 = vpop.f32.mrb[32].mxu1  ;;  %7701 = vmatprep.subr.bf16.mxu0 %v7700_v36 }
 0x4e5   : > { %v9790_v32 = vpop.f32.mrb[33].mxu1 }
 0x4e6   : > { %v9792_v25 = vpop.f32.mrb[34].mxu1 }
 0x4e7   : > { %v8386_v5 = vpack.i.bf16 %v9792_v25, %v9788_v62  ;;  %v7708_v4 = vpack.c.bf16 %v9792_v25, %v9788_v62  ;;  %v9798_v35 = vpop.f32.mrb[35].mxu1  ;;  %7703 = vmatpush3.bf16.msra.mxu0 %v7702_v63 }
 0x4e8   : > { %v8391_v46 = vpack.i.bf16 %v9798_v35, %v9790_v32  ;;  %v7704_v36 = vpack.c.bf16 %v9798_v35, %v9790_v32 }
 0x4e9   : > { %8387 = vrot.lane.b32.xlu1 %v8386_v5, %s8587_s27 }
 0x4ea   : > { %8392 = vrot.lane.b32.xlu0 %v8391_v46, %s8587_s27  ;;  %7705 = vmatprep.subr.bf16.mxu0 %v7704_v36  ;;  %v11214_v46 = vld [vmem:[#allocation52_spill] sm:$0xff] }
 0x4eb   : > { %7707 = vmatpush3.bf16.msra.mxu0 %v7706_v6 }
 0x4ec   : > { %7709 = vmatprep.subr.bf16.mxu0 %v7708_v4 }
 0x4ef   : > { %7711 = vmatpush3.bf16.msra.mxu0 %v7710_v58 }
 0x4f2   : > { %2886 = vmatmul.mubr.f32.vlgmr.msra.gmra.mrb[32].mxu0 %v11161_v31 }
 0x4f3   : > { %3024 = vmatprep.mubr.f32.mxu0 %v11161_v31 }
 0x523   : > { %v8318_v63 = vpop.permute.xlu0 %8317 }
 0x524   : > { %v8320_v38 = vunpack.i.h.bf16 %v8318_v63  ;;  %v8319_v60 = vunpack.i.l.bf16 %v8318_v63  ;;  %v11215_v63 = vld [vmem:[#allocation55_spill] sm:$0xff] }
 0x526   : > { %v5054_v5 = vsel %vm5050_vm8, %v11213_v27, %v8320_v38  ;;  %v5053_v6 = vsel %vm5050_vm8, %v11214_v46, %v8319_v60  ;;  %v11216_v60 = vld [vmem:[#allocation53_spill] sm:$0xff] }
 0x527   : > { %v6458_v4 = vpack.c.bf16 %v5054_v5, %v5054_v5  ;;  %v6457_v58 = vpack.c.bf16 %v5053_v6, %v5053_v6  ;;  %v8323_v36 = vpop.permute.xlu0 %8322 }
 0x528   : > { %v8325_v33 = vunpack.i.h.bf16 %v8323_v36  ;;  %v8324_v53 = vunpack.i.l.bf16 %v8323_v36 }
 0x529   : > { %5374 = vst.msk [vmem:[%s9816_s30 + $0x8] sm:$0xf] %vm5371_vm9, %v6457_v58  ;;  %5375 = vst.msk [vmem:[%s9816_s30 + $0xc] sm:$0xf] %vm5371_vm9, %v6458_v4  ;;  %v11217_v58 = vld [vmem:[#allocation58_spill] sm:$0xff] }
 0x52a   : > { %v5052_v38 = vsel %vm5050_vm8, %v11215_v63, %v8325_v33  ;;  %v5051_v27 = vsel %vm5050_vm8, %v11216_v60, %v8324_v53 }
 0x52b   : > { %v6456_v5 = vpack.c.bf16 %v5052_v38, %v5052_v38  ;;  %v6455_v46 = vpack.c.bf16 %v5051_v27, %v5051_v27  ;;  %v8328_v6 = vpop.permute.xlu1 %8327  ;;  %v11219_v27 = vld [vmem:[#allocation59_spill] sm:$0xff] }
 0x52c   : > { %v8330_v36 = vunpack.i.h.bf16 %v8328_v6  ;;  %v8329_v8 = vunpack.i.l.bf16 %v8328_v6 }
 0x52d   : > { %5372 = vst.msk [vmem:[%s9816_s30] sm:$0xf] %vm5371_vm9, %v6455_v46  ;;  %5373 = vst.msk [vmem:[%s9816_s30 + $0x4] sm:$0xf] %vm5371_vm9, %v6456_v5  ;;  %v11220_v46 = vld [vmem:[#allocation57_spill] sm:$0xff] }
 0x52e   : > { %v5058_v4 = vsel %vm5050_vm8, %v11217_v58, %v8330_v36  ;;  %v5057_v33 = vsel %vm5050_vm8, %v11218_v47, %v8329_v8 }
 0x52f   : > { %v6462_v63 = vpack.c.bf16 %v5058_v4, %v5058_v4  ;;  %v6461_v56 = vpack.c.bf16 %v5057_v33, %v5057_v33  ;;  %v8333_v53 = vpop.permute.xlu1 %8332 }
 0x530   : > { %v8335_v38 = vunpack.i.h.bf16 %v8333_v53  ;;  %v8334_v60 = vunpack.i.l.bf16 %v8333_v53 }
 0x531   : > { %5378 = vst.msk [vmem:[%s9816_s30 + $0x18] sm:$0xf] %vm5371_vm9, %v6461_v56  ;;  %5379 = vst.msk [vmem:[%s9816_s30 + $0x1c] sm:$0xf] %vm5371_vm9, %v6462_v63  ;;  %v11221_v63 = vld [vmem:[#allocation62_spill] sm:$0xff] }
 0x532   : > { %v5056_v5 = vsel %vm5050_vm8, %v11219_v27, %v8335_v38  ;;  %v5055_v6 = vsel %vm5050_vm8, %v11220_v46, %v8334_v60  ;;  %v11222_v60 = vld [vmem:[#allocation60_spill] sm:$0xff] }
 0x533   : > { %v6460_v36 = vpack.c.bf16 %v5056_v5, %v5056_v5  ;;  %v6459_v58 = vpack.c.bf16 %v5055_v6, %v5055_v6  ;;  %v8338_v47 = vpop.permute.xlu1 %8337  ;;  %v11223_v6 = vld [vmem:[#allocation63_spill] sm:$0xff] }
 0x534   : > { %v8340_v8 = vunpack.i.h.bf16 %v8338_v47  ;;  %v8339_v4 = vunpack.i.l.bf16 %v8338_v47  ;;  %v8343_v33 = vpop.permute.xlu0 %8342 }
 0x535   : > { %v8345_v53 = vunpack.i.h.bf16 %v8343_v33  ;;  %v8344_v56 = vunpack.i.l.bf16 %v8343_v33  ;;  %5376 = vst.msk [vmem:[%s9816_s30 + $0x10] sm:$0xf] %vm5371_vm9, %v6459_v58  ;;  %5377 = vst.msk [vmem:[%s9816_s30 + $0x14] sm:$0xf] %vm5371_vm9, %v6460_v36 }
 0x536   : > { %v5062_v38 = vsel %vm5050_vm8, %v11221_v63, %v8340_v8  ;;  %v5061_v27 = vsel %vm5050_vm8, %v11222_v60, %v8339_v4  ;;  %v11226_v63 = vld [vmem:[#allocation64_spill] sm:$0xff] }
 0x537   : > { %v6466_v5 = vpack.c.bf16 %v5062_v38, %v5062_v38  ;;  %v6465_v46 = vpack.c.bf16 %v5061_v27, %v5061_v27  ;;  %v5060_v47 = vsel %vm5050_vm8, %v11223_v6, %v8345_v53  ;;  %v5059_v23 = vsel %vm5050_vm8, %v11224_v59, %v8344_v56  ;;  %v11225_v56 = vld [vmem:[#allocation66_spill] sm:$0xff] }
 0x538   : > { %v6464_v10 = vpack.c.bf16 %v5060_v47, %v5060_v47  ;;  %v6463_v33 = vpack.c.bf16 %v5059_v23, %v5059_v23 }
 0x539   : > { %5382 = vst.msk [vmem:[%s9816_s30 + $0x28] sm:$0xf] %vm5371_vm9, %v6465_v46  ;;  %5383 = vst.msk [vmem:[%s9816_s30 + $0x2c] sm:$0xf] %vm5371_vm9, %v6466_v5  ;;  %v11227_v5 = vld [vmem:[#allocation67_spill] sm:$0xff]  ;;  %v11228_v46 = vld [vmem:[#allocation65_spill] sm:$0xff] }
 0x53a   : > { %5380 = vst.msk [vmem:[%s9816_s30 + $0x20] sm:$0xf] %vm5371_vm9, %v6463_v33  ;;  %5381 = vst.msk [vmem:[%s9816_s30 + $0x24] sm:$0xf] %vm5371_vm9, %v6464_v10 }
 0x53b   : > { %v8348_v36 = vpop.permute.xlu1 %8347 }
 0x53c   : > { %v8350_v58 = vunpack.i.h.bf16 %v8348_v36  ;;  %v8349_v8 = vunpack.i.l.bf16 %v8348_v36  ;;  %v8353_v4 = vpop.permute.xlu0 %8352 }
 0x53d   : > { %v8355_v53 = vunpack.i.h.bf16 %v8353_v4  ;;  %v8354_v59 = vunpack.i.l.bf16 %v8353_v4 }
 0x53e   : > { %v5066_v23 = vsel %vm5050_vm8, %v11225_v56, %v8350_v58  ;;  %v5065_v38 = vsel %vm5050_vm8, %v11226_v63, %v8349_v8  ;;  %v11229_v56 = vld [vmem:[#allocation70_spill] sm:$0xff]  ;;  %v11230_v63 = vld [vmem:[#allocation68_spill] sm:$0xff] }
 0x53f   : > { %v6470_v60 = vpack.c.bf16 %v5066_v23, %v5066_v23  ;;  %v6469_v27 = vpack.c.bf16 %v5065_v38, %v5065_v38  ;;  %v5064_v10 = vsel %vm5050_vm8, %v11227_v5, %v8355_v53  ;;  %v5063_v6 = vsel %vm5050_vm8, %v11228_v46, %v8354_v59  ;;  %v11231_v5 = vld [vmem:[#allocation71_spill] sm:$0xff]  ;;  %v11232_v46 = vld [vmem:[#allocation69_spill] sm:$0xff] }
 0x540   : > { %v6468_v47 = vpack.c.bf16 %v5064_v10, %v5064_v10  ;;  %v6467_v33 = vpack.c.bf16 %v5063_v6, %v5063_v6 }
 0x541   : > { %5386 = vst.msk [vmem:[%s9816_s30 + $0x38] sm:$0xf] %vm5371_vm9, %v6469_v27  ;;  %5387 = vst.msk [vmem:[%s9816_s30 + $0x3c] sm:$0xf] %vm5371_vm9, %v6470_v60 }
 0x542   : > { %5384 = vst.msk [vmem:[%s9816_s30 + $0x30] sm:$0xf] %vm5371_vm9, %v6467_v33  ;;  %5385 = vst.msk [vmem:[%s9816_s30 + $0x34] sm:$0xf] %vm5371_vm9, %v6468_v47 }
 0x543   : > { %v8358_v36 = vpop.permute.xlu1 %8357 }
 0x544   : > { %v8360_v58 = vunpack.i.h.bf16 %v8358_v36  ;;  %v8359_v8 = vunpack.i.l.bf16 %v8358_v36  ;;  %v8363_v4 = vpop.permute.xlu0 %8362 }
 0x545   : > { %v8365_v53 = vunpack.i.h.bf16 %v8363_v4  ;;  %v8364_v59 = vunpack.i.l.bf16 %v8363_v4 }
 0x546   : > { %v5070_v23 = vsel %vm5050_vm8, %v11229_v56, %v8360_v58  ;;  %v5069_v38 = vsel %vm5050_vm8, %v11230_v63, %v8359_v8  ;;  %v11233_v56 = vld [vmem:[#allocation74_spill] sm:$0xff]  ;;  %v11234_v63 = vld [vmem:[#allocation72_spill] sm:$0xff] }
 0x547   : > { %v6474_v60 = vpack.c.bf16 %v5070_v23, %v5070_v23  ;;  %v6473_v27 = vpack.c.bf16 %v5069_v38, %v5069_v38  ;;  %v5068_v10 = vsel %vm5050_vm8, %v11231_v5, %v8365_v53  ;;  %v5067_v6 = vsel %vm5050_vm8, %v11232_v46, %v8364_v59  ;;  %v11235_v5 = vld [vmem:[#allocation75_spill] sm:$0xff]  ;;  %v11236_v46 = vld [vmem:[#allocation73_spill] sm:$0xff] }
 0x548   : > { %v6472_v47 = vpack.c.bf16 %v5068_v10, %v5068_v10  ;;  %v6471_v33 = vpack.c.bf16 %v5067_v6, %v5067_v6 }
 0x549   : > { %5390 = vst.msk [vmem:[%s9816_s30 + $0x48] sm:$0xf] %vm5371_vm9, %v6473_v27  ;;  %5391 = vst.msk [vmem:[%s9816_s30 + $0x4c] sm:$0xf] %vm5371_vm9, %v6474_v60 }
 0x54a   : > { %5388 = vst.msk [vmem:[%s9816_s30 + $0x40] sm:$0xf] %vm5371_vm9, %v6471_v33  ;;  %5389 = vst.msk [vmem:[%s9816_s30 + $0x44] sm:$0xf] %vm5371_vm9, %v6472_v47 }
 0x54b   : > { %v8368_v36 = vpop.permute.xlu1 %8367 }
 0x54c   : > { %v8370_v58 = vunpack.i.h.bf16 %v8368_v36  ;;  %v8369_v8 = vunpack.i.l.bf16 %v8368_v36  ;;  %v8373_v4 = vpop.permute.xlu0 %8372 }
 0x54d   : > { %v8375_v53 = vunpack.i.h.bf16 %v8373_v4  ;;  %v8374_v59 = vunpack.i.l.bf16 %v8373_v4 }
 0x54e   : > { %v5074_v23 = vsel %vm5050_vm8, %v11233_v56, %v8370_v58  ;;  %v5073_v38 = vsel %vm5050_vm8, %v11234_v63, %v8369_v8  ;;  %v11237_v56 = vld [vmem:[#allocation78_spill] sm:$0xff]  ;;  %v11238_v63 = vld [vmem:[#allocation76_spill] sm:$0xff] }
 0x54f   : > { %v6478_v60 = vpack.c.bf16 %v5074_v23, %v5074_v23  ;;  %v6477_v27 = vpack.c.bf16 %v5073_v38, %v5073_v38  ;;  %v5072_v10 = vsel %vm5050_vm8, %v11235_v5, %v8375_v53  ;;  %v5071_v6 = vsel %vm5050_vm8, %v11236_v46, %v8374_v59  ;;  %v11239_v5 = vld [vmem:[#allocation79_spill] sm:$0xff]  ;;  %v11240_v46 = vld [vmem:[#allocation77_spill] sm:$0xff] }
 0x550   : > { %v6476_v47 = vpack.c.bf16 %v5072_v10, %v5072_v10  ;;  %v6475_v33 = vpack.c.bf16 %v5071_v6, %v5071_v6 }
 0x551   : > { %5394 = vst.msk [vmem:[%s9816_s30 + $0x58] sm:$0xf] %vm5371_vm9, %v6477_v27  ;;  %5395 = vst.msk [vmem:[%s9816_s30 + $0x5c] sm:$0xf] %vm5371_vm9, %v6478_v60 }
 0x552   : > { %5392 = vst.msk [vmem:[%s9816_s30 + $0x50] sm:$0xf] %vm5371_vm9, %v6475_v33  ;;  %5393 = vst.msk [vmem:[%s9816_s30 + $0x54] sm:$0xf] %vm5371_vm9, %v6476_v47 }
 0x553   : > { %v8378_v36 = vpop.permute.xlu1 %8377 }
 0x554   : > { %v8380_v58 = vunpack.i.h.bf16 %v8378_v36  ;;  %v8379_v8 = vunpack.i.l.bf16 %v8378_v36  ;;  %v8383_v4 = vpop.permute.xlu0 %8382 }
 0x555   : > { %v8385_v53 = vunpack.i.h.bf16 %v8383_v4  ;;  %v8384_v59 = vunpack.i.l.bf16 %v8383_v4 }
 0x556   : > { %v5078_v23 = vsel %vm5050_vm8, %v11237_v56, %v8380_v58  ;;  %v5077_v38 = vsel %vm5050_vm8, %v11238_v63, %v8379_v8  ;;  %v11241_v56 = vld [vmem:[#allocation82_spill] sm:$0xff]  ;;  %v11242_v63 = vld [vmem:[#allocation80_spill] sm:$0xff] }
 0x557   : > { %v6482_v60 = vpack.c.bf16 %v5078_v23, %v5078_v23  ;;  %v6481_v27 = vpack.c.bf16 %v5077_v38, %v5077_v38  ;;  %v5076_v10 = vsel %vm5050_vm8, %v11239_v5, %v8385_v53  ;;  %v5075_v6 = vsel %vm5050_vm8, %v11240_v46, %v8384_v59  ;;  %v11243_v5 = vld [vmem:[#allocation83_spill] sm:$0xff]  ;;  %v11244_v46 = vld [vmem:[#allocation81_spill] sm:$0xff] }
 0x558   : > { %v6480_v47 = vpack.c.bf16 %v5076_v10, %v5076_v10  ;;  %v6479_v33 = vpack.c.bf16 %v5075_v6, %v5075_v6 }
 0x559   : > { %5398 = vst.msk [vmem:[%s9816_s30 + $0x68] sm:$0xf] %vm5371_vm9, %v6481_v27  ;;  %5399 = vst.msk [vmem:[%s9816_s30 + $0x6c] sm:$0xf] %vm5371_vm9, %v6482_v60 }
 0x55a   : > { %5396 = vst.msk [vmem:[%s9816_s30 + $0x60] sm:$0xf] %vm5371_vm9, %v6479_v33  ;;  %5397 = vst.msk [vmem:[%s9816_s30 + $0x64] sm:$0xf] %vm5371_vm9, %v6480_v47 }
 0x55b   : > { %v8388_v36 = vpop.permute.xlu1 %8387 }
 0x55c   : > { %v8390_v58 = vunpack.i.h.bf16 %v8388_v36  ;;  %v8389_v8 = vunpack.i.l.bf16 %v8388_v36  ;;  %v8393_v4 = vpop.permute.xlu0 %8392 }
 0x55d   : > { %v8395_v53 = vunpack.i.h.bf16 %v8393_v4  ;;  %v8394_v59 = vunpack.i.l.bf16 %v8393_v4 }
 0x55e   : > { %v5082_v23 = vsel %vm5050_vm8, %v11241_v56, %v8390_v58  ;;  %v5081_v38 = vsel %vm5050_vm8, %v11242_v63, %v8389_v8 }
 0x55f   : > { %v6486_v60 = vpack.c.bf16 %v5082_v23, %v5082_v23  ;;  %v6485_v27 = vpack.c.bf16 %v5081_v38, %v5081_v38  ;;  %v5080_v10 = vsel %vm5050_vm8, %v11243_v5, %v8395_v53  ;;  %v5079_v6 = vsel %vm5050_vm8, %v11244_v46, %v8394_v59  ;;  %v11245_v53 = vld [vmem:[#allocation85_spill] sm:$0xff] }
 0x560   : > { %v6484_v47 = vpack.c.bf16 %v5080_v10, %v5080_v10  ;;  %v6483_v33 = vpack.c.bf16 %v5079_v6, %v5079_v6 }
 0x561   : > { %5402 = vst.msk [vmem:[%s9816_s30 + $0x78] sm:$0xf] %vm5371_vm9, %v6485_v27  ;;  %5403 = vst.msk [vmem:[%s9816_s30 + $0x7c] sm:$0xf] %vm5371_vm9, %v6486_v60 }
 0x562   : > { %5400 = vst.msk [vmem:[%s9816_s30 + $0x70] sm:$0xf] %vm5371_vm9, %v6483_v33  ;;  %5401 = vst.msk [vmem:[%s9816_s30 + $0x74] sm:$0xf] %vm5371_vm9, %v6484_v47 }
 0x5c5   : > { %v6758_v36 = vpop.f32.mrb[32].mxu0 }
 0x5c6   : > { %v6759_v58 = vpop.f32.mrb[33].mxu0 }
 0x5c7   : > { %v6760_v8 = vadd.f32 %v6759_v58, %v6758_v36 }
 0x5c9   : > { %v2891_v4 = vmul.f32 0.00390625, %v6760_v8  ;;  %5566 = vrot.lane.b32.xlu0 %v6760_v8, %s8587_s27 }
 0x5cb   : > { %v2895_v56 = vrot.slane %v2891_v4, %v11245_v53 }
 0x5cd   : > { %v2896_v59 = vsub.f32 %v9664_v55, %v2895_v56  ;;  %v2897_v23 = vsub.f32 %v9670_v3, %v2895_v56  ;;  %v2898_v63 = vsub.f32 %v9662_v42, %v2895_v56  ;;  %v2899_v38 = vsub.f32 %v9666_v44, %v2895_v56 }
 0x5ce   : > { %v2900_v60 = vsub.f32 %v9682_v48, %v2895_v56  ;;  %v2901_v27 = vsub.f32 %v9688_v26, %v2895_v56  ;;  %v2902_v5 = vsub.f32 %v9679_v29, %v2895_v56  ;;  %v2903_v10 = vsub.f32 %v9684_v19, %v2895_v56 }
 0x5cf   : > { %v2904_v46 = vsub.f32 %v9700_v50, %v2895_v56  ;;  %v2905_v6 = vsub.f32 %v9708_v21, %v2895_v56  ;;  %v2906_v55 = vsub.f32 %v9697_v20, %v2895_v56  ;;  %v2907_v3 = vsub.f32 %v9702_v9, %v2895_v56 }
 0x5d0   : > { %v2908_v42 = vsub.f32 %v9718_v37, %v2895_v56  ;;  %v2909_v44 = vsub.f32 %v9726_v34, %v2895_v56  ;;  %v2910_v48 = vsub.f32 %v9716_v11, %v2895_v56  ;;  %v2911_v26 = vsub.f32 %v9720_v18, %v2895_v56 }
 0x5d1   : > { %v2912_v29 = vsub.f32 %v9736_v13, %v2895_v56  ;;  %v2913_v19 = vsub.f32 %v9744_v52, %v2895_v56  ;;  %v2914_v50 = vsub.f32 %v9734_v61, %v2895_v56  ;;  %v2915_v21 = vsub.f32 %v9738_v43, %v2895_v56 }
 0x5d2   : > { %v2916_v20 = vsub.f32 %v9754_v1, %v2895_v56  ;;  %v2917_v9 = vsub.f32 %v9762_v0, %v2895_v56  ;;  %v2918_v37 = vsub.f32 %v9752_v22, %v2895_v56  ;;  %v2919_v34 = vsub.f32 %v9756_v15, %v2895_v56 }
 0x5d3   : > { %v2920_v11 = vsub.f32 %v9772_v45, %v2895_v56  ;;  %v2921_v18 = vsub.f32 %v9780_v12, %v2895_v56  ;;  %v2922_v13 = vsub.f32 %v9770_v17, %v2895_v56  ;;  %v2923_v52 = vsub.f32 %v9774_v14, %v2895_v56 }
 0x5d4   : > { %v2924_v61 = vsub.f32 %v9790_v32, %v2895_v56  ;;  %v2925_v43 = vsub.f32 %v9798_v35, %v2895_v56  ;;  %v2926_v1 = vsub.f32 %v9788_v62, %v2895_v56  ;;  %v2927_v0 = vsub.f32 %v9792_v25, %v2895_v56 }
 0x5d5   : > { %v2928_v47 = vmul.f32 %v2896_v59, %v2896_v59  ;;  %v2929_v22 = vmul.f32 %v2897_v23, %v2897_v23  ;;  %v2930_v33 = vmul.f32 %v2898_v63, %v2898_v63  ;;  %v2931_v15 = vmul.f32 %v2899_v38, %v2899_v38 }
 0x5d6   : > { %v2932_v36 = vmul.f32 %v2900_v60, %v2900_v60  ;;  %v2933_v45 = vmul.f32 %v2901_v27, %v2901_v27  ;;  %v2934_v58 = vmul.f32 %v2902_v5, %v2902_v5  ;;  %v2935_v12 = vmul.f32 %v2903_v10, %v2903_v10 }
 0x5d7   : > { %v2936_v8 = vmul.f32 %v2904_v46, %v2904_v46  ;;  %v2937_v17 = vmul.f32 %v2905_v6, %v2905_v6  ;;  %v2938_v4 = vmul.f32 %v2906_v55, %v2906_v55  ;;  %v2939_v14 = vmul.f32 %v2907_v3, %v2907_v3 }
 0x5d8   : > { %v2940_v53 = vmul.f32 %v2908_v42, %v2908_v42  ;;  %v2941_v32 = vmul.f32 %v2909_v44, %v2909_v44  ;;  %v2942_v40 = vmul.f32 %v2910_v48, %v2910_v48  ;;  %v2943_v35 = vmul.f32 %v2911_v26, %v2911_v26 }
 0x5d9   : > { %v2944_v16 = vmul.f32 %v2912_v29, %v2912_v29  ;;  %v2945_v62 = vmul.f32 %v2913_v19, %v2913_v19  ;;  %v2946_v57 = vmul.f32 %v2914_v50, %v2914_v50  ;;  %v2947_v25 = vmul.f32 %v2915_v21, %v2915_v21 }
 0x5da   : > { %v2948_v56 = vmul.f32 %v2916_v20, %v2916_v20  ;;  %v2949_v59 = vmul.f32 %v2917_v9, %v2917_v9  ;;  %v2950_v23 = vmul.f32 %v2918_v37, %v2918_v37  ;;  %v2951_v63 = vmul.f32 %v2919_v34, %v2919_v34 }
 0x5db   : > { %v2952_v38 = vmul.f32 %v2920_v11, %v2920_v11  ;;  %v2953_v60 = vmul.f32 %v2921_v18, %v2921_v18  ;;  %v2954_v27 = vmul.f32 %v2922_v13, %v2922_v13  ;;  %v2955_v5 = vmul.f32 %v2923_v52, %v2923_v52  ;;  %v6247_v52 = vld [vmem:[%s10877_s1 + $0x14] sm:$0x3] }
 0x5dc   : > { %v2956_v10 = vmul.f32 %v2924_v61, %v2924_v61  ;;  %v2957_v46 = vmul.f32 %v2925_v43, %v2925_v43  ;;  %v2958_v6 = vmul.f32 %v2926_v1, %v2926_v1  ;;  %v2959_v55 = vmul.f32 %v2927_v0, %v2927_v0  ;;  %v11246_v61 = vld [vmem:[#allocation23_spill] sm:$0xff]  ;;  %v11247_v43 = vld [vmem:[#allocation26_spill] sm:$0xff]  ;;  %v11248_v1 = vld [vmem:[#allocation29_spill] sm:$0xff] }
 0x5dd   : > { %v7712_v3 = vpack.c.bf16 %v2945_v62, %v2944_v16  ;;  %v7714_v42 = vpack.c.bf16 %v2929_v22, %v2928_v47  ;;  %v7718_v44 = vpack.c.bf16 %v2931_v15, %v2930_v33  ;;  %v7722_v48 = vpack.c.bf16 %v2933_v45, %v2932_v36  ;;  %v11249_v0 = vld [vmem:[#allocation30_spill] sm:$0xff]  ;;  %v11250_v47 = vld [vmem:[#allocation31_spill] sm:$0xff]  ;;  %v11252_v33 = vld [vmem:[#allocation32_spill] sm:$0xff] }
 0x5de   : > { %v7726_v26 = vpack.c.bf16 %v2935_v12, %v2934_v58  ;;  %v7730_v29 = vpack.c.bf16 %v2937_v17, %v2936_v8  ;;  %v7734_v19 = vpack.c.bf16 %v2939_v14, %v2938_v4  ;;  %v7738_v50 = vpack.c.bf16 %v2941_v32, %v2940_v53  ;;  %v11251_v22 = vld [vmem:[#allocation51_spill] sm:$0xff]  ;;  %v6265_v36 = vld [vmem:[%s10877_s1 + $0x16] sm:$0x3]  ;;  %v11253_v45 = vld [vmem:[#allocation33_spill] sm:$0xff] }
 0x5df   : > { %7713 = vmatprep.subr.bf16.mxu0 %v7712_v3  ;;  %v7742_v21 = vpack.c.bf16 %v2943_v35, %v2942_v40  ;;  %v7716_v20 = vpack.c.bf16 %v2947_v25, %v2946_v57  ;;  %v7720_v9 = vpack.c.bf16 %v2949_v59, %v2948_v56  ;;  %v7724_v37 = vpack.c.bf16 %v2951_v63, %v2950_v23  ;;  %v6214_v57 = vld [vmem:[%s10877_s1 + $0x12] sm:$0x3]  ;;  %v6213_v40 = vld [vmem:[%s10877_s1 + $0x10] sm:$0x3]  ;;  %v11254_v58 = vld [vmem:[#allocation34_spill] sm:$0xff] }
 0x5e0   : > { %7715 = vmatpush3.bf16.msra.mxu0 %v7714_v42  ;;  %v7728_v34 = vpack.c.bf16 %v2953_v60, %v2952_v38  ;;  %v7732_v11 = vpack.c.bf16 %v2955_v5, %v2954_v27  ;;  %v7736_v18 = vpack.c.bf16 %v2957_v46, %v2956_v10  ;;  %v7740_v13 = vpack.c.bf16 %v2959_v55, %v2958_v6  ;;  %v11255_v12 = vld [vmem:[#allocation35_spill] sm:$0xff]  ;;  %v11256_v8 = vld [vmem:[#allocation36_spill] sm:$0xff]  ;;  %v11257_v17 = vld [vmem:[#allocation37_spill] sm:$0xff] }
 0x5e1   : > { %7717 = vmatprep.subr.bf16.mxu0 %v7716_v20  ;;  %v3035_v16 = vsel %vm949_vm0, %v6214_v57, 0  ;;  %v3199_v53 = vsel %vm949_vm0, %v6213_v40, 0  ;;  %v3371_v15 = vsel %vm949_vm0, %v6247_v52, 0  ;;  %v11258_v4 = vld [vmem:[#allocation38_spill] sm:$0xff]  ;;  %v11259_v14 = vld [vmem:[#allocation39_spill] sm:$0xff]  ;;  %v11260_v32 = vld [vmem:[#allocation40_spill] sm:$0xff] }
 0x5e2   : > { %v11261_v35 = vld [vmem:[#allocation41_spill] sm:$0xff]  ;;  %v11262_v62 = vld [vmem:[#allocation42_spill] sm:$0xff]  ;;  %v11263_v25 = vld [vmem:[#allocation43_spill] sm:$0xff]  ;;  %v3575_v38 = vsel %vm949_vm0, %v6265_v36, 0 }
 0x5e3   : > { %v11264_v56 = vld [vmem:[#allocation44_spill] sm:$0xff]  ;;  %v11265_v59 = vld [vmem:[#allocation45_spill] sm:$0xff]  ;;  %v11266_v23 = vld [vmem:[#allocation46_spill] sm:$0xff] }
 0x5e4   : > { %7719 = vmatpush3.bf16.msra.mxu0 %v7718_v44  ;;  %v11267_v63 = vld [vmem:[#allocation49_spill] sm:$0xff]  ;;  %v10092_v60 = vld [vmem:[%s8673_s5 + $0xcc] sm:$0xf]  ;;  %v10095_v27 = vld [vmem:[%s8673_s5 + $0xd0] sm:$0xf] }
 0x5e5   : > { %7721 = vmatprep.subr.bf16.mxu0 %v7720_v9  ;;  %11268 = vst [vmem:[#allocation7_spill] sm:$0xff] %v10092_v60  ;;  %11269 = vst [vmem:[#allocation8_spill] sm:$0xff] %v10095_v27  ;;  %v6248_v5 = vcombine.low %v10092_v60, %v10095_v27  ;;  %v816_v55 = vshrl.u32 %v10092_v60, 16  ;;  %v819_v3 = vshll.u32 %v10092_v60, 16  ;;  %v829_v42 = vshrl.u32 %v10095_v27, 16 }
 0x5e6   : > { %v825_v44 = vshll.u32 %v10095_v27, 16 }
 0x5e8   : > { %7723 = vmatpush3.bf16.msra.mxu0 %v7722_v48  ;;  %v818_v48 = vrot.slane %v816_v55, 4 }
 0x5e9   : > { %7725 = vmatprep.subr.bf16.mxu0 %v7724_v37 }
 0x5ec   : > { %7727 = vmatpush3.bf16.msra.mxu0 %v7726_v26  ;;  %v821_v26 = vrot.slane %v819_v3, 5 }
 0x5ed   : > { %7729 = vmatprep.subr.bf16.mxu0 %v7728_v34 }
 0x5f0   : > { %7731 = vmatpush3.bf16.msra.mxu0 %v7730_v29  ;;  %v827_v29 = vrot.slane %v825_v44, 5 }
 0x5f1   : > { %7733 = vmatprep.subr.bf16.mxu0 %v7732_v11 }
 0x5f4   : > { %7735 = vmatpush3.bf16.msra.mxu0 %v7734_v19  ;;  %v831_v19 = vrot.slane %v829_v42, 4 }
 0x5f5   : > { %7737 = vmatprep.subr.bf16.mxu0 %v7736_v18 }
 0x5f6   : > { %v832_v20 = vor.u32 %v831_v19, %v827_v29 }
 0x5f8   : > { %7739 = vmatpush3.bf16.msra.mxu0 %v7738_v50  ;;  %v10128_v50 = vld [vmem:[%s8673_s5 + $0xd4] sm:$0x1]  ;;  %v833_v34 = vrot.slane %v832_v20, 4  ;;  %s8588_s5 = smov 16  }
 0x5f9   : > { %7741 = vmatprep.subr.bf16.mxu0 %v7740_v13  ;;  %11270 = vst [vmem:[#allocation9_spill] sm:$0xff] %v10128_v50  ;;  %v835_v9 = vshll.u32 %v10128_v50, 16 }
 0x5fb   : > { %v837_v11 = vrot.slane %v835_v9, 5 }
 0x5fc   : > { %7743 = vmatpush3.bf16.msra.mxu0 %v7742_v21  ;;  %v822_v21 = vor.u32 %v821_v26, %v818_v48 }
 0x5fd   : > { %8264 = vmatprep.subr.msk.bf16.mxu0 %vm949_vm0, %v6214_v57  ;;  %v838_v57 = vsel %vm8708_vm4, %v833_v34, %v837_v11 }
 0x5fe   : > { %v823_v37 = vrot.slane %v822_v21, 4 }
 0x5ff   : > { %3025 = vmatmul.mubr.f32.vlgmr.msra.gmra.mrb[34].mxu0 %v11161_v31 }
 0x600   : > { %7345 = vmatpush3.bf16.msra.mxu0 %v3035_v16  ;;  %7346 = vmatprep.mubr.msk.bf16.mxu0 %vm900_vm3, %v11192_v30  ;;  %v828_v13 = vsel %vm8708_vm4, %v823_v37, %v827_v29 }
 0x601   : > { %8265 = vmatprep.subr.msk.bf16.mxu0 %vm949_vm0, %v6213_v40  ;;  %v10143_v16 = vcombine.low %v828_v13, %v838_v57 }
 0x603   : > { %7347 = vmatmul.mubr.msk.bf16.vlgmr.msra.gmra.mrb[36].mxu0 %vm900_vm3, %v11193_v49  ;;  %11272 = vst [vmem:[#allocation10_spill] sm:$0xff] %v10143_v16 }
 0x604   : > { %7350 = vmatprep.mubr.msk.bf16.mxu0 %vm900_vm3, %v11194_v51  ;;  %7379 = vmatpush3.bf16.msra.mxu0 %v3199_v53 }
 0x605   : > { %8266 = vmatprep.subr.msk.bf16.mxu0 %vm949_vm0, %v6247_v52 }
 0x60b   : > { %7351 = vmatmul.mubr.msk.bf16.gmra.mrb[40].mxu0 %vm900_vm3, %v11195_v24 }
 0x60c   : > { %7354 = vmatprep.mubr.msk.bf16.mxu0 %vm900_vm3, %v11196_v28 }
 0x613   : > { %7355 = vmatmul.mubr.msk.bf16.gmra.mrb[44].mxu0 %vm900_vm3, %v11197_v7 }
 0x614   : > { %7358 = vmatprep.mubr.msk.bf16.mxu0 %vm900_vm3, %v11198_v41 }
 0x61b   : > { %7359 = vmatmul.mubr.msk.bf16.gmra.mrb[48].mxu0 %vm900_vm3, %v11199_v39 }
 0x61c   : > { %7362 = vmatprep.mubr.msk.bf16.mxu0 %vm900_vm3, %v11200_v54 }
 0x623   : > { %7363 = vmatmul.mubr.msk.bf16.gmra.mrb[52].mxu0 %vm900_vm3, %v11201_v2 }
 0x624   : > { %7366 = vmatprep.mubr.msk.bf16.mxu0 %vm900_vm3, %v11246_v61 }
 0x62b   : > { %7367 = vmatmul.mubr.msk.bf16.gmra.mrb[56].mxu0 %vm900_vm3, %v11247_v43 }
 0x62c   : > { %7370 = vmatprep.mubr.msk.bf16.mxu0 %vm900_vm3, %v11248_v1 }
 0x633   : > { %7371 = vmatmul.mubr.msk.bf16.gmra.mrb[60].mxu0 %vm900_vm3, %v11249_v0 }
 0x634   : > { %7374 = vmatprep.mubr.msk.bf16.mxu0 %vm900_vm3, %v11250_v47 }
 0x63b   : > { %7375 = vmatmul.mubr.msk.bf16.gmra.mrb[64].mxu0 %vm900_vm3, %v11251_v22 }
 0x63c   : > { %7380 = vmatprep.mubr.msk.bf16.mxu0 %vm900_vm3, %v11252_v33 }
 0x643   : > { %7381 = vmatmul.mubr.msk.bf16.vlgmr.msra.gmra.mrb[36].mxu0 %vm900_vm3, %v11253_v45 }
 0x644   : > { %7384 = vmatprep.mubr.msk.bf16.mxu0 %vm900_vm3, %v11254_v58  ;;  %7413 = vmatpush3.bf16.msra.mxu0 %v3371_v15 }
 0x645   : > { %8267 = vmatprep.subr.msk.bf16.mxu0 %vm949_vm0, %v6265_v36 }
 0x64b   : > { %7385 = vmatmul.mubr.msk.bf16.gmra.mrb[40].mxu0 %vm900_vm3, %v11255_v12 }
 0x64c   : > { %7388 = vmatprep.mubr.msk.bf16.mxu0 %vm900_vm3, %v11256_v8 }
 0x653   : > { %7389 = vmatmul.mubr.msk.bf16.gmra.mrb[44].mxu0 %vm900_vm3, %v11257_v17 }
 0x654   : > { %7392 = vmatprep.mubr.msk.bf16.mxu0 %vm900_vm3, %v11258_v4 }
 0x65b   : > { %7393 = vmatmul.mubr.msk.bf16.gmra.mrb[48].mxu0 %vm900_vm3, %v11259_v14 }
 0x65c   : > { %7396 = vmatprep.mubr.msk.bf16.mxu0 %vm900_vm3, %v11260_v32 }
 0x663   : > { %7397 = vmatmul.mubr.msk.bf16.gmra.mrb[52].mxu0 %vm900_vm3, %v11261_v35 }
 0x664   : > { %7400 = vmatprep.mubr.msk.bf16.mxu0 %vm900_vm3, %v11262_v62 }
 0x66b   : > { %7401 = vmatmul.mubr.msk.bf16.gmra.mrb[56].mxu0 %vm900_vm3, %v11263_v25 }
 0x66c   : > { %7404 = vmatprep.mubr.msk.bf16.mxu0 %vm900_vm3, %v11264_v56 }
 0x673   : > { %7405 = vmatmul.mubr.msk.bf16.gmra.mrb[60].mxu0 %vm900_vm3, %v11265_v59 }
 0x674   : > { %7408 = vmatprep.mubr.msk.bf16.mxu0 %vm900_vm3, %v11266_v23 }
 0x67b   : > { %7409 = vmatmul.mubr.msk.bf16.gmra.mrb[64].mxu0 %vm900_vm3, %v11267_v63 }
 0x67c   : > { %7414 = vmatprep.mubr.msk.bf16.mxu0 %vm900_vm3, %v11253_v45 }
 0x683   : > { %7415 = vmatmul.mubr.msk.bf16.vlgmr.msra.gmra.mrb[36].mxu0 %vm900_vm3, %v11254_v58 }
 0x684   : > { %7418 = vmatprep.mubr.msk.bf16.mxu0 %vm900_vm3, %v11255_v12  ;;  %7447 = vmatpush3.bf16.msra.mxu0 %v3575_v38 }
 0x68b   : > { %7419 = vmatmul.mubr.msk.bf16.gmra.mrb[40].mxu0 %vm900_vm3, %v11256_v8 }
 0x68c   : > { %7422 = vmatprep.mubr.msk.bf16.mxu0 %vm900_vm3, %v11257_v17 }
 0x693   : > { %7423 = vmatmul.mubr.msk.bf16.gmra.mrb[44].mxu0 %vm900_vm3, %v11258_v4 }
 0x694   : > { %7426 = vmatprep.mubr.msk.bf16.mxu0 %vm900_vm3, %v11259_v14 }
 0x69b   : > { %7427 = vmatmul.mubr.msk.bf16.gmra.mrb[48].mxu0 %vm900_vm3, %v11260_v32 }
 0x69c   : > { %7430 = vmatprep.mubr.msk.bf16.mxu0 %vm900_vm3, %v11261_v35 }
 0x6a3   : > { %7431 = vmatmul.mubr.msk.bf16.gmra.mrb[52].mxu0 %vm900_vm3, %v11262_v62 }
 0x6a4   : > { %7434 = vmatprep.mubr.msk.bf16.mxu0 %vm900_vm3, %v11263_v25 }
 0x6ab   : > { %7435 = vmatmul.mubr.msk.bf16.gmra.mrb[56].mxu0 %vm900_vm3, %v11264_v56 }
 0x6ac   : > { %7438 = vmatprep.mubr.msk.bf16.mxu0 %vm900_vm3, %v11265_v59 }
 0x6b3   : > { %7439 = vmatmul.mubr.msk.bf16.gmra.mrb[60].mxu0 %vm900_vm3, %v11266_v23 }
 0x6b4   : > { %7442 = vmatprep.mubr.msk.bf16.mxu0 %vm900_vm3, %v11267_v63 }
 0x6bb   : > { %7443 = vmatmul.mubr.msk.bf16.gmra.mrb[64].mxu0 %vm900_vm3, %v6248_v5 }
 0x6bc   : > { %7448 = vmatprep.mubr.msk.bf16.mxu0 %vm900_vm3, %v11193_v49 }
 0x6c3   : > { %7449 = vmatmul.mubr.msk.bf16.vlgmr.msra.gmra.mrb[36].mxu0 %vm900_vm3, %v11194_v51 }
 0x6c4   : > { %7452 = vmatprep.mubr.msk.bf16.mxu0 %vm900_vm3, %v11195_v24 }
 0x6cb   : > { %7453 = vmatmul.mubr.msk.bf16.gmra.mrb[40].mxu0 %vm900_vm3, %v11196_v28 }
 0x6cc   : > { %7456 = vmatprep.mubr.msk.bf16.mxu0 %vm900_vm3, %v11197_v7 }
 0x6d2   : > { %v6793_v10 = vpop.f32.mrb[34].mxu0 }
 0x6d3   : > { %v6794_v46 = vpop.f32.mrb[35].mxu0  ;;  %7457 = vmatmul.mubr.msk.bf16.gmra.mrb[44].mxu0 %vm900_vm3, %v11198_v41 }
 0x6d4   : > { %v6795_v6 = vadd.f32 %v6794_v46, %v6793_v10  ;;  %7460 = vmatprep.mubr.msk.bf16.mxu0 %vm900_vm3, %v11199_v39 }
 0x6d6   : > { %5585 = vrot.lane.b32.xlu1 %v6795_v6, %s8587_s27 }
 0x6db   : > { %7461 = vmatmul.mubr.msk.bf16.gmra.mrb[48].mxu0 %vm900_vm3, %v11200_v54 }
 0x6dc   : > { %7464 = vmatprep.mubr.msk.bf16.mxu0 %vm900_vm3, %v11201_v2 }
 0x6e3   : > { %7465 = vmatmul.mubr.msk.bf16.gmra.mrb[52].mxu0 %vm900_vm3, %v11246_v61 }
 0x6e4   : > { %7468 = vmatprep.mubr.msk.bf16.mxu0 %vm900_vm3, %v11247_v43 }
 0x6eb   : > { %7469 = vmatmul.mubr.msk.bf16.gmra.mrb[56].mxu0 %vm900_vm3, %v11248_v1 }
 0x6ec   : > { %7472 = vmatprep.mubr.msk.bf16.mxu0 %vm900_vm3, %v11249_v0 }
 0x6f3   : > { %7473 = vmatmul.mubr.msk.bf16.gmra.mrb[60].mxu0 %vm900_vm3, %v11250_v47 }
 0x6f4   : > { %7476 = vmatprep.mubr.msk.bf16.mxu0 %vm900_vm3, %v11251_v22 }
 0x6fb   : > { %7477 = vmatmul.mubr.msk.bf16.gmra.mrb[64].mxu0 %vm900_vm3, %v10143_v16 }
 0x6fc   : > { %4777 = vmatprep.mubr.f32.mxu0 %v11161_v31 }
 0x796   : > { %v10148_v40 = vpop.f32.mrb[36].mxu0 }
 0x797   : > { %11273 = vst [vmem:[#allocation11_spill] sm:$0xff] %v10148_v40  ;;  %v10150_v53 = vpop.f32.mrb[37].mxu0 }
 0x798   : > { %11274 = vst [vmem:[#allocation12_spill] sm:$0xff] %v10150_v53  ;;  %v10152_v52 = vpop.f32.mrb[38].mxu0 }
 0x799   : > { %11275 = vst [vmem:[#allocation13_spill] sm:$0xff] %v10152_v52  ;;  %v7750_v33 = vpack.c.bf16 %v10152_v52, %v10148_v40  ;;  %v10156_v15 = vpop.f32.mrb[39].mxu0 }
 0x79a   : > { %11276 = vst [vmem:[#allocation15_spill] sm:$0xff] %v10156_v15  ;;  %v7746_v36 = vpack.c.bf16 %v10156_v15, %v10150_v53 }
 0x79e   : > { %v10160_v45 = vpop.f32.mrb[40].mxu0 }
 0x79f   : > { %11277 = vst [vmem:[#allocation17_spill] sm:$0xff] %v10160_v45  ;;  %v10162_v58 = vpop.f32.mrb[41].mxu0 }
 0x7a0   : > { %11278 = vst [vmem:[#allocation19_spill] sm:$0xff] %v10162_v58  ;;  %v10164_v12 = vpop.f32.mrb[42].mxu0 }
 0x7a1   : > { %11279 = vst [vmem:[#allocation21_spill] sm:$0xff] %v10164_v12  ;;  %v7758_v8 = vpack.c.bf16 %v10164_v12, %v10160_v45  ;;  %v10168_v17 = vpop.f32.mrb[43].mxu0 }
 0x7a2   : > { %11280 = vst [vmem:[#allocation48_spill] sm:$0xff] %v10168_v17  ;;  %v7754_v4 = vpack.c.bf16 %v10168_v17, %v10162_v58 }
 0x7a6   : > { %v10172_v14 = vpop.f32.mrb[44].mxu0 }
 0x7a7   : > { %11281 = vst [vmem:[#allocation47_spill] sm:$0xff] %v10172_v14  ;;  %v10174_v32 = vpop.f32.mrb[45].mxu0 }
 0x7a8   : > { %11282 = vst [vmem:[#allocation50_spill] sm:$0xff] %v10174_v32  ;;  %v10176_v35 = vpop.f32.mrb[46].mxu0 }
 0x7a9   : > { %11283 = vst [vmem:[#allocation54_spill] sm:$0xff] %v10176_v35  ;;  %v7766_v62 = vpack.c.bf16 %v10176_v35, %v10172_v14  ;;  %v10180_v25 = vpop.f32.mrb[47].mxu0 }
 0x7aa   : > { %11284 = vst [vmem:[#allocation52_spill] sm:$0xff] %v10180_v25  ;;  %v7762_v56 = vpack.c.bf16 %v10180_v25, %v10174_v32 }
 0x7ae   : > { %v10184_v59 = vpop.f32.mrb[48].mxu0 }
 0x7af   : > { %11285 = vst [vmem:[#allocation55_spill] sm:$0xff] %v10184_v59  ;;  %v10186_v23 = vpop.f32.mrb[49].mxu0 }
 0x7b0   : > { %11286 = vst [vmem:[#allocation53_spill] sm:$0xff] %v10186_v23  ;;  %v10188_v63 = vpop.f32.mrb[50].mxu0 }
 0x7b1   : > { %11287 = vst [vmem:[#allocation58_spill] sm:$0xff] %v10188_v63  ;;  %v7774_v38 = vpack.c.bf16 %v10188_v63, %v10184_v59  ;;  %v10192_v5 = vpop.f32.mrb[51].mxu0 }
 0x7b2   : > { %11288 = vst [vmem:[#allocation56_spill] sm:$0xff] %v10192_v5  ;;  %v7770_v10 = vpack.c.bf16 %v10192_v5, %v10186_v23 }
 0x7b6   : > { %v10196_v46 = vpop.f32.mrb[52].mxu0 }
 0x7b7   : > { %11289 = vst [vmem:[#allocation59_spill] sm:$0xff] %v10196_v46  ;;  %v10198_v6 = vpop.f32.mrb[53].mxu0 }
 0x7b8   : > { %11290 = vst [vmem:[#allocation57_spill] sm:$0xff] %v10198_v6  ;;  %v10200_v55 = vpop.f32.mrb[54].mxu0 }
 0x7b9   : > { %11291 = vst [vmem:[#allocation62_spill] sm:$0xff] %v10200_v55  ;;  %v7748_v3 = vpack.c.bf16 %v10200_v55, %v10196_v46  ;;  %v10204_v42 = vpop.f32.mrb[55].mxu0 }
 0x7ba   : > { %11292 = vst [vmem:[#allocation60_spill] sm:$0xff] %v10204_v42  ;;  %v7744_v44 = vpack.c.bf16 %v10204_v42, %v10198_v6 }
 0x7bc   : > { %7745 = vmatprep.subr.bf16.mxu1 %v7744_v44 }
 0x7bd   : > { %7747 = vmatpush3.bf16.msra.mxu1 %v7746_v36 }
 0x7be   : > { %v10208_v48 = vpop.f32.mrb[56].mxu0  ;;  %7749 = vmatprep.subr.bf16.mxu1 %v7748_v3 }
 0x7bf   : > { %11293 = vst [vmem:[#allocation63_spill] sm:$0xff] %v10208_v48  ;;  %v10210_v26 = vpop.f32.mrb[57].mxu0 }
 0x7c0   : > { %11294 = vst [vmem:[#allocation61_spill] sm:$0xff] %v10210_v26  ;;  %v10212_v29 = vpop.f32.mrb[58].mxu0 }
 0x7c1   : > { %11295 = vst [vmem:[#allocation66_spill] sm:$0xff] %v10212_v29  ;;  %v7756_v19 = vpack.c.bf16 %v10212_v29, %v10208_v48  ;;  %v10216_v21 = vpop.f32.mrb[59].mxu0  ;;  %7751 = vmatpush3.bf16.msra.mxu1 %v7750_v33 }
 0x7c2   : > { %11296 = vst [vmem:[#allocation64_spill] sm:$0xff] %v10216_v21  ;;  %v7752_v20 = vpack.c.bf16 %v10216_v21, %v10210_v26 }
 0x7c4   : > { %7753 = vmatprep.subr.bf16.mxu1 %v7752_v20 }
 0x7c5   : > { %7755 = vmatpush3.bf16.msra.mxu1 %v7754_v4 }
 0x7c6   : > { %v10220_v9 = vpop.f32.mrb[60].mxu0  ;;  %7757 = vmatprep.subr.bf16.mxu1 %v7756_v19 }
 0x7c7   : > { %11297 = vst [vmem:[#allocation67_spill] sm:$0xff] %v10220_v9  ;;  %v10222_v37 = vpop.f32.mrb[61].mxu0 }
 0x7c8   : > { %11298 = vst [vmem:[#allocation65_spill] sm:$0xff] %v10222_v37  ;;  %v10224_v34 = vpop.f32.mrb[62].mxu0 }
 0x7c9   : > { %11299 = vst [vmem:[#allocation70_spill] sm:$0xff] %v10224_v34  ;;  %v7764_v11 = vpack.c.bf16 %v10224_v34, %v10220_v9  ;;  %v10228_v18 = vpop.f32.mrb[63].mxu0  ;;  %7759 = vmatpush3.bf16.msra.mxu1 %v7758_v8 }
 0x7ca   : > { %11300 = vst [vmem:[#allocation68_spill] sm:$0xff] %v10228_v18  ;;  %v7760_v13 = vpack.c.bf16 %v10228_v18, %v10222_v37 }
 0x7cc   : > { %7761 = vmatprep.subr.bf16.mxu1 %v7760_v13 }
 0x7cd   : > { %7763 = vmatpush3.bf16.msra.mxu1 %v7762_v56 }
 0x7ce   : > { %v10232_v57 = vpop.f32.mrb[64].mxu0  ;;  %7765 = vmatprep.subr.bf16.mxu1 %v7764_v11  ;;  %v11304_v11 = vld [vmem:[#allocation85_spill] sm:$0xff] }
 0x7cf   : > { %11301 = vst [vmem:[#allocation71_spill] sm:$0xff] %v10232_v57  ;;  %v10234_v33 = vpop.f32.mrb[65].mxu0 }
 0x7d0   : > { %11302 = vst [vmem:[#allocation69_spill] sm:$0xff] %v10234_v33  ;;  %v10236_v36 = vpop.f32.mrb[66].mxu0 }
 0x7d1   : > { %v7772_v4 = vpack.c.bf16 %v10236_v36, %v10232_v57  ;;  %v10240_v3 = vpop.f32.mrb[67].mxu0  ;;  %7767 = vmatpush3.bf16.msra.mxu1 %v7766_v62 }
 0x7d2   : > { %11303 = vst [vmem:[#allocation74_spill] sm:$0xff] %v10240_v3  ;;  %v7768_v8 = vpack.c.bf16 %v10240_v3, %v10234_v33 }
 0x7d4   : > { %7769 = vmatprep.subr.bf16.mxu1 %v7768_v8 }
 0x7d5   : > { %7771 = vmatpush3.bf16.msra.mxu1 %v7770_v10 }
 0x7d6   : > { %7773 = vmatprep.subr.bf16.mxu1 %v7772_v4 }
 0x7d9   : > { %7775 = vmatpush3.bf16.msra.mxu1 %v7774_v38 }
 0x7dc   : > { %3835 = vmatmul.mubr.f32.vlgmr.msra.gmra.mrb[36].mxu1 %v11161_v31 }
 0x7dd   : > { %3973 = vmatprep.mubr.f32.mxu1 %v11161_v31 }
 0x8af   : > { %v6896_v56 = vpop.f32.mrb[36].mxu1 }
 0x8b0   : > { %v6897_v44 = vpop.f32.mrb[37].mxu1 }
 0x8b1   : > { %v6898_v19 = vadd.f32 %v6897_v44, %v6896_v56 }
 0x8b3   : > { %v3840_v20 = vmul.f32 0.00390625, %v6898_v19  ;;  %5570 = vrot.lane.b32.xlu0 %v6898_v19, %s8588_s5 }
 0x8b5   : > { %v3844_v62 = vrot.slane %v3840_v20, %v11304_v11 }
 0x8b7   : > { %v3845_v13 = vsub.f32 %v10150_v53, %v3844_v62  ;;  %v3846_v8 = vsub.f32 %v10156_v15, %v3844_v62  ;;  %v3847_v10 = vsub.f32 %v10148_v40, %v3844_v62  ;;  %v3848_v38 = vsub.f32 %v10152_v52, %v3844_v62 }
 0x8b8   : > { %v3849_v4 = vsub.f32 %v10162_v58, %v3844_v62  ;;  %v3850_v50 = vsub.f32 %v10168_v17, %v3844_v62  ;;  %v3851_v56 = vsub.f32 %v10160_v45, %v3844_v62  ;;  %v3852_v44 = vsub.f32 %v10164_v12, %v3844_v62 }
 0x8b9   : > { %v3853_v19 = vsub.f32 %v10174_v32, %v3844_v62  ;;  %v3854_v20 = vsub.f32 %v10180_v25, %v3844_v62  ;;  %v3855_v11 = vsub.f32 %v10172_v14, %v3844_v62  ;;  %v3856_v53 = vsub.f32 %v10176_v35, %v3844_v62 }
 0x8ba   : > { %v3857_v15 = vsub.f32 %v10186_v23, %v3844_v62  ;;  %v3858_v40 = vsub.f32 %v10192_v5, %v3844_v62  ;;  %v3859_v58 = vsub.f32 %v10184_v59, %v3844_v62  ;;  %v3860_v17 = vsub.f32 %v10188_v63, %v3844_v62 }
 0x8bb   : > { %v3861_v45 = vsub.f32 %v10198_v6, %v3844_v62  ;;  %v3862_v12 = vsub.f32 %v10204_v42, %v3844_v62  ;;  %v3863_v32 = vsub.f32 %v10196_v46, %v3844_v62  ;;  %v3864_v25 = vsub.f32 %v10200_v55, %v3844_v62 }
 0x8bc   : > { %v3865_v14 = vsub.f32 %v10210_v26, %v3844_v62  ;;  %v3866_v35 = vsub.f32 %v10216_v21, %v3844_v62  ;;  %v3867_v23 = vsub.f32 %v10208_v48, %v3844_v62  ;;  %v3868_v5 = vsub.f32 %v10212_v29, %v3844_v62 }
 0x8bd   : > { %v3869_v59 = vsub.f32 %v10222_v37, %v3844_v62  ;;  %v3870_v63 = vsub.f32 %v10228_v18, %v3844_v62  ;;  %v3871_v6 = vsub.f32 %v10220_v9, %v3844_v62  ;;  %v3872_v42 = vsub.f32 %v10224_v34, %v3844_v62 }
 0x8be   : > { %v3873_v46 = vsub.f32 %v10234_v33, %v3844_v62  ;;  %v3874_v55 = vsub.f32 %v10240_v3, %v3844_v62  ;;  %v3875_v26 = vsub.f32 %v10232_v57, %v3844_v62  ;;  %v3876_v21 = vsub.f32 %v10236_v36, %v3844_v62 }
 0x8bf   : > { %v3877_v52 = vmul.f32 %v3845_v13, %v3845_v13  ;;  %v3878_v48 = vmul.f32 %v3846_v8, %v3846_v8  ;;  %v3879_v60 = vmul.f32 %v3847_v10, %v3847_v10  ;;  %v3880_v29 = vmul.f32 %v3848_v38, %v3848_v38 }
 0x8c0   : > { %v3881_v27 = vmul.f32 %v3849_v4, %v3849_v4  ;;  %v3882_v37 = vmul.f32 %v3850_v50, %v3850_v50  ;;  %v3883_v16 = vmul.f32 %v3851_v56, %v3851_v56  ;;  %v3884_v18 = vmul.f32 %v3852_v44, %v3852_v44 }
 0x8c1   : > { %v3885_v22 = vmul.f32 %v3853_v19, %v3853_v19  ;;  %v3886_v9 = vmul.f32 %v3854_v20, %v3854_v20  ;;  %v3887_v47 = vmul.f32 %v3855_v11, %v3855_v11  ;;  %v3888_v34 = vmul.f32 %v3856_v53, %v3856_v53 }
 0x8c2   : > { %v3889_v0 = vmul.f32 %v3857_v15, %v3857_v15  ;;  %v3890_v33 = vmul.f32 %v3858_v40, %v3858_v40  ;;  %v3891_v1 = vmul.f32 %v3859_v58, %v3859_v58  ;;  %v3892_v3 = vmul.f32 %v3860_v17, %v3860_v17 }
 0x8c3   : > { %v3893_v43 = vmul.f32 %v3861_v45, %v3861_v45  ;;  %v3894_v57 = vmul.f32 %v3862_v12, %v3862_v12  ;;  %v3895_v61 = vmul.f32 %v3863_v32, %v3863_v32  ;;  %v3896_v62 = vmul.f32 %v3864_v25, %v3864_v25 }
 0x8c4   : > { %v3897_v13 = vmul.f32 %v3865_v14, %v3865_v14  ;;  %v3898_v8 = vmul.f32 %v3866_v35, %v3866_v35  ;;  %v3899_v10 = vmul.f32 %v3867_v23, %v3867_v23  ;;  %v3900_v38 = vmul.f32 %v3868_v5, %v3868_v5 }
 0x8c5   : > { %v3901_v4 = vmul.f32 %v3869_v59, %v3869_v59  ;;  %v3902_v50 = vmul.f32 %v3870_v63, %v3870_v63  ;;  %v3903_v56 = vmul.f32 %v3871_v6, %v3871_v6  ;;  %v3904_v44 = vmul.f32 %v3872_v42, %v3872_v42  ;;  %v11311_v42 = vld [vmem:[#allocation93_spill] sm:$0xff] }
 0x8c6   : > { %v3905_v19 = vmul.f32 %v3873_v46, %v3873_v46  ;;  %v3906_v20 = vmul.f32 %v3874_v55, %v3874_v55  ;;  %v3907_v11 = vmul.f32 %v3875_v26, %v3875_v26  ;;  %v3908_v53 = vmul.f32 %v3876_v21, %v3876_v21  ;;  %v11310_v55 = vld [vmem:[#allocation92_spill] sm:$0xff]  ;;  %v11313_v26 = vld [vmem:[#allocation14_spill] sm:$0xff] }
 0x8c7   : > { %v7776_v15 = vpack.c.bf16 %v3894_v57, %v3893_v43  ;;  %v7778_v40 = vpack.c.bf16 %v3878_v48, %v3877_v52  ;;  %v7782_v58 = vpack.c.bf16 %v3880_v29, %v3879_v60  ;;  %v7786_v17 = vpack.c.bf16 %v3882_v37, %v3881_v27  ;;  %v11306_v60 = vld [vmem:[#allocation88_spill] sm:$0xff]  ;;  %v11307_v27 = vld [vmem:[#allocation89_spill] sm:$0xff]  ;;  %v11309_v52 = vld [vmem:[#allocation91_spill] sm:$0xff] }
 0x8c8   : > { %v7790_v45 = vpack.c.bf16 %v3884_v18, %v3883_v16  ;;  %v7794_v12 = vpack.c.bf16 %v3886_v9, %v3885_v22  ;;  %v7798_v32 = vpack.c.bf16 %v3888_v34, %v3887_v47  ;;  %v7802_v25 = vpack.c.bf16 %v3890_v33, %v3889_v0  ;;  %v11305_v0 = vld [vmem:[#allocation87_spill] sm:$0xff]  ;;  %v6317_v22 = vld [vmem:[%s10877_s1 + $0x1c] sm:$0x3]  ;;  %v11308_v16 = vld [vmem:[#allocation90_spill] sm:$0xff] }
 0x8c9   : > { %7777 = vmatprep.subr.bf16.mxu1 %v7776_v15  ;;  %v7806_v14 = vpack.c.bf16 %v3892_v3, %v3891_v1  ;;  %v7780_v35 = vpack.c.bf16 %v3896_v62, %v3895_v61  ;;  %v7784_v23 = vpack.c.bf16 %v3898_v8, %v3897_v13  ;;  %v7788_v59 = vpack.c.bf16 %v3900_v38, %v3899_v10  ;;  %v6284_v61 = vld [vmem:[%s10877_s1 + $0x1a] sm:$0x3]  ;;  %v6283_v1 = vld [vmem:[%s10877_s1 + $0x18] sm:$0x3]  ;;  %v11312_v48 = vld [vmem:[#allocation94_spill] sm:$0xff] }
 0x8ca   : > { %7779 = vmatpush3.bf16.msra.mxu1 %v7778_v40  ;;  %v7792_v63 = vpack.c.bf16 %v3902_v50, %v3901_v4  ;;  %v7796_v5 = vpack.c.bf16 %v3904_v44, %v3903_v56  ;;  %v7800_v46 = vpack.c.bf16 %v3906_v20, %v3905_v19  ;;  %v7804_v6 = vpack.c.bf16 %v3908_v53, %v3907_v11  ;;  %v11314_v29 = vld [vmem:[#allocation16_spill] sm:$0xff]  ;;  %v11315_v21 = vld [vmem:[#allocation18_spill] sm:$0xff]  ;;  %v11319_v18 = vld [vmem:[#allocation27_spill] sm:$0xff] }
 0x8cb   : > { %7781 = vmatprep.subr.bf16.mxu1 %v7780_v35  ;;  %v3984_v43 = vsel %vm949_vm0, %v6284_v61, 0  ;;  %v4148_v47 = vsel %vm949_vm0, %v6283_v1, 0  ;;  %v11316_v9 = vld [vmem:[#allocation20_spill] sm:$0xff]  ;;  %v11317_v37 = vld [vmem:[#allocation22_spill] sm:$0xff]  ;;  %v4314_v33 = vsel %vm949_vm0, %v6317_v22, 0  ;;  %v11323_v13 = vld [vmem:[#allocation29_spill] sm:$0xff] }
 0x8cc   : > { %v11318_v34 = vld [vmem:[#allocation24_spill] sm:$0xff]  ;;  %v6334_v3 = vld [vmem:[%s10877_s1 + $0x1e] sm:$0x3]  ;;  %v11322_v62 = vld [vmem:[#allocation26_spill] sm:$0xff] }
 0x8cd   : > { %v11320_v57 = vld [vmem:[#allocation28_spill] sm:$0xff]  ;;  %v11324_v8 = vld [vmem:[#allocation30_spill] sm:$0xff]  ;;  %v11325_v10 = vld [vmem:[#allocation31_spill] sm:$0xff]  ;;  %v4518_v4 = vsel %vm949_vm0, %v6334_v3, 0 }
 0x8ce   : > { %7783 = vmatpush3.bf16.msra.mxu1 %v7782_v58  ;;  %v11326_v38 = vld [vmem:[#allocation51_spill] sm:$0xff]  ;;  %v11330_v50 = vld [vmem:[#allocation9_spill] sm:$0xff] }
 0x8cf   : > { %7785 = vmatprep.subr.bf16.mxu1 %v7784_v23  ;;  %v847_v56 = vrot.slane %v11330_v50, 5 }
 0x8d2   : > { %7787 = vmatpush3.bf16.msra.mxu1 %v7786_v17 }
 0x8d3   : > { %7789 = vmatprep.subr.bf16.mxu1 %v7788_v59 }
 0x8d6   : > { %7791 = vmatpush3.bf16.msra.mxu1 %v7790_v45 }
 0x8d7   : > { %7793 = vmatprep.subr.bf16.mxu1 %v7792_v63 }
 0x8da   : > { %7795 = vmatpush3.bf16.msra.mxu1 %v7794_v12 }
 0x8db   : > { %7797 = vmatprep.subr.bf16.mxu1 %v7796_v5 }
 0x8de   : > { %7799 = vmatpush3.bf16.msra.mxu1 %v7798_v32 }
 0x8df   : > { %7801 = vmatprep.subr.bf16.mxu1 %v7800_v46 }
 0x8e2   : > { %7803 = vmatpush3.bf16.msra.mxu1 %v7802_v25 }
 0x8e3   : > { %7805 = vmatprep.subr.bf16.mxu1 %v7804_v6 }
 0x8e6   : > { %7807 = vmatpush3.bf16.msra.mxu1 %v7806_v14 }
 0x8e7   : > { %8268 = vmatprep.subr.msk.bf16.mxu1 %vm949_vm0, %v6284_v61 }
 0x8e9   : > { %3974 = vmatmul.mubr.f32.vlgmr.msra.gmra.mrb[38].mxu1 %v11161_v31 }
 0x8ea   : > { %7481 = vmatpush3.bf16.msra.mxu1 %v3984_v43  ;;  %7482 = vmatprep.mubr.msk.bf16.mxu1 %vm900_vm3, %v11305_v0 }
 0x8eb   : > { %8269 = vmatprep.subr.msk.bf16.mxu1 %vm949_vm0, %v6283_v1 }
 0x8ed   : > { %7483 = vmatmul.mubr.msk.bf16.vlgmr.msra.gmra.mrb[40].mxu1 %vm900_vm3, %v11306_v60 }
 0x8ee   : > { %7486 = vmatprep.mubr.msk.bf16.mxu1 %vm900_vm3, %v11307_v27  ;;  %7515 = vmatpush3.bf16.msra.mxu1 %v4148_v47 }
 0x8ef   : > { %8270 = vmatprep.subr.msk.bf16.mxu1 %vm949_vm0, %v6317_v22 }
 0x8f5   : > { %7487 = vmatmul.mubr.msk.bf16.gmra.mrb[44].mxu1 %vm900_vm3, %v11308_v16 }
 0x8f6   : > { %7490 = vmatprep.mubr.msk.bf16.mxu1 %vm900_vm3, %v11309_v52 }
 0x8fd   : > { %7491 = vmatmul.mubr.msk.bf16.gmra.mrb[48].mxu1 %vm900_vm3, %v11310_v55 }
 0x8fe   : > { %7494 = vmatprep.mubr.msk.bf16.mxu1 %vm900_vm3, %v11311_v42 }
 0x905   : > { %7495 = vmatmul.mubr.msk.bf16.gmra.mrb[52].mxu1 %vm900_vm3, %v11312_v48 }
 0x906   : > { %7498 = vmatprep.mubr.msk.bf16.mxu1 %vm900_vm3, %v11313_v26 }
 0x90d   : > { %7499 = vmatmul.mubr.msk.bf16.gmra.mrb[56].mxu1 %vm900_vm3, %v11314_v29 }
 0x90e   : > { %7502 = vmatprep.mubr.msk.bf16.mxu1 %vm900_vm3, %v11315_v21 }
 0x915   : > { %7503 = vmatmul.mubr.msk.bf16.gmra.mrb[60].mxu1 %vm900_vm3, %v11316_v9 }
 0x916   : > { %7506 = vmatprep.mubr.msk.bf16.mxu1 %vm900_vm3, %v11317_v37 }
 0x91d   : > { %7507 = vmatmul.mubr.msk.bf16.gmra.mrb[64].mxu1 %vm900_vm3, %v11318_v34 }
 0x91e   : > { %7510 = vmatprep.mubr.msk.bf16.mxu1 %vm900_vm3, %v11319_v18 }
 0x925   : > { %7511 = vmatmul.mubr.msk.bf16.gmra.mrb[68].mxu1 %vm900_vm3, %v11320_v57 }
 0x926   : > { %7516 = vmatprep.mubr.msk.bf16.mxu1 %vm900_vm3, %v11192_v30  ;;  %v11321_v30 = vld [vmem:[#allocation23_spill] sm:$0xff] }
 0x92d   : > { %7517 = vmatmul.mubr.msk.bf16.vlgmr.msra.gmra.mrb[40].mxu1 %vm900_vm3, %v11193_v49 }
 0x92e   : > { %7520 = vmatprep.mubr.msk.bf16.mxu1 %vm900_vm3, %v11194_v51  ;;  %7549 = vmatpush3.bf16.msra.mxu1 %v4314_v33 }
 0x92f   : > { %8271 = vmatprep.subr.msk.bf16.mxu1 %vm949_vm0, %v6334_v3 }
 0x935   : > { %7521 = vmatmul.mubr.msk.bf16.gmra.mrb[44].mxu1 %vm900_vm3, %v11195_v24 }
 0x936   : > { %7524 = vmatprep.mubr.msk.bf16.mxu1 %vm900_vm3, %v11196_v28 }
 0x93d   : > { %7525 = vmatmul.mubr.msk.bf16.gmra.mrb[48].mxu1 %vm900_vm3, %v11197_v7 }
 0x93e   : > { %7528 = vmatprep.mubr.msk.bf16.mxu1 %vm900_vm3, %v11198_v41 }
 0x945   : > { %7529 = vmatmul.mubr.msk.bf16.gmra.mrb[52].mxu1 %vm900_vm3, %v11199_v39 }
 0x946   : > { %7532 = vmatprep.mubr.msk.bf16.mxu1 %vm900_vm3, %v11200_v54 }
 0x94d   : > { %7533 = vmatmul.mubr.msk.bf16.gmra.mrb[56].mxu1 %vm900_vm3, %v11201_v2 }
 0x94e   : > { %7536 = vmatprep.mubr.msk.bf16.mxu1 %vm900_vm3, %v11321_v30 }
 0x955   : > { %7537 = vmatmul.mubr.msk.bf16.gmra.mrb[60].mxu1 %vm900_vm3, %v11322_v62 }
 0x956   : > { %7540 = vmatprep.mubr.msk.bf16.mxu1 %vm900_vm3, %v11323_v13 }
 0x95d   : > { %7541 = vmatmul.mubr.msk.bf16.gmra.mrb[64].mxu1 %vm900_vm3, %v11324_v8 }
 0x95e   : > { %7544 = vmatprep.mubr.msk.bf16.mxu1 %vm900_vm3, %v11325_v10 }
 0x965   : > { %7545 = vmatmul.mubr.msk.bf16.gmra.mrb[68].mxu1 %vm900_vm3, %v11326_v38 }
 0x966   : > { %7550 = vmatprep.mubr.msk.bf16.mxu1 %vm900_vm3, %v11193_v49  ;;  %v11327_v49 = vld [vmem:[#allocation10_spill] sm:$0xff] }
 0x96d   : > { %7551 = vmatmul.mubr.msk.bf16.vlgmr.msra.gmra.mrb[40].mxu1 %vm900_vm3, %v11194_v51 }
 0x96e   : > { %7554 = vmatprep.mubr.msk.bf16.mxu1 %vm900_vm3, %v11195_v24  ;;  %7583 = vmatpush3.bf16.msra.mxu1 %v4518_v4 }
 0x975   : > { %7555 = vmatmul.mubr.msk.bf16.gmra.mrb[44].mxu1 %vm900_vm3, %v11196_v28 }
 0x976   : > { %7558 = vmatprep.mubr.msk.bf16.mxu1 %vm900_vm3, %v11197_v7  ;;  %v11328_v7 = vld [vmem:[#allocation8_spill] sm:$0xff] }
 0x97d   : > { %7559 = vmatmul.mubr.msk.bf16.gmra.mrb[48].mxu1 %vm900_vm3, %v11198_v41  ;;  %v844_v41 = vrot.slane %v11328_v7, 5 }
 0x97e   : > { %7562 = vmatprep.mubr.msk.bf16.mxu1 %vm900_vm3, %v11199_v39  ;;  %v11329_v39 = vld [vmem:[#allocation7_spill] sm:$0xff] }
 0x985   : > { %7563 = vmatmul.mubr.msk.bf16.gmra.mrb[52].mxu1 %vm900_vm3, %v11200_v54  ;;  %v6026_v54 = vrot.slane %v11329_v39, 9 }
 0x986   : > { %7566 = vmatprep.mubr.msk.bf16.mxu1 %vm900_vm3, %v11201_v2  ;;  %v846_v2 = vrot.slane %v844_v41, 4 }
 0x987   : > { %v845_v19 = vsel %vm9356_vm7, %v6026_v54, %v844_v41 }
 0x988   : > { %v848_v20 = vsel %vm9356_vm7, %v846_v2, %v847_v56 }
 0x989   : > { %v6335_v11 = vcombine.low %v845_v19, %v848_v20 }
 0x98d   : > { %7567 = vmatmul.mubr.msk.bf16.gmra.mrb[56].mxu1 %vm900_vm3, %v11321_v30 }
 0x98e   : > { %7570 = vmatprep.mubr.msk.bf16.mxu1 %vm900_vm3, %v11322_v62 }
 0x995   : > { %7571 = vmatmul.mubr.msk.bf16.gmra.mrb[60].mxu1 %vm900_vm3, %v11323_v13 }
 0x996   : > { %7574 = vmatprep.mubr.msk.bf16.mxu1 %vm900_vm3, %v11324_v8 }
 0x99d   : > { %7575 = vmatmul.mubr.msk.bf16.gmra.mrb[64].mxu1 %vm900_vm3, %v11325_v10 }
 0x99e   : > { %7578 = vmatprep.mubr.msk.bf16.mxu1 %vm900_vm3, %v11326_v38 }
 0x9a5   : > { %7579 = vmatmul.mubr.msk.bf16.gmra.mrb[68].mxu1 %vm900_vm3, %v11327_v49 }
 0x9a6   : > { %7584 = vmatprep.mubr.msk.bf16.mxu1 %vm900_vm3, %v11306_v60 }
 0x9ad   : > { %7585 = vmatmul.mubr.msk.bf16.vlgmr.msra.gmra.mrb[40].mxu1 %vm900_vm3, %v11307_v27 }
 0x9ae   : > { %7588 = vmatprep.mubr.msk.bf16.mxu1 %vm900_vm3, %v11308_v16 }
 0x9b5   : > { %7589 = vmatmul.mubr.msk.bf16.gmra.mrb[44].mxu1 %vm900_vm3, %v11309_v52 }
 0x9b6   : > { %7592 = vmatprep.mubr.msk.bf16.mxu1 %vm900_vm3, %v11310_v55 }
 0x9bc   : > { %v6931_v51 = vpop.f32.mrb[38].mxu1 }
 0x9bd   : > { %v6932_v24 = vpop.f32.mrb[39].mxu1  ;;  %7593 = vmatmul.mubr.msk.bf16.gmra.mrb[48].mxu1 %vm900_vm3, %v11311_v42 }
 0x9be   : > { %v6933_v28 = vadd.f32 %v6932_v24, %v6931_v51  ;;  %7596 = vmatprep.mubr.msk.bf16.mxu1 %vm900_vm3, %v11312_v48 }
 0x9c0   : > { %5589 = vrot.lane.b32.xlu1 %v6933_v28, %s8588_s5  ;;  %s10777_s5 = scalar_lea.vmem (%p8649_p5), %s10878_s2, %s6519_s10 }
 0x9c5   : > { %7597 = vmatmul.mubr.msk.bf16.gmra.mrb[52].mxu1 %vm900_vm3, %v11313_v26 }
 0x9c6   : > { %7600 = vmatprep.mubr.msk.bf16.mxu1 %vm900_vm3, %v11314_v29 }
 0x9cd   : > { %7601 = vmatmul.mubr.msk.bf16.gmra.mrb[56].mxu1 %vm900_vm3, %v11315_v21 }
 0x9ce   : > { %7604 = vmatprep.mubr.msk.bf16.mxu1 %vm900_vm3, %v11316_v9 }
 0x9d5   : > { %7605 = vmatmul.mubr.msk.bf16.gmra.mrb[60].mxu1 %vm900_vm3, %v11317_v37 }
 0x9d6   : > { %7608 = vmatprep.mubr.msk.bf16.mxu1 %vm900_vm3, %v11318_v34 }
 0x9dd   : > { %7609 = vmatmul.mubr.msk.bf16.gmra.mrb[64].mxu1 %vm900_vm3, %v11319_v18 }
 0x9de   : > { %7612 = vmatprep.mubr.msk.bf16.mxu1 %vm900_vm3, %v11320_v57 }
 0x9e5   : > { %7613 = vmatmul.mubr.msk.bf16.gmra.mrb[68].mxu1 %vm900_vm3, %v6335_v11 }
 0xa80   : > { %v10436_v53 = vpop.f32.mrb[40].mxu1 }
 0xa81   : > { %v10438_v15 = vpop.f32.mrb[41].mxu1 }
 0xa82   : > { %v10440_v40 = vpop.f32.mrb[42].mxu1 }
 0xa83   : > { %v8396_v58 = vpack.i.bf16 %v10440_v40, %v10436_v53  ;;  %v7814_v17 = vpack.c.bf16 %v10440_v40, %v10436_v53  ;;  %v10446_v45 = vpop.f32.mrb[43].mxu1 }
 0xa84   : > { %v8401_v12 = vpack.i.bf16 %v10446_v45, %v10438_v15  ;;  %v7810_v32 = vpack.c.bf16 %v10446_v45, %v10438_v15 }
 0xa85   : > { %8397 = vrot.lane.b32.xlu1 %v8396_v58, %s8587_s27 }
 0xa86   : > { %8402 = vrot.lane.b32.xlu0 %v8401_v12, %s8587_s27  ;;  %v10582_v12 = vpop.permute.xlu1 %5585 }
 0xa88   : > { %v10454_v25 = vpop.f32.mrb[44].mxu1 }
 0xa89   : > { %v10456_v14 = vpop.f32.mrb[45].mxu1 }
 0xa8a   : > { %v10458_v35 = vpop.f32.mrb[46].mxu1 }
 0xa8b   : > { %v8406_v23 = vpack.i.bf16 %v10458_v35, %v10454_v25  ;;  %v7822_v59 = vpack.c.bf16 %v10458_v35, %v10454_v25  ;;  %v10464_v63 = vpop.f32.mrb[47].mxu1 }
 0xa8c   : > { %v8411_v5 = vpack.i.bf16 %v10464_v63, %v10456_v14  ;;  %v7818_v46 = vpack.c.bf16 %v10464_v63, %v10456_v14 }
 0xa8d   : > { %8407 = vrot.lane.b32.xlu1 %v8406_v23, %s8587_s27  ;;  %v10586_v23 = vpop.permute.xlu1 %5589 }
 0xa8e   : > { %8412 = vrot.lane.b32.xlu0 %v8411_v5, %s8587_s27 }
 0xa90   : > { %v10472_v6 = vpop.f32.mrb[48].mxu1 }
 0xa91   : > { %v10474_v61 = vpop.f32.mrb[49].mxu1 }
 0xa92   : > { %v10476_v43 = vpop.f32.mrb[50].mxu1 }
 0xa93   : > { %v8416_v1 = vpack.i.bf16 %v10476_v43, %v10472_v6  ;;  %v7830_v0 = vpack.c.bf16 %v10476_v43, %v10472_v6  ;;  %v10482_v47 = vpop.f32.mrb[51].mxu1 }
 0xa94   : > { %v8421_v22 = vpack.i.bf16 %v10482_v47, %v10474_v61  ;;  %v7826_v60 = vpack.c.bf16 %v10482_v47, %v10474_v61 }
 0xa95   : > { %8417 = vrot.lane.b32.xlu1 %v8416_v1, %s8587_s27 }
 0xa96   : > { %8422 = vrot.lane.b32.xlu0 %v8421_v22, %s8587_s27 }
 0xa98   : > { %v10490_v27 = vpop.f32.mrb[52].mxu1 }
 0xa99   : > { %v10492_v16 = vpop.f32.mrb[53].mxu1 }
 0xa9a   : > { %v10494_v52 = vpop.f32.mrb[54].mxu1 }
 0xa9b   : > { %v8426_v55 = vpack.i.bf16 %v10494_v52, %v10490_v27  ;;  %v7838_v42 = vpack.c.bf16 %v10494_v52, %v10490_v27  ;;  %v10500_v48 = vpop.f32.mrb[55].mxu1 }
 0xa9c   : > { %v8431_v26 = vpack.i.bf16 %v10500_v48, %v10492_v16  ;;  %v7834_v29 = vpack.c.bf16 %v10500_v48, %v10492_v16 }
 0xa9d   : > { %8427 = vrot.lane.b32.xlu1 %v8426_v55, %s8587_s27  ;;  %v11332_v55 = vld [vmem:[#allocation13_spill] sm:$0xff] }
 0xa9e   : > { %8432 = vrot.lane.b32.xlu0 %v8431_v26, %s8587_s27  ;;  %v11333_v26 = vld [vmem:[#allocation11_spill] sm:$0xff] }
 0xaa0   : > { %v10508_v21 = vpop.f32.mrb[56].mxu1 }
 0xaa1   : > { %v10510_v9 = vpop.f32.mrb[57].mxu1 }
 0xaa2   : > { %v10512_v37 = vpop.f32.mrb[58].mxu1 }
 0xaa3   : > { %v8436_v34 = vpack.i.bf16 %v10512_v37, %v10508_v21  ;;  %v7812_v18 = vpack.c.bf16 %v10512_v37, %v10508_v21  ;;  %v10518_v57 = vpop.f32.mrb[59].mxu1 }
 0xaa4   : > { %v8441_v33 = vpack.i.bf16 %v10518_v57, %v10510_v9  ;;  %v7808_v3 = vpack.c.bf16 %v10518_v57, %v10510_v9 }
 0xaa5   : > { %8437 = vrot.lane.b32.xlu1 %v8436_v34, %s8587_s27 }
 0xaa6   : > { %8442 = vrot.lane.b32.xlu0 %v8441_v33, %s8587_s27  ;;  %7809 = vmatprep.subr.bf16.mxu0 %v7808_v3  ;;  %v11334_v33 = vld [vmem:[#allocation15_spill] sm:$0xff] }
 0xaa7   : > { %7811 = vmatpush3.bf16.msra.mxu0 %v7810_v32  ;;  %v10584_v32 = vpop.permute.xlu0 %5566 }
 0xaa8   : > { %v10526_v30 = vpop.f32.mrb[60].mxu1  ;;  %7813 = vmatprep.subr.bf16.mxu0 %v7812_v18 }
 0xaa9   : > { %v10528_v62 = vpop.f32.mrb[61].mxu1 }
 0xaaa   : > { %v10530_v13 = vpop.f32.mrb[62].mxu1 }
 0xaab   : > { %v8446_v8 = vpack.i.bf16 %v10530_v13, %v10526_v30  ;;  %v7820_v10 = vpack.c.bf16 %v10530_v13, %v10526_v30  ;;  %v10536_v38 = vpop.f32.mrb[63].mxu1  ;;  %7815 = vmatpush3.bf16.msra.mxu0 %v7814_v17 }
 0xaac   : > { %v8451_v4 = vpack.i.bf16 %v10536_v38, %v10528_v62  ;;  %v7816_v49 = vpack.c.bf16 %v10536_v38, %v10528_v62 }
 0xaad   : > { %8447 = vrot.lane.b32.xlu1 %v8446_v8, %s8587_s27  ;;  %v11335_v8 = vld [vmem:[#allocation12_spill] sm:$0xff] }
 0xaae   : > { %8452 = vrot.lane.b32.xlu0 %v8451_v4, %s8587_s27  ;;  %7817 = vmatprep.subr.bf16.mxu0 %v7816_v49 }
 0xaaf   : > { %7819 = vmatpush3.bf16.msra.mxu0 %v7818_v46 }
 0xab0   : > { %v10544_v51 = vpop.f32.mrb[64].mxu1  ;;  %7821 = vmatprep.subr.bf16.mxu0 %v7820_v10 }
 0xab1   : > { %v10546_v24 = vpop.f32.mrb[65].mxu1 }
 0xab2   : > { %v10548_v28 = vpop.f32.mrb[66].mxu1 }
 0xab3   : > { %v8456_v7 = vpack.i.bf16 %v10548_v28, %v10544_v51  ;;  %v7828_v41 = vpack.c.bf16 %v10548_v28, %v10544_v51  ;;  %v10554_v39 = vpop.f32.mrb[67].mxu1  ;;  %7823 = vmatpush3.bf16.msra.mxu0 %v7822_v59  ;;  %v10588_v59 = vpop.permute.xlu0 %5570 }
 0xab4   : > { %v8461_v54 = vpack.i.bf16 %v10554_v39, %v10546_v24  ;;  %v7824_v2 = vpack.c.bf16 %v10554_v39, %v10546_v24 }
 0xab5   : > { %8457 = vrot.lane.b32.xlu1 %v8456_v7, %s8587_s27 }
 0xab6   : > { %8462 = vrot.lane.b32.xlu0 %v8461_v54, %s8587_s27  ;;  %7825 = vmatprep.subr.bf16.mxu0 %v7824_v2 }
 0xab7   : > { %7827 = vmatpush3.bf16.msra.mxu0 %v7826_v60 }
 0xab8   : > { %v10562_v50 = vpop.f32.mrb[68].mxu1  ;;  %7829 = vmatprep.subr.bf16.mxu0 %v7828_v41 }
 0xab9   : > { %v10564_v56 = vpop.f32.mrb[69].mxu1 }
 0xaba   : > { %v10566_v44 = vpop.f32.mrb[70].mxu1 }
 0xabb   : > { %v8466_v19 = vpack.i.bf16 %v10566_v44, %v10562_v50  ;;  %v7836_v20 = vpack.c.bf16 %v10566_v44, %v10562_v50  ;;  %v10572_v11 = vpop.f32.mrb[71].mxu1  ;;  %7831 = vmatpush3.bf16.msra.mxu0 %v7830_v0 }
 0xabc   : > { %v8471_v58 = vpack.i.bf16 %v10572_v11, %v10564_v56  ;;  %v7832_v17 = vpack.c.bf16 %v10572_v11, %v10564_v56 }
 0xabd   : > { %8467 = vrot.lane.b32.xlu1 %v8466_v19, %s8587_s27 }
 0xabe   : > { %8472 = vrot.lane.b32.xlu0 %v8471_v58, %s8587_s27  ;;  %7833 = vmatprep.subr.bf16.mxu0 %v7832_v17  ;;  %v11336_v58 = vld [vmem:[#allocation21_spill] sm:$0xff]  ;;  %s8589_s27 = smov 24  }
 0xabf   : > { %7835 = vmatpush3.bf16.msra.mxu0 %v7834_v29 }
 0xac0   : > { %7837 = vmatprep.subr.bf16.mxu0 %v7836_v20 }
 0xac3   : > { %7839 = vmatpush3.bf16.msra.mxu0 %v7838_v42 }
 0xac6   : > { %4778 = vmatmul.mubr.f32.vlgmr.msra.gmra.mrb[68].mxu0 %v11161_v31 }
 0xac7   : > { %4916 = vmatprep.mubr.f32.mxu0 %v11161_v31 }
 0xaf7   : > { %v8398_v5 = vpop.permute.xlu1 %8397 }
 0xaf8   : > { %v8400_v46 = vunpack.i.h.bf16 %v8398_v5  ;;  %v8399_v1 = vunpack.i.l.bf16 %v8398_v5  ;;  %v8403_v0 = vpop.permute.xlu0 %8402  ;;  %v11337_v5 = vld [vmem:[#allocation17_spill] sm:$0xff] }
 0xaf9   : > { %v8405_v22 = vunpack.i.h.bf16 %v8403_v0  ;;  %v8404_v60 = vunpack.i.l.bf16 %v8403_v0 }
 0xafa   : > { %v5214_v42 = vsel %vm5050_vm8, %v11332_v55, %v8400_v46  ;;  %v5213_v29 = vsel %vm5050_vm8, %v11333_v26, %v8399_v1  ;;  %v11339_v55 = vld [vmem:[#allocation19_spill] sm:$0xff] }
 0xafb   : > { %v6490_v34 = vpack.c.bf16 %v5214_v42, %v5214_v42  ;;  %v6489_v18 = vpack.c.bf16 %v5213_v29, %v5213_v29  ;;  %v5212_v3 = vsel %vm5050_vm8, %v11334_v33, %v8405_v22  ;;  %v5211_v10 = vsel %vm5050_vm8, %v11335_v8, %v8404_v60  ;;  %v11338_v22 = vld [vmem:[#allocation48_spill] sm:$0xff] }
 0xafc   : > { %v6488_v4 = vpack.c.bf16 %v5212_v3, %v5212_v3  ;;  %v6487_v49 = vpack.c.bf16 %v5211_v10, %v5211_v10 }
 0xafd   : > { %6418 = vst.msk [vmem:[%s9816_s30 + $0x88] sm:$0xf] %vm5371_vm9, %v6489_v18  ;;  %6419 = vst.msk [vmem:[%s9816_s30 + $0x8c] sm:$0xf] %vm5371_vm9, %v6490_v34 }
 0xafe   : > { %6416 = vst.msk [vmem:[%s9816_s30 + $0x80] sm:$0xf] %vm5371_vm9, %v6487_v49  ;;  %6417 = vst.msk [vmem:[%s9816_s30 + $0x84] sm:$0xf] %vm5371_vm9, %v6488_v4  ;;  %v11340_v4 = vld [vmem:[#allocation54_spill] sm:$0xff] }
 0xaff   : > { %v8408_v7 = vpop.permute.xlu1 %8407 }
 0xb00   : > { %v8410_v41 = vunpack.i.h.bf16 %v8408_v7  ;;  %v8409_v54 = vunpack.i.l.bf16 %v8408_v7  ;;  %v8413_v2 = vpop.permute.xlu0 %8412  ;;  %v11341_v7 = vld [vmem:[#allocation47_spill] sm:$0xff] }
 0xb01   : > { %v8415_v19 = vunpack.i.h.bf16 %v8413_v2  ;;  %v8414_v20 = vunpack.i.l.bf16 %v8413_v2 }
 0xb02   : > { %v5218_v17 = vsel %vm5050_vm8, %v11336_v58, %v8410_v41  ;;  %v5217_v46 = vsel %vm5050_vm8, %v11337_v5, %v8409_v54  ;;  %v11343_v58 = vld [vmem:[#allocation50_spill] sm:$0xff] }
 0xb03   : > { %v6494_v1 = vpack.c.bf16 %v5218_v17, %v5218_v17  ;;  %v6493_v0 = vpack.c.bf16 %v5217_v46, %v5217_v46  ;;  %v5216_v60 = vsel %vm5050_vm8, %v11338_v22, %v8415_v19  ;;  %v5215_v42 = vsel %vm5050_vm8, %v11339_v55, %v8414_v20  ;;  %v11342_v19 = vld [vmem:[#allocation52_spill] sm:$0xff] }
 0xb04   : > { %v6492_v26 = vpack.c.bf16 %v5216_v60, %v5216_v60  ;;  %v6491_v29 = vpack.c.bf16 %v5215_v42, %v5215_v42 }
 0xb05   : > { %6422 = vst.msk [vmem:[%s9816_s30 + $0x98] sm:$0xf] %vm5371_vm9, %v6493_v0  ;;  %6423 = vst.msk [vmem:[%s9816_s30 + $0x9c] sm:$0xf] %vm5371_vm9, %v6494_v1 }
 0xb06   : > { %6420 = vst.msk [vmem:[%s9816_s30 + $0x90] sm:$0xf] %vm5371_vm9, %v6491_v29  ;;  %6421 = vst.msk [vmem:[%s9816_s30 + $0x94] sm:$0xf] %vm5371_vm9, %v6492_v26  ;;  %v11344_v26 = vld [vmem:[#allocation58_spill] sm:$0xff] }
 0xb07   : > { %v8418_v34 = vpop.permute.xlu1 %8417 }
 0xb08   : > { %v8420_v18 = vunpack.i.h.bf16 %v8418_v34  ;;  %v8419_v33 = vunpack.i.l.bf16 %v8418_v34  ;;  %v8423_v3 = vpop.permute.xlu0 %8422  ;;  %v11345_v34 = vld [vmem:[#allocation55_spill] sm:$0xff] }
 0xb09   : > { %v8425_v8 = vunpack.i.h.bf16 %v8423_v3  ;;  %v8424_v10 = vunpack.i.l.bf16 %v8423_v3 }
 0xb0a   : > { %v5222_v49 = vsel %vm5050_vm8, %v11340_v4, %v8420_v18  ;;  %v5221_v41 = vsel %vm5050_vm8, %v11341_v7, %v8419_v33  ;;  %v11347_v4 = vld [vmem:[#allocation53_spill] sm:$0xff] }
 0xb0b   : > { %v6498_v54 = vpack.c.bf16 %v5222_v49, %v5222_v49  ;;  %v6497_v2 = vpack.c.bf16 %v5221_v41, %v5221_v41  ;;  %v5220_v20 = vsel %vm5050_vm8, %v11342_v19, %v8425_v8  ;;  %v5219_v17 = vsel %vm5050_vm8, %v11343_v58, %v8424_v10  ;;  %v11346_v8 = vld [vmem:[#allocation56_spill] sm:$0xff] }
 0xb0c   : > { %v6496_v5 = vpack.c.bf16 %v5220_v20, %v5220_v20  ;;  %v6495_v46 = vpack.c.bf16 %v5219_v17, %v5219_v17 }
 0xb0d   : > { %6426 = vst.msk [vmem:[%s9816_s30 + $0xa8] sm:$0xf] %vm5371_vm9, %v6497_v2  ;;  %6427 = vst.msk [vmem:[%s9816_s30 + $0xac] sm:$0xf] %vm5371_vm9, %v6498_v54 }
 0xb0e   : > { %6424 = vst.msk [vmem:[%s9816_s30 + $0xa0] sm:$0xf] %vm5371_vm9, %v6495_v46  ;;  %6425 = vst.msk [vmem:[%s9816_s30 + $0xa4] sm:$0xf] %vm5371_vm9, %v6496_v5  ;;  %v11348_v5 = vld [vmem:[#allocation62_spill] sm:$0xff] }
 0xb0f   : > { %v8428_v1 = vpop.permute.xlu1 %8427 }
 0xb10   : > { %v8430_v0 = vunpack.i.h.bf16 %v8428_v1  ;;  %v8429_v22 = vunpack.i.l.bf16 %v8428_v1  ;;  %v8433_v60 = vpop.permute.xlu0 %8432  ;;  %v11349_v1 = vld [vmem:[#allocation59_spill] sm:$0xff] }
 0xb11   : > { %v8435_v55 = vunpack.i.h.bf16 %v8433_v60  ;;  %v8434_v42 = vunpack.i.l.bf16 %v8433_v60 }
 0xb12   : > { %v5226_v29 = vsel %vm5050_vm8, %v11344_v26, %v8430_v0  ;;  %v5225_v18 = vsel %vm5050_vm8, %v11345_v34, %v8429_v22  ;;  %v11351_v26 = vld [vmem:[#allocation57_spill] sm:$0xff] }
 0xb13   : > { %v6502_v33 = vpack.c.bf16 %v5226_v29, %v5226_v29  ;;  %v6501_v3 = vpack.c.bf16 %v5225_v18, %v5225_v18  ;;  %v5224_v10 = vsel %vm5050_vm8, %v11346_v8, %v8435_v55  ;;  %v5223_v49 = vsel %vm5050_vm8, %v11347_v4, %v8434_v42  ;;  %v11350_v55 = vld [vmem:[#allocation60_spill] sm:$0xff] }
 0xb14   : > { %v6500_v7 = vpack.c.bf16 %v5224_v10, %v5224_v10  ;;  %v6499_v41 = vpack.c.bf16 %v5223_v49, %v5223_v49 }
 0xb15   : > { %6430 = vst.msk [vmem:[%s9816_s30 + $0xb8] sm:$0xf] %vm5371_vm9, %v6501_v3  ;;  %6431 = vst.msk [vmem:[%s9816_s30 + $0xbc] sm:$0xf] %vm5371_vm9, %v6502_v33 }
 0xb16   : > { %6428 = vst.msk [vmem:[%s9816_s30 + $0xb0] sm:$0xf] %vm5371_vm9, %v6499_v41  ;;  %6429 = vst.msk [vmem:[%s9816_s30 + $0xb4] sm:$0xf] %vm5371_vm9, %v6500_v7  ;;  %v11352_v7 = vld [vmem:[#allocation66_spill] sm:$0xff] }
 0xb17   : > { %v8438_v54 = vpop.permute.xlu1 %8437 }
 0xb18   : > { %v8440_v2 = vunpack.i.h.bf16 %v8438_v54  ;;  %v8439_v19 = vunpack.i.l.bf16 %v8438_v54  ;;  %v8443_v20 = vpop.permute.xlu0 %8442  ;;  %v11353_v54 = vld [vmem:[#allocation63_spill] sm:$0xff] }
 0xb19   : > { %v8445_v58 = vunpack.i.h.bf16 %v8443_v20  ;;  %v8444_v17 = vunpack.i.l.bf16 %v8443_v20 }
 0xb1a   : > { %v5230_v46 = vsel %vm5050_vm8, %v11348_v5, %v8440_v2  ;;  %v5229_v0 = vsel %vm5050_vm8, %v11349_v1, %v8439_v19  ;;  %v11355_v5 = vld [vmem:[#allocation61_spill] sm:$0xff] }
 0xb1b   : > { %v6506_v22 = vpack.c.bf16 %v5230_v46, %v5230_v46  ;;  %v6505_v60 = vpack.c.bf16 %v5229_v0, %v5229_v0  ;;  %v5228_v42 = vsel %vm5050_vm8, %v11350_v55, %v8445_v58  ;;  %v5227_v29 = vsel %vm5050_vm8, %v11351_v26, %v8444_v17  ;;  %v11354_v58 = vld [vmem:[#allocation64_spill] sm:$0xff] }
 0xb1c   : > { %v6504_v34 = vpack.c.bf16 %v5228_v42, %v5228_v42  ;;  %v6503_v18 = vpack.c.bf16 %v5227_v29, %v5227_v29 }
 0xb1d   : > { %6434 = vst.msk [vmem:[%s9816_s30 + $0xc8] sm:$0xf] %vm5371_vm9, %v6505_v60  ;;  %6435 = vst.msk [vmem:[%s9816_s30 + $0xcc] sm:$0xf] %vm5371_vm9, %v6506_v22 }
 0xb1e   : > { %6432 = vst.msk [vmem:[%s9816_s30 + $0xc0] sm:$0xf] %vm5371_vm9, %v6503_v18  ;;  %6433 = vst.msk [vmem:[%s9816_s30 + $0xc4] sm:$0xf] %vm5371_vm9, %v6504_v34  ;;  %v11356_v34 = vld [vmem:[#allocation70_spill] sm:$0xff] }
 0xb1f   : > { %v8448_v33 = vpop.permute.xlu1 %8447 }
 0xb20   : > { %v8450_v3 = vunpack.i.h.bf16 %v8448_v33  ;;  %v8449_v8 = vunpack.i.l.bf16 %v8448_v33  ;;  %v8453_v10 = vpop.permute.xlu0 %8452  ;;  %v11357_v33 = vld [vmem:[#allocation67_spill] sm:$0xff] }
 0xb21   : > { %v8455_v4 = vunpack.i.h.bf16 %v8453_v10  ;;  %v8454_v49 = vunpack.i.l.bf16 %v8453_v10 }
 0xb22   : > { %v5234_v41 = vsel %vm5050_vm8, %v11352_v7, %v8450_v3  ;;  %v5233_v2 = vsel %vm5050_vm8, %v11353_v54, %v8449_v8  ;;  %v11359_v7 = vld [vmem:[#allocation65_spill] sm:$0xff] }
 0xb23   : > { %v6510_v19 = vpack.c.bf16 %v5234_v41, %v5234_v41  ;;  %v6509_v20 = vpack.c.bf16 %v5233_v2, %v5233_v2  ;;  %v5232_v17 = vsel %vm5050_vm8, %v11354_v58, %v8455_v4  ;;  %v5231_v46 = vsel %vm5050_vm8, %v11355_v5, %v8454_v49  ;;  %v11358_v4 = vld [vmem:[#allocation68_spill] sm:$0xff] }
 0xb24   : > { %v6508_v1 = vpack.c.bf16 %v5232_v17, %v5232_v17  ;;  %v6507_v0 = vpack.c.bf16 %v5231_v46, %v5231_v46 }
 0xb25   : > { %6438 = vst.msk [vmem:[%s9816_s30 + $0xd8] sm:$0xf] %vm5371_vm9, %v6509_v20  ;;  %6439 = vst.msk [vmem:[%s9816_s30 + $0xdc] sm:$0xf] %vm5371_vm9, %v6510_v19 }
 0xb26   : > { %6436 = vst.msk [vmem:[%s9816_s30 + $0xd0] sm:$0xf] %vm5371_vm9, %v6507_v0  ;;  %6437 = vst.msk [vmem:[%s9816_s30 + $0xd4] sm:$0xf] %vm5371_vm9, %v6508_v1  ;;  %v11360_v0 = vld [vmem:[#allocation71_spill] sm:$0xff] }
 0xb27   : > { %v8458_v22 = vpop.permute.xlu1 %8457 }
 0xb28   : > { %v8460_v60 = vunpack.i.h.bf16 %v8458_v22  ;;  %v8459_v55 = vunpack.i.l.bf16 %v8458_v22  ;;  %v8463_v42 = vpop.permute.xlu0 %8462 }
 0xb29   : > { %v8465_v26 = vunpack.i.h.bf16 %v8463_v42  ;;  %v8464_v29 = vunpack.i.l.bf16 %v8463_v42  ;;  %v11361_v42 = vld [vmem:[#allocation74_spill] sm:$0xff] }
 0xb2a   : > { %v5238_v18 = vsel %vm5050_vm8, %v11356_v34, %v8460_v60  ;;  %v5237_v3 = vsel %vm5050_vm8, %v11357_v33, %v8459_v55 }
 0xb2b   : > { %v6514_v8 = vpack.c.bf16 %v5238_v18, %v5238_v18  ;;  %v6513_v10 = vpack.c.bf16 %v5237_v3, %v5237_v3  ;;  %v5236_v49 = vsel %vm5050_vm8, %v11358_v4, %v8465_v26  ;;  %v5235_v41 = vsel %vm5050_vm8, %v11359_v7, %v8464_v29  ;;  %v11362_v29 = vld [vmem:[#allocation69_spill] sm:$0xff] }
 0xb2c   : > { %v6512_v54 = vpack.c.bf16 %v5236_v49, %v5236_v49  ;;  %v6511_v2 = vpack.c.bf16 %v5235_v41, %v5235_v41  ;;  %v11363_v4 = vld [vmem:[#allocation85_spill] sm:$0xff] }
 0xb2d   : > { %6442 = vst.msk [vmem:[%s9816_s30 + $0xe8] sm:$0xf] %vm5371_vm9, %v6513_v10  ;;  %6443 = vst.msk [vmem:[%s9816_s30 + $0xec] sm:$0xf] %vm5371_vm9, %v6514_v8 }
 0xb2e   : > { %6440 = vst.msk [vmem:[%s9816_s30 + $0xe0] sm:$0xf] %vm5371_vm9, %v6511_v2  ;;  %6441 = vst.msk [vmem:[%s9816_s30 + $0xe4] sm:$0xf] %vm5371_vm9, %v6512_v54 }
 0xb2f   : > { %v8468_v19 = vpop.permute.xlu1 %8467 }
 0xb30   : > { %v8470_v20 = vunpack.i.h.bf16 %v8468_v19  ;;  %v8469_v58 = vunpack.i.l.bf16 %v8468_v19  ;;  %v8473_v17 = vpop.permute.xlu0 %8472 }
 0xb31   : > { %v8475_v5 = vunpack.i.h.bf16 %v8473_v17  ;;  %v8474_v46 = vunpack.i.l.bf16 %v8473_v17 }
 0xb32   : > { %v5242_v1 = vsel %vm5050_vm8, %v10236_v36, %v8470_v20  ;;  %v5241_v22 = vsel %vm5050_vm8, %v11360_v0, %v8469_v58 }
 0xb33   : > { %v6518_v60 = vpack.c.bf16 %v5242_v1, %v5242_v1  ;;  %v6517_v55 = vpack.c.bf16 %v5241_v22, %v5241_v22  ;;  %v5240_v26 = vsel %vm5050_vm8, %v11361_v42, %v8475_v5  ;;  %v5239_v34 = vsel %vm5050_vm8, %v11362_v29, %v8474_v46 }
 0xb34   : > { %v6516_v18 = vpack.c.bf16 %v5240_v26, %v5240_v26  ;;  %v6515_v33 = vpack.c.bf16 %v5239_v34, %v5239_v34 }
 0xb35   : > { %6446 = vst.msk [vmem:[%s9816_s30 + $0xf8] sm:$0xf] %vm5371_vm9, %v6517_v55  ;;  %6447 = vst.msk [vmem:[%s9816_s30 + $0xfc] sm:$0xf] %vm5371_vm9, %v6518_v60 }
 0xb36   : > { %6444 = vst.msk [vmem:[%s9816_s30 + $0xf0] sm:$0xf] %vm5371_vm9, %v6515_v33  ;;  %6445 = vst.msk [vmem:[%s9816_s30 + $0xf4] sm:$0xf] %vm5371_vm9, %v6516_v18 }
 0xb99   : > { %v7034_v36 = vpop.f32.mrb[68].mxu0 }
 0xb9a   : > { %v7035_v3 = vpop.f32.mrb[69].mxu0 }
 0xb9b   : > { %v7036_v8 = vadd.f32 %v7035_v3, %v7034_v36 }
 0xb9d   : > { %v4783_v10 = vmul.f32 0.00390625, %v7036_v8  ;;  %5574 = vrot.lane.b32.xlu0 %v7036_v8, %s8589_s27 }
 0xb9f   : > { %v4787_v49 = vrot.slane %v4783_v10, %v11363_v4 }
 0xba1   : > { %v4788_v7 = vsub.f32 %v10438_v15, %v4787_v49  ;;  %v4789_v41 = vsub.f32 %v10446_v45, %v4787_v49  ;;  %v4790_v54 = vsub.f32 %v10436_v53, %v4787_v49  ;;  %v4791_v2 = vsub.f32 %v10440_v40, %v4787_v49 }
 0xba2   : > { %v4792_v19 = vsub.f32 %v10456_v14, %v4787_v49  ;;  %v4793_v20 = vsub.f32 %v10464_v63, %v4787_v49  ;;  %v4794_v58 = vsub.f32 %v10454_v25, %v4787_v49  ;;  %v4795_v17 = vsub.f32 %v10458_v35, %v4787_v49 }
 0xba3   : > { %v4796_v5 = vsub.f32 %v10474_v61, %v4787_v49  ;;  %v4797_v46 = vsub.f32 %v10482_v47, %v4787_v49  ;;  %v4798_v15 = vsub.f32 %v10472_v6, %v4787_v49  ;;  %v4799_v45 = vsub.f32 %v10476_v43, %v4787_v49 }
 0xba4   : > { %v4800_v53 = vsub.f32 %v10492_v16, %v4787_v49  ;;  %v4801_v40 = vsub.f32 %v10500_v48, %v4787_v49  ;;  %v4802_v14 = vsub.f32 %v10490_v27, %v4787_v49  ;;  %v4803_v63 = vsub.f32 %v10494_v52, %v4787_v49 }
 0xba5   : > { %v4804_v25 = vsub.f32 %v10510_v9, %v4787_v49  ;;  %v4805_v35 = vsub.f32 %v10518_v57, %v4787_v49  ;;  %v4806_v61 = vsub.f32 %v10508_v21, %v4787_v49  ;;  %v4807_v47 = vsub.f32 %v10512_v37, %v4787_v49 }
 0xba6   : > { %v4808_v6 = vsub.f32 %v10528_v62, %v4787_v49  ;;  %v4809_v43 = vsub.f32 %v10536_v38, %v4787_v49  ;;  %v4810_v16 = vsub.f32 %v10526_v30, %v4787_v49  ;;  %v4811_v48 = vsub.f32 %v10530_v13, %v4787_v49 }
 0xba7   : > { %v4812_v27 = vsub.f32 %v10546_v24, %v4787_v49  ;;  %v4813_v52 = vsub.f32 %v10554_v39, %v4787_v49  ;;  %v4814_v9 = vsub.f32 %v10544_v51, %v4787_v49  ;;  %v4815_v57 = vsub.f32 %v10548_v28, %v4787_v49 }
 0xba8   : > { %v4816_v21 = vsub.f32 %v10564_v56, %v4787_v49  ;;  %v4817_v37 = vsub.f32 %v10572_v11, %v4787_v49  ;;  %v4818_v62 = vsub.f32 %v10562_v50, %v4787_v49  ;;  %v4819_v38 = vsub.f32 %v10566_v44, %v4787_v49 }
 0xba9   : > { %v4820_v1 = vmul.f32 %v4788_v7, %v4788_v7  ;;  %v4821_v30 = vmul.f32 %v4789_v41, %v4789_v41  ;;  %v4822_v0 = vmul.f32 %v4790_v54, %v4790_v54  ;;  %v4823_v13 = vmul.f32 %v4791_v2, %v4791_v2 }
 0xbaa   : > { %v4824_v22 = vmul.f32 %v4792_v19, %v4792_v19  ;;  %v4825_v24 = vmul.f32 %v4793_v20, %v4793_v20  ;;  %v4826_v60 = vmul.f32 %v4794_v58, %v4794_v58  ;;  %v4827_v39 = vmul.f32 %v4795_v17, %v4795_v17 }
 0xbab   : > { %v4828_v55 = vmul.f32 %v4796_v5, %v4796_v5  ;;  %v4829_v51 = vmul.f32 %v4797_v46, %v4797_v46  ;;  %v4830_v42 = vmul.f32 %v4798_v15, %v4798_v15  ;;  %v4831_v28 = vmul.f32 %v4799_v45, %v4799_v45 }
 0xbac   : > { %v4832_v26 = vmul.f32 %v4800_v53, %v4800_v53  ;;  %v4833_v56 = vmul.f32 %v4801_v40, %v4801_v40  ;;  %v4834_v29 = vmul.f32 %v4802_v14, %v4802_v14  ;;  %v4835_v11 = vmul.f32 %v4803_v63, %v4803_v63 }
 0xbad   : > { %v4836_v34 = vmul.f32 %v4804_v25, %v4804_v25  ;;  %v4837_v50 = vmul.f32 %v4805_v35, %v4805_v35  ;;  %v4838_v18 = vmul.f32 %v4806_v61, %v4806_v61  ;;  %v4839_v44 = vmul.f32 %v4807_v47, %v4807_v47 }
 0xbae   : > { %v4840_v33 = vmul.f32 %v4808_v6, %v4808_v6  ;;  %v4841_v36 = vmul.f32 %v4809_v43, %v4809_v43  ;;  %v4842_v3 = vmul.f32 %v4810_v16, %v4810_v16  ;;  %v4843_v8 = vmul.f32 %v4811_v48, %v4811_v48  ;;  %v11364_v43 = vld [vmem:[#allocation84_spill] sm:$0xff] }
 0xbaf   : > { %v4844_v10 = vmul.f32 %v4812_v27, %v4812_v27  ;;  %v4845_v4 = vmul.f32 %v4813_v52, %v4813_v52  ;;  %v4846_v49 = vmul.f32 %v4814_v9, %v4814_v9  ;;  %v4847_v7 = vmul.f32 %v4815_v57, %v4815_v57 }
 0xbb0   : > { %v4848_v41 = vmul.f32 %v4816_v21, %v4816_v21  ;;  %v4849_v54 = vmul.f32 %v4817_v37, %v4817_v37  ;;  %v4850_v2 = vmul.f32 %v4818_v62, %v4818_v62  ;;  %v4851_v19 = vmul.f32 %v4819_v38, %v4819_v38  ;;  %v11365_v21 = vld [vmem:[#allocation25_spill] sm:$0xff]  ;;  %v5638_v38 = vld [vmem:[%s9816_s30 + $0x10] sm:$0xff] (%p8649_p5)  }
 0xbb1   : > { %v7840_v20 = vpack.c.bf16 %v4837_v50, %v4836_v34  ;;  %v7842_v58 = vpack.c.bf16 %v4821_v30, %v4820_v1  ;;  %v7846_v17 = vpack.c.bf16 %v4823_v13, %v4822_v0  ;;  %v7850_v5 = vpack.c.bf16 %v4825_v24, %v4824_v22  ;;  %v5642_v1 = vld [vmem:[%s9816_s30 + $0x18] sm:$0xff] (%p8649_p5)   ;;  %v5646_v30 = vld [vmem:[%s9816_s30 + $0x20] sm:$0xff] (%p8649_p5)   ;;  %v5650_v0 = vld [vmem:[%s9816_s30 + $0x28] sm:$0xff] (%p8649_p5)   ;;  %5639 = vst [vmem:[%s10777_s5 + $0x10] sm:$0xff] (%p8649_p5), %v5638_v38  }
 0xbb2   : > { %v7854_v46 = vpack.c.bf16 %v4827_v39, %v4826_v60  ;;  %v7858_v15 = vpack.c.bf16 %v4829_v51, %v4828_v55  ;;  %v7862_v45 = vpack.c.bf16 %v4831_v28, %v4830_v42  ;;  %v7866_v53 = vpack.c.bf16 %v4833_v56, %v4832_v26  ;;  %5643 = vst [vmem:[%s10777_s5 + $0x18] sm:$0xff] (%p8649_p5), %v5642_v1   ;;  %v5654_v13 = vld [vmem:[%s9816_s30 + $0x30] sm:$0xff] (%p8649_p5)   ;;  %v5658_v22 = vld [vmem:[%s9816_s30 + $0x38] sm:$0xff] (%p8649_p5)   ;;  %v5662_v24 = vld [vmem:[%s9816_s30 + $0x40] sm:$0xff] (%p8649_p5)  }
 0xbb3   : > { %7841 = vmatprep.subr.bf16.mxu0 %v7840_v20  ;;  %v7870_v40 = vpack.c.bf16 %v4835_v11, %v4834_v29  ;;  %v7844_v14 = vpack.c.bf16 %v4839_v44, %v4838_v18  ;;  %v7848_v63 = vpack.c.bf16 %v4841_v36, %v4840_v33  ;;  %v7852_v25 = vpack.c.bf16 %v4843_v8, %v4842_v3  ;;  %v5666_v60 = vld [vmem:[%s9816_s30 + $0x48] sm:$0xff] (%p8649_p5)   ;;  %v5670_v39 = vld [vmem:[%s9816_s30 + $0x50] sm:$0xff] (%p8649_p5)   ;;  %v5674_v55 = vld [vmem:[%s9816_s30 + $0x58] sm:$0xff] (%p8649_p5)  }
 0xbb4   : > { %7843 = vmatpush3.bf16.msra.mxu0 %v7842_v58  ;;  %v7856_v35 = vpack.c.bf16 %v4845_v4, %v4844_v10  ;;  %v7860_v61 = vpack.c.bf16 %v4847_v7, %v4846_v49  ;;  %v7864_v47 = vpack.c.bf16 %v4849_v54, %v4848_v41  ;;  %v7868_v6 = vpack.c.bf16 %v4851_v19, %v4850_v2  ;;  %v5678_v51 = vld [vmem:[%s9816_s30 + $0x60] sm:$0xff] (%p8649_p5)   ;;  %v5682_v42 = vld [vmem:[%s9816_s30 + $0x68] sm:$0xff] (%p8649_p5)   ;;  %v5686_v28 = vld [vmem:[%s9816_s30 + $0x70] sm:$0xff] (%p8649_p5)  }
 0xbb5   : > { %7845 = vmatprep.subr.bf16.mxu0 %v7844_v14  ;;  %v5577_v16 = vsel %vm5050_vm8, %v11364_v43, %v10584_v32  ;;  %v5596_v32 = vsel %vm5050_vm8, %v11365_v21, %v10582_v12  ;;  %v5630_v12 = vld [vmem:[%s9816_s30] sm:$0xff] (%p8649_p5)   ;;  %5647 = vst [vmem:[%s10777_s5 + $0x20] sm:$0xff] (%p8649_p5), %v5646_v30   ;;  %5651 = vst [vmem:[%s10777_s5 + $0x28] sm:$0xff] (%p8649_p5), %v5650_v0   ;;  %v5690_v26 = vld [vmem:[%s9816_s30 + $0x78] sm:$0xff] (%p8649_p5)  }
 0xbb6   : > { %v5579_v48 = vsel %vm5578_vm10, %v5577_v16, %v10588_v59  ;;  %v5597_v37 = vsel %vm5578_vm10, %v5596_v32, %v10586_v23  ;;  %v5634_v23 = vld [vmem:[%s9816_s30 + $0x8] sm:$0xff] (%p8649_p5)   ;;  %5631 = vst [vmem:[%s10777_s5] sm:$0xff] (%p8649_p5), %v5630_v12   ;;  %5655 = vst [vmem:[%s10777_s5 + $0x30] sm:$0xff] (%p8649_p5), %v5654_v13   ;;  %v5694_v56 = vld [vmem:[%s9816_s30 + $0x80] sm:$0xff] (%p8649_p5)  }
 0xbb7   : > { %5635 = vst [vmem:[%s10777_s5 + $0x8] sm:$0xff] (%p8649_p5), %v5634_v23   ;;  %5659 = vst [vmem:[%s10777_s5 + $0x38] sm:$0xff] (%p8649_p5), %v5658_v22   ;;  %v5698_v29 = vld [vmem:[%s9816_s30 + $0x88] sm:$0xff] (%p8649_p5)   ;;  %v5702_v11 = vld [vmem:[%s9816_s30 + $0x90] sm:$0xff] (%p8649_p5)  }
 0xbb8   : > { %7847 = vmatpush3.bf16.msra.mxu0 %v7846_v17  ;;  %5663 = vst [vmem:[%s10777_s5 + $0x40] sm:$0xff] (%p8649_p5), %v5662_v24   ;;  %5667 = vst [vmem:[%s10777_s5 + $0x48] sm:$0xff] (%p8649_p5), %v5666_v60   ;;  %v5706_v34 = vld [vmem:[%s9816_s30 + $0x98] sm:$0xff] (%p8649_p5)   ;;  %v5710_v50 = vld [vmem:[%s9816_s30 + $0xa0] sm:$0xff] (%p8649_p5)  }
 0xbb9   : > { %7849 = vmatprep.subr.bf16.mxu0 %v7848_v63  ;;  %5671 = vst [vmem:[%s10777_s5 + $0x50] sm:$0xff] (%p8649_p5), %v5670_v39   ;;  %5675 = vst [vmem:[%s10777_s5 + $0x58] sm:$0xff] (%p8649_p5), %v5674_v55   ;;  %v5714_v18 = vld [vmem:[%s9816_s30 + $0xa8] sm:$0xff] (%p8649_p5)   ;;  %v5718_v44 = vld [vmem:[%s9816_s30 + $0xb0] sm:$0xff] (%p8649_p5)  }
 0xbba   : > { %5679 = vst [vmem:[%s10777_s5 + $0x60] sm:$0xff] (%p8649_p5), %v5678_v51   ;;  %5683 = vst [vmem:[%s10777_s5 + $0x68] sm:$0xff] (%p8649_p5), %v5682_v42   ;;  %v5722_v33 = vld [vmem:[%s9816_s30 + $0xb8] sm:$0xff] (%p8649_p5)   ;;  %v5726_v36 = vld [vmem:[%s9816_s30 + $0xc0] sm:$0xff] (%p8649_p5)  }
 0xbbb   : > { %5687 = vst [vmem:[%s10777_s5 + $0x70] sm:$0xff] (%p8649_p5), %v5686_v28   ;;  %5691 = vst [vmem:[%s10777_s5 + $0x78] sm:$0xff] (%p8649_p5), %v5690_v26   ;;  %v5730_v3 = vld [vmem:[%s9816_s30 + $0xc8] sm:$0xff] (%p8649_p5)   ;;  %v5734_v8 = vld [vmem:[%s9816_s30 + $0xd0] sm:$0xff] (%p8649_p5)  }
 0xbbc   : > { %7851 = vmatpush3.bf16.msra.mxu0 %v7850_v5  ;;  %5695 = vst [vmem:[%s10777_s5 + $0x100] sm:$0xff] (%p8649_p5), %v5694_v56   ;;  %5699 = vst [vmem:[%s10777_s5 + $0x108] sm:$0xff] (%p8649_p5), %v5698_v29   ;;  %v5738_v10 = vld [vmem:[%s9816_s30 + $0xd8] sm:$0xff] (%p8649_p5)   ;;  %v5742_v4 = vld [vmem:[%s9816_s30 + $0xe0] sm:$0xff] (%p8649_p5)  }
 0xbbd   : > { %7853 = vmatprep.subr.bf16.mxu0 %v7852_v25  ;;  %5703 = vst [vmem:[%s10777_s5 + $0x110] sm:$0xff] (%p8649_p5), %v5702_v11   ;;  %5707 = vst [vmem:[%s10777_s5 + $0x118] sm:$0xff] (%p8649_p5), %v5706_v34   ;;  %v5746_v49 = vld [vmem:[%s9816_s30 + $0xe8] sm:$0xff] (%p8649_p5)   ;;  %v5750_v7 = vld [vmem:[%s9816_s30 + $0xf0] sm:$0xff] (%p8649_p5)  }
 0xbbe   : > { %5711 = vst [vmem:[%s10777_s5 + $0x120] sm:$0xff] (%p8649_p5), %v5710_v50   ;;  %5715 = vst [vmem:[%s10777_s5 + $0x128] sm:$0xff] (%p8649_p5), %v5714_v18   ;;  %v5754_v41 = vld [vmem:[%s9816_s30 + $0xf8] sm:$0xff] (%p8649_p5)  }
 0xbbf   : > { %5719 = vst [vmem:[%s10777_s5 + $0x130] sm:$0xff] (%p8649_p5), %v5718_v44   ;;  %5723 = vst [vmem:[%s10777_s5 + $0x138] sm:$0xff] (%p8649_p5), %v5722_v33  }
 0xbc0   : > { %7855 = vmatpush3.bf16.msra.mxu0 %v7854_v46  ;;  %5727 = vst [vmem:[%s10777_s5 + $0x140] sm:$0xff] (%p8649_p5), %v5726_v36   ;;  %5731 = vst [vmem:[%s10777_s5 + $0x148] sm:$0xff] (%p8649_p5), %v5730_v3  }
 0xbc1   : > { %7857 = vmatprep.subr.bf16.mxu0 %v7856_v35  ;;  %5735 = vst [vmem:[%s10777_s5 + $0x150] sm:$0xff] (%p8649_p5), %v5734_v8   ;;  %5739 = vst [vmem:[%s10777_s5 + $0x158] sm:$0xff] (%p8649_p5), %v5738_v10  }
 0xbc2   : > { %5743 = vst [vmem:[%s10777_s5 + $0x160] sm:$0xff] (%p8649_p5), %v5742_v4   ;;  %5747 = vst [vmem:[%s10777_s5 + $0x168] sm:$0xff] (%p8649_p5), %v5746_v49  }
 0xbc3   : > { %5751 = vst [vmem:[%s10777_s5 + $0x170] sm:$0xff] (%p8649_p5), %v5750_v7   ;;  %5755 = vst [vmem:[%s10777_s5 + $0x178] sm:$0xff] (%p8649_p5), %v5754_v41  }
 0xbc4   : > { %7859 = vmatpush3.bf16.msra.mxu0 %v7858_v15 }
 0xbc5   : > { %7861 = vmatprep.subr.bf16.mxu0 %v7860_v61 }
 0xbc8   : > { %7863 = vmatpush3.bf16.msra.mxu0 %v7862_v45 }
 0xbc9   : > { %7865 = vmatprep.subr.bf16.mxu0 %v7864_v47 }
 0xbcc   : > { %7867 = vmatpush3.bf16.msra.mxu0 %v7866_v53 }
 0xbcd   : > { %7869 = vmatprep.subr.bf16.mxu0 %v7868_v6 }
 0xbd0   : > { %7871 = vmatpush3.bf16.msra.mxu0 %v7870_v40 }
 0xbd3   : > { %4917 = vmatmul.mubr.f32.vlgmr.msra.gmra.mrb[70].mxu0 %v11161_v31 }
 0xc0f   : > { %v5575_v27 = vpop.permute.xlu0 %5574 }
 0xc10   : > { %v5581_v52 = vsel %vm5580_vm11, %v5579_v48, %v5575_v27 }
 0xc11   : > { %5583 = vst.msk [vmem:[%s10758_s8] sm:$0x1] %vm5582_vm12, %v5581_v52 }
 0xca6   : > { %v7069_v9 = vpop.f32.mrb[70].mxu0 }
 0xca7   : > { %v7070_v31 = vpop.f32.mrb[71].mxu0 }
 0xca8   : > { %v7071_v57 = vadd.f32 %v7070_v31, %v7069_v9 }
 0xcaa   : > { %5593 = vrot.lane.b32.xlu1 %v7071_v57, %s8589_s27 }
 0xd18   : > { %5611 = sbr.rel (!%p8649_p5) target bundleno = 3359 (0xd1f), region = 32 }
 0xd1c   : > { %v5594_v62 = vpop.permute.xlu1 %5593 }
 0xd1d   : > { %v5598_v59 = vsel %vm5580_vm11, %v5597_v37, %v5594_v62 }
 0xd1e   : > { %5599 = vst.msk [vmem:[%s10758_s8 + $0x1] sm:$0x1] %vm5582_vm12, %v5598_v59 }
 0xd1f PF: > { %s6452_s19 = sshll.u32 %s8632_s16, 5  ;;  %s5915_s20 = sshll.u32 %s10758_s8, 4  ;;  %s5916_s20 = int_to_ptr.vmem [resolvable:$true] %s5915_s20 }
 0xd20   : > { %s5913_s26 = scalar_lea.hbm %s10879_s3, %s6452_s19  ;;  %s8522_s29 = scalar_lea.vmem %s5916_s20, 32 }
 0xd21   : > { %p8523_p11 = scmp.ne.s32.totalorder %s5916_s20, %s8522_s29  ;;  %s8590_s4 = smov [#allocation3]  }
 0xd22   : > { %s8526_s30 = sshll.u32 %s8590_s4, 4  ;;  %s8527_s30 = int_to_ptr.vmem [resolvable:$false] %s8526_s30 }
 0xd23   : > { %p8524_p12 = pnand %p8523_p11, %p8649_p5  ;;  %s8528_s6 = scalar_lea.vmem %s8527_s30, 64 }
 0xd24   : > { %p8529_p0 = scmp.lt.s32.totalorder %s5916_s20, %s8527_s30  ;;  %p8530_p1 = scmp.lt.s32.totalorder %s8528_s6, %s8522_s29 }
 0xd25   : > { %p8525_p13 = pneg %p8524_p12 }
 0xd26   : > { %p8531_p2 = por %p8530_p1, %p8529_p0 }
 0xd28   : > { %p8532_p3 = pnand %p8531_p2, %p8525_p13 }
 0xd2a   : > { %8535 = shalt.err (!%p8532_p3)
}
 0xd2b   : > { %s8536_s16 = scalar_lea.hbm %s5913_s26, 32  ;;  %s8540_s8 = scalar_lea.hbm %s10879_s3, 64 }
 0xd2c   : > { %p8537_p4 = scmp.ne.s32.totalorder %s5913_s26, %s8536_s16  ;;  %p8541_p9 = scmp.lt.u32.totalorder %s5913_s26, %s10879_s3 }
 0xd2d   : > { %p8542_p10 = scmp.lt.u32.totalorder %s8540_s8, %s8536_s16  ;;  %p8544_p12 = scmp.lt.u32.totalorder %s8536_s16, %s5913_s26 }
 0xd2e   : > { %p8538_p7 = pnand %p8537_p4, %p8649_p5 }
 0xd2f   : > { %p8543_p11 = por %p8542_p10, %p8541_p9 }
 0xd30   : > { %p8539_p8 = pneg %p8538_p7 }
 0xd31   : > { %p8545_p0 = por %p8544_p12, %p8543_p11 }
 0xd33   : > { %p8546_p13 = pnand %p8545_p0, %p8539_p8 }
 0xd35   : > { %8549 = shalt.err (!%p8546_p13)
}
 0xd36   : > { %8273 = dma.vmem_to_hbm [thread:$0]  (%p8649_p5), %s5916_s20, 32, %s5913_s26, %s5605_s9  }
 0xd37 PF: > { %p8279_p1 = scmp.ge.s32.totalorder %s8584_s15, 2  ;;  %s5934_s17 = sand.u32 1, %s8572_s12  }
 0xd38   : > { %s5935_s5 = scalar_lea.sflag [#allocation4], %s5934_s17 }
 0xd39   : > { %p8276_p2 = pnand %p8279_p1, %p8653_p6 }
 0xd3b   : > { %8567 = dma.done.wait (!%p8276_p2), %s5935_s5, 32  }
 0xd3c   : > { %8569 = vsyncadd (!%p8276_p2), %s5935_s5, 4294967264  ;;  %p14_p3 = scmp.ge.s32.totalorder %s8636_s18, 4   ;;  %s11366_s12 = smov %s8576_s13 }
 0xd3d   : > { %s11367_s13 = smov %s8580_s14  ;;  %s11368_s14 = smov %s8647_s21 }
 0xd3e   : > { %s11369_s15 = smov %s8636_s18  ;;  %16 = sbr.rel (!%p14_p3) target bundleno = 3 (0x3), region = 132 }
 0xd45   :  { %5940 = vsyncpa [#allocation4], 1 }
 0xd46   :  { %5942 = vsyncpa [#allocation4 + $0x1], 1 }

</bundles_post_ra>
